<compile_context>
chip_gen: v7x
topology: tpu7x:2x2x1
jax: 0.10.0
libtpu: 0.0.40
codegen_flags: <defaults>
</compile_context>

<pallas_src>
import functools

import jax
import jax.numpy as jnp
from jax.experimental import pallas as pl
from jax.experimental.pallas import tpu as pltpu


def _round_up(x, m):
    return -(-x // m) * m


def _vmem_capacity_bytes():
    try:
        info = pltpu.get_tpu_info()
        cap = getattr(info, "vmem_capacity_bytes", None)
        if cap:
            return int(cap)
    except Exception:
        pass
    return 64 << 20  # conservative (v7x-sized) default


def _conv_transpose2x_kernel(x_ref, w_ref, b_ref, o_ref, *,
                             n_rows, halo_h, w_pad, KH, KW, TC):
    # x_ref : (1, 1, (n_rows+halo_h)*w_pad, C_in)  bf16  haloed row block, channels-last
    # w_ref : (1, C_in, KH*KW*TC)                  bf16  this C_out tile's weights, tap-major
    # b_ref : (1, TC)                              f32
    # o_ref : (1, 2, 2, n_rows, w_pad, TC)               phase-separated output block
    R = n_rows + halo_h

    # One fused MXU matmul covering every (kh, kw) tap of this C_out tile.
    y = jnp.dot(x_ref[0, 0], w_ref[0], preferred_element_type=jnp.float32)
    y = y.reshape(R, w_pad, KH * KW * TC)        # free retiling: w_pad % 8 == 0
    y = y.astype(jnp.bfloat16)                   # halve the dominant VMEM intermediate

    # Bias broadcast hoisted once (used as the initializer of every phase).
    bias_b = jnp.broadcast_to(
        b_ref[...].astype(jnp.float32).reshape(1, 1, TC), (n_rows, w_pad, TC))

    # Transposed-conv scatter: oh = 2*ih + kh with kh = 2*qh + rh.
    # Phase (rh, rw) row h' = ih + qh  -> free leading-dim slice of y (the halo rows).
    # Column shift by qw               -> XLU roll; wrap-around hits the zero W pad.
    for rh in range(2):
        for rw in range(2):
            acc = bias_b
            for qh in range((KH - rh + 1) // 2):
                rows = halo_h - qh                      # static offset, free slice
                for qw in range((KW - rw + 1) // 2):
                    k = (2 * qh + rh) * KW + (2 * qw + rw)
                    tap = y[rows:rows + n_rows, :, k * TC:(k + 1) * TC]
                    tap = tap.astype(jnp.float32)       # accumulate in f32 (v5e-safe)
                    if qw:
                        tap = pltpu.roll(tap, shift=qw, axis=1)
                    acc = acc + tap
            o_ref[0, rh, rw] = acc.astype(o_ref.dtype)  # single store per phase


def transposed_upsample(x_nchw, weight, bias, *, cout_tile=None, h_tile=None,
                        out_dtype=None):
    """ConvTranspose2d(C_in, C_out, ks, stride=2, padding=0) forward pass.

    x_nchw : (N, C_in, H, W)
    weight : (C_in, C_out, KH, KW)   (PyTorch ConvTranspose2d layout)
    bias   : (C_out,)
    returns (N, C_out, 2*(H-1)+KH, 2*(W-1)+KW) in `out_dtype` (default: x.dtype)
    """
    N, C_in, H, W = x_nchw.shape
    wc_in, C_out, KH, KW = weight.shape
    assert wc_in == C_in
    out_dtype = out_dtype or x_nchw.dtype

    stride = 2
    H_out = (H - 1) * stride + KH
    W_out = (W - 1) * stride + KW
    halo_h = (KH - 1) // 2
    halo_w = (KW - 1) // 2

    vmem_cap = _vmem_capacity_bytes()
    big_vmem = vmem_cap >= (96 << 20)                 # v5e/v6e (128 MiB) vs v7x (64 MiB)
    vmem_limit = int(min(vmem_cap * 0.75, 100 << 20))  # ~48 MiB on v7x, ~96 MiB on v5e/v6e

    # ---- C_out tiling (largest 128-multiple divisor <= 256; 256 only on big-VMEM) ----
    if cout_tile is None:
        if C_out % 256 == 0 and big_vmem:
            cout_tile = 256          # v6e-class: feeds the 256-wide MXU, halves weight DMAs
        elif C_out % 128 == 0:
            cout_tile = 128          # v7x / v5e: lane-dense under the tighter VMEM budget
        else:
            cout_tile = C_out        # small / odd channel counts: single tile
    assert C_out % cout_tile == 0
    num_tc = C_out // cout_tile

    # ---- spatial tiling -------------------------------------------------------------
    # W padded to a multiple of 8: unmasked phase stores, free in-kernel reshape, and
    # the zero wrap-around region for the qw column rolls.
    w_pad = _round_up(W + halo_w, 8)
    hp = H + halo_h                                   # phase-output rows
    out_bytes = jnp.dtype(out_dtype).itemsize

    def step_bytes(th):                               # per-grid-step VMEM footprint estimate
        r = th + halo_h
        taps = KH * KW * cout_tile
        return (2 * r * w_pad * C_in * 2              # x block (x2 buffers, bf16)
                + 2 * C_in * taps * 2                 # w block (x2 buffers, bf16)
                + r * w_pad * taps * (4 + 2)          # f32 dot result + bf16 y copy
                + 2 * 4 * th * w_pad * cout_tile * out_bytes   # output block (x2 buffers)
                + 2 * th * w_pad * cout_tile * 4)     # phase accumulators

    if h_tile is None:
        target = 16 if big_vmem else 8
        h_tile = hp if hp <= 2 * target else target   # small images: one tile, no halo waste
        while h_tile > 4 and step_bytes(h_tile) > int(0.6 * vmem_limit):
            h_tile = max(4, h_tile // 2)
    num_ht = -(-hp // h_tile)
    h_tile = -(-hp // num_ht)                         # rebalance: minimise padded rows
    hp_pad = num_ht * h_tile

    # ---- layout plumbing (fused by XLA into the HBM staging passes) -------------------
    # Input: NCHW -> channels-last, zero-padded in W (roll wrap-around region) and H
    # (top halo + bottom fill), then gathered into overlapping row tiles so every grid
    # step sees its 2-row halo without in-kernel DMA.
    x = jnp.transpose(x_nchw, (0, 2, 3, 1))                            # (N, H, W, C_in)
    x = jnp.pad(x, ((0, 0), (halo_h, hp_pad - H), (0, w_pad - W), (0, 0)))
    row_idx = (jnp.arange(num_ht)[:, None] * h_tile
               + jnp.arange(h_tile + halo_h)[None, :])                 # (T, th+halo)
    x = x[:, row_idx]                                                  # (N, T, th+halo, w_pad, C_in)
    x = x.reshape(N, num_ht, (h_tile + halo_h) * w_pad, C_in).astype(jnp.bfloat16)

    # Weight: (C_in, C_out, KH, KW) -> (num_tc, C_in, KH*KW*cout_tile), tap-major.
    w = jnp.transpose(weight, (2, 3, 0, 1)).reshape(KH * KW, C_in, num_tc, cout_tile)
    w = jnp.transpose(w, (2, 1, 0, 3)).reshape(num_tc, C_in, KH * KW * cout_tile)
    w = w.astype(jnp.bfloat16)
    b2 = bias.reshape(1, C_out).astype(jnp.float32)

    kernel = functools.partial(
        _conv_transpose2x_kernel,
        n_rows=h_tile, halo_h=halo_h, w_pad=w_pad, KH=KH, KW=KW, TC=cout_tile)

    m_in = (h_tile + halo_h) * w_pad

    # Grid (N, H_tiles, C_out_tiles), C_out innermost: x's index map is constant across
    # it (row block stays VMEM-resident, only the weight slice re-DMAs per step).
    acc = pl.pallas_call(
        kernel,
        out_shape=jax.ShapeDtypeStruct((N, 2, 2, hp_pad, w_pad, C_out), out_dtype),
        grid=(N, num_ht, num_tc),
        in_specs=[
            pl.BlockSpec((1, 1, m_in, C_in), lambda n, t, j: (n, t, 0, 0)),
            pl.BlockSpec((1, C_in, KH * KW * cout_tile), lambda n, t, j: (j, 0, 0)),
            pl.BlockSpec((1, cout_tile), lambda n, t, j: (0, j)),
        ],
        out_specs=pl.BlockSpec((1, 2, 2, h_tile, w_pad, cout_tile),
                               lambda n, t, j: (n, 0, 0, t, 0, j)),
        compiler_params=pltpu.CompilerParams(
            dimension_semantics=("parallel", "parallel", "parallel"),
            vmem_limit_bytes=vmem_limit,
        ),
    )(x, w, b2)

    # Interleave the 4 phases and return NCHW (module semantics):
    #   out[n, c, 2h'+rh, 2w'+rw] = acc[n, rh, rw, h', w', c]
    # One transpose + free reshape + crop, done in out_dtype (bf16 halves this pass
    # when the caller runs the module in bf16).
    out = jnp.transpose(acc, (0, 5, 3, 1, 4, 2)).reshape(N, C_out, 2 * hp_pad, 2 * w_pad)
    return out[:, :, :H_out, :W_out]


def _reference_conv_transpose(x, w, b, stride=2):
    """Direct transcription of ConvTranspose2d semantics (pure JAX, f32, for checking)."""
    N, C_in, H, W = x.shape
    _, C_out, KH, KW = w.shape
    H_out = (H - 1) * stride + KH
    W_out = (W - 1) * stride + KW
    out = jnp.zeros((N, C_out, H_out, W_out), jnp.float32) + b[None, :, None, None]
    for kh in range(KH):
        for kw in range(KW):
            tap = jnp.einsum("nchw,cd->ndhw", x, w[:, :, kh, kw])
            out = out.at[:, :, kh:kh + stride * H:stride, kw:kw + stride * W:stride].add(tap)
    return out


if __name__ == "__main__":
    key = jax.random.PRNGKey(0)
    k_x, k_w, k_b = jax.random.split(key, 3)

    N, C, H, W = 2, 4, 16, 16
    C_out, ks = 4, 5

    x = jax.random.normal(k_x, (N, C, H, W), jnp.float32)
    # ConvTranspose2d weight shape: (in_channels, out_channels, KH, KW)
    weight = jax.random.normal(k_w, (C, C_out, ks, ks), jnp.float32) * 0.1
    bias = jax.random.normal(k_b, (C_out,), jnp.float32) * 0.1

    fn = jax.jit(lambda a, b, c: transposed_upsample(a, b, c))
    out = fn(x, weight, bias)
    out = jax.block_until_ready(out)

    ref = _reference_conv_transpose(x, weight, bias)
    assert out.shape == (N, C_out, 2 * H + 3, 2 * W + 3), out.shape
    # bf16 matmul operands + bf16 tap re-read with f32 accumulation -> loosened tolerance.
    max_err = float(jnp.max(jnp.abs(out - ref)))
    assert jnp.allclose(out, ref, atol=5e-2, rtol=5e-2), max_err

    print("KERNEL_OK")
</pallas_src>

<mosaic_0001>
module attributes {stable_mosaic.version = 11 : i64} {
  func.func @_conv_transpose2x_kernel(%arg0: i32, %arg1: i32, %arg2: i32, %arg3: memref<1x1x192x4xbf16, #tpu.memory_space<vmem>>, %arg4: memref<1x4x100xbf16, #tpu.memory_space<vmem>>, %arg5: memref<1x4xf32, #tpu.memory_space<vmem>>, %arg6: memref<1x2x2x6x24x4xf32, #tpu.memory_space<vmem>>) attributes {dimension_semantics = [#tpu.dimension_semantics<parallel>, #tpu.dimension_semantics<parallel>, #tpu.dimension_semantics<parallel>], iteration_bounds = array<i64: 2, 3, 1>, scalar_prefetch = 0 : i64, scratch_operands = 0 : i64, tpu.core_type = #tpu.core_type<tc>, window_params = [{transform_indices = @transform_0, window_bounds = array<i64: 1, 1, 192, 4>}, {transform_indices = @transform_1, window_bounds = array<i64: 1, 4, 100>}, {transform_indices = @transform_2, window_bounds = array<i64: 1, 4>}, {transform_indices = @transform_3, window_bounds = array<i64: 1, 2, 2, 6, 24, 4>}]} {
    %c0 = arith.constant 0 : index
    %c0_0 = arith.constant 0 : index
    %c0_1 = arith.constant 0 : index
    %c0_2 = arith.constant 0 : index
    %0 = vector.load %arg3[%c0, %c0_0, %c0_1, %c0_2] : memref<1x1x192x4xbf16, #tpu.memory_space<vmem>>, vector<1x1x192x4xbf16>
    %1 = vector.shape_cast %0 : vector<1x1x192x4xbf16> to vector<192x4xbf16>
    %c0_3 = arith.constant 0 : index
    %c0_4 = arith.constant 0 : index
    %c0_5 = arith.constant 0 : index
    %2 = vector.load %arg4[%c0_3, %c0_4, %c0_5] : memref<1x4x100xbf16, #tpu.memory_space<vmem>>, vector<1x4x100xbf16>
    %3 = vector.shape_cast %2 : vector<1x4x100xbf16> to vector<4x100xbf16>
    %cst = arith.constant dense<0.000000e+00> : vector<192x100xf32>
    %4 = tpu.matmul %1, %3, %cst {dimension_numbers = #tpu.dot_dimension_numbers<[1], [0], [0], [1], [0, 0, 1, 1], [], []>} : vector<192x4xbf16>, vector<4x100xbf16>, vector<192x100xf32> -> vector<192x100xf32>
    %5 = vector.shape_cast %4 : vector<192x100xf32> to vector<8x24x100xf32>
    %6 = arith.truncf %5 : vector<8x24x100xf32> to vector<8x24x100xbf16>
    %c0_6 = arith.constant 0 : index
    %c0_7 = arith.constant 0 : index
    %7 = vector.load %arg5[%c0_6, %c0_7] : memref<1x4xf32, #tpu.memory_space<vmem>>, vector<1x4xf32>
    %8 = vector.shape_cast %7 : vector<1x4xf32> to vector<1x1x4xf32>
    %9 = vector.shape_cast %8 : vector<1x1x4xf32> to vector<1x1x4xf32>
    %10 = vector.broadcast %9 : vector<1x1x4xf32> to vector<6x24x4xf32>
    %11 = vector.extract_strided_slice %6 {offsets = [2, 0, 0], sizes = [6, 24, 4], strides = [1, 1, 1]} : vector<8x24x100xbf16> to vector<6x24x4xbf16>
    %12 = arith.extf %11 : vector<6x24x4xbf16> to vector<6x24x4xf32>
    %13 = arith.addf %10, %12 : vector<6x24x4xf32>
    %14 = vector.extract_strided_slice %6 {offsets = [2, 0, 8], sizes = [6, 24, 4], strides = [1, 1, 1]} : vector<8x24x100xbf16> to vector<6x24x4xbf16>
    %15 = arith.extf %14 : vector<6x24x4xbf16> to vector<6x24x4xf32>
    %c1_i32 = arith.constant 1 : i32
    %16 = tpu.dynamic_rotate %15 by %c1_i32 dim 1 : vector<6x24x4xf32>, i32 -> vector<6x24x4xf32>
    %17 = arith.addf %13, %16 : vector<6x24x4xf32>
    %18 = vector.extract_strided_slice %6 {offsets = [2, 0, 16], sizes = [6, 24, 4], strides = [1, 1, 1]} : vector<8x24x100xbf16> to vector<6x24x4xbf16>
    %19 = arith.extf %18 : vector<6x24x4xbf16> to vector<6x24x4xf32>
    %c2_i32 = arith.constant 2 : i32
    %20 = tpu.dynamic_rotate %19 by %c2_i32 dim 1 : vector<6x24x4xf32>, i32 -> vector<6x24x4xf32>
    %21 = arith.addf %17, %20 : vector<6x24x4xf32>
    %22 = vector.extract_strided_slice %6 {offsets = [1, 0, 40], sizes = [6, 24, 4], strides = [1, 1, 1]} : vector<8x24x100xbf16> to vector<6x24x4xbf16>
    %23 = arith.extf %22 : vector<6x24x4xbf16> to vector<6x24x4xf32>
    %24 = arith.addf %21, %23 : vector<6x24x4xf32>
    %25 = vector.extract_strided_slice %6 {offsets = [1, 0, 48], sizes = [6, 24, 4], strides = [1, 1, 1]} : vector<8x24x100xbf16> to vector<6x24x4xbf16>
    %26 = arith.extf %25 : vector<6x24x4xbf16> to vector<6x24x4xf32>
    %c1_i32_8 = arith.constant 1 : i32
    %27 = tpu.dynamic_rotate %26 by %c1_i32_8 dim 1 : vector<6x24x4xf32>, i32 -> vector<6x24x4xf32>
    %28 = arith.addf %24, %27 : vector<6x24x4xf32>
    %29 = vector.extract_strided_slice %6 {offsets = [1, 0, 56], sizes = [6, 24, 4], strides = [1, 1, 1]} : vector<8x24x100xbf16> to vector<6x24x4xbf16>
    %30 = arith.extf %29 : vector<6x24x4xbf16> to vector<6x24x4xf32>
    %c2_i32_9 = arith.constant 2 : i32
    %31 = tpu.dynamic_rotate %30 by %c2_i32_9 dim 1 : vector<6x24x4xf32>, i32 -> vector<6x24x4xf32>
    %32 = arith.addf %28, %31 : vector<6x24x4xf32>
    %33 = vector.extract_strided_slice %6 {offsets = [0, 0, 80], sizes = [6, 24, 4], strides = [1, 1, 1]} : vector<8x24x100xbf16> to vector<6x24x4xbf16>
    %34 = arith.extf %33 : vector<6x24x4xbf16> to vector<6x24x4xf32>
    %35 = arith.addf %32, %34 : vector<6x24x4xf32>
    %36 = vector.extract_strided_slice %6 {offsets = [0, 0, 88], sizes = [6, 24, 4], strides = [1, 1, 1]} : vector<8x24x100xbf16> to vector<6x24x4xbf16>
    %37 = arith.extf %36 : vector<6x24x4xbf16> to vector<6x24x4xf32>
    %c1_i32_10 = arith.constant 1 : i32
    %38 = tpu.dynamic_rotate %37 by %c1_i32_10 dim 1 : vector<6x24x4xf32>, i32 -> vector<6x24x4xf32>
    %39 = arith.addf %35, %38 : vector<6x24x4xf32>
    %40 = vector.extract_strided_slice %6 {offsets = [0, 0, 96], sizes = [6, 24, 4], strides = [1, 1, 1]} : vector<8x24x100xbf16> to vector<6x24x4xbf16>
    %41 = arith.extf %40 : vector<6x24x4xbf16> to vector<6x24x4xf32>
    %c2_i32_11 = arith.constant 2 : i32
    %42 = tpu.dynamic_rotate %41 by %c2_i32_11 dim 1 : vector<6x24x4xf32>, i32 -> vector<6x24x4xf32>
    %43 = arith.addf %39, %42 : vector<6x24x4xf32>
    %c0_12 = arith.constant 0 : index
    %c0_13 = arith.constant 0 : index
    %c0_14 = arith.constant 0 : index
    %c0_15 = arith.constant 0 : index
    %c0_16 = arith.constant 0 : index
    %c0_17 = arith.constant 0 : index
    %44 = vector.load %arg6[%c0_12, %c0_13, %c0_14, %c0_15, %c0_16, %c0_17] : memref<1x2x2x6x24x4xf32, #tpu.memory_space<vmem>>, vector<1x1x1x6x24x4xf32>
    %45 = vector.shape_cast %44 : vector<1x1x1x6x24x4xf32> to vector<6x24x4xf32>
    %46 = vector.shape_cast %43 : vector<6x24x4xf32> to vector<1x1x1x6x24x4xf32>
    tpu.vector_store %arg6[%c0_12, %c0_13, %c0_14, %c0_15, %c0_16, %c0_17], %46 {strides = array<i32>} : memref<1x2x2x6x24x4xf32, #tpu.memory_space<vmem>>, vector<1x1x1x6x24x4xf32>,
    %47 = vector.extract_strided_slice %6 {offsets = [2, 0, 4], sizes = [6, 24, 4], strides = [1, 1, 1]} : vector<8x24x100xbf16> to vector<6x24x4xbf16>
    %48 = arith.extf %47 : vector<6x24x4xbf16> to vector<6x24x4xf32>
    %49 = arith.addf %10, %48 : vector<6x24x4xf32>
    %50 = vector.extract_strided_slice %6 {offsets = [2, 0, 12], sizes = [6, 24, 4], strides = [1, 1, 1]} : vector<8x24x100xbf16> to vector<6x24x4xbf16>
    %51 = arith.extf %50 : vector<6x24x4xbf16> to vector<6x24x4xf32>
    %c1_i32_18 = arith.constant 1 : i32
    %52 = tpu.dynamic_rotate %51 by %c1_i32_18 dim 1 : vector<6x24x4xf32>, i32 -> vector<6x24x4xf32>
    %53 = arith.addf %49, %52 : vector<6x24x4xf32>
    %54 = vector.extract_strided_slice %6 {offsets = [1, 0, 44], sizes = [6, 24, 4], strides = [1, 1, 1]} : vector<8x24x100xbf16> to vector<6x24x4xbf16>
    %55 = arith.extf %54 : vector<6x24x4xbf16> to vector<6x24x4xf32>
    %56 = arith.addf %53, %55 : vector<6x24x4xf32>
    %57 = vector.extract_strided_slice %6 {offsets = [1, 0, 52], sizes = [6, 24, 4], strides = [1, 1, 1]} : vector<8x24x100xbf16> to vector<6x24x4xbf16>
    %58 = arith.extf %57 : vector<6x24x4xbf16> to vector<6x24x4xf32>
    %c1_i32_19 = arith.constant 1 : i32
    %59 = tpu.dynamic_rotate %58 by %c1_i32_19 dim 1 : vector<6x24x4xf32>, i32 -> vector<6x24x4xf32>
    %60 = arith.addf %56, %59 : vector<6x24x4xf32>
    %61 = vector.extract_strided_slice %6 {offsets = [0, 0, 84], sizes = [6, 24, 4], strides = [1, 1, 1]} : vector<8x24x100xbf16> to vector<6x24x4xbf16>
    %62 = arith.extf %61 : vector<6x24x4xbf16> to vector<6x24x4xf32>
    %63 = arith.addf %60, %62 : vector<6x24x4xf32>
    %64 = vector.extract_strided_slice %6 {offsets = [0, 0, 92], sizes = [6, 24, 4], strides = [1, 1, 1]} : vector<8x24x100xbf16> to vector<6x24x4xbf16>
    %65 = arith.extf %64 : vector<6x24x4xbf16> to vector<6x24x4xf32>
    %c1_i32_20 = arith.constant 1 : i32
    %66 = tpu.dynamic_rotate %65 by %c1_i32_20 dim 1 : vector<6x24x4xf32>, i32 -> vector<6x24x4xf32>
    %67 = arith.addf %63, %66 : vector<6x24x4xf32>
    %c0_21 = arith.constant 0 : index
    %c0_22 = arith.constant 0 : index
    %c1 = arith.constant 1 : index
    %c0_23 = arith.constant 0 : index
    %c0_24 = arith.constant 0 : index
    %c0_25 = arith.constant 0 : index
    %68 = vector.load %arg6[%c0_21, %c0_22, %c1, %c0_23, %c0_24, %c0_25] : memref<1x2x2x6x24x4xf32, #tpu.memory_space<vmem>>, vector<1x1x1x6x24x4xf32>
    %69 = vector.shape_cast %68 : vector<1x1x1x6x24x4xf32> to vector<6x24x4xf32>
    %70 = vector.shape_cast %67 : vector<6x24x4xf32> to vector<1x1x1x6x24x4xf32>
    tpu.vector_store %arg6[%c0_21, %c0_22, %c1, %c0_23, %c0_24, %c0_25], %70 {strides = array<i32>} : memref<1x2x2x6x24x4xf32, #tpu.memory_space<vmem>>, vector<1x1x1x6x24x4xf32>,
    %71 = vector.extract_strided_slice %6 {offsets = [2, 0, 20], sizes = [6, 24, 4], strides = [1, 1, 1]} : vector<8x24x100xbf16> to vector<6x24x4xbf16>
    %72 = arith.extf %71 : vector<6x24x4xbf16> to vector<6x24x4xf32>
    %73 = arith.addf %10, %72 : vector<6x24x4xf32>
    %74 = vector.extract_strided_slice %6 {offsets = [2, 0, 28], sizes = [6, 24, 4], strides = [1, 1, 1]} : vector<8x24x100xbf16> to vector<6x24x4xbf16>
    %75 = arith.extf %74 : vector<6x24x4xbf16> to vector<6x24x4xf32>
    %c1_i32_26 = arith.constant 1 : i32
    %76 = tpu.dynamic_rotate %75 by %c1_i32_26 dim 1 : vector<6x24x4xf32>, i32 -> vector<6x24x4xf32>
    %77 = arith.addf %73, %76 : vector<6x24x4xf32>
    %78 = vector.extract_strided_slice %6 {offsets = [2, 0, 36], sizes = [6, 24, 4], strides = [1, 1, 1]} : vector<8x24x100xbf16> to vector<6x24x4xbf16>
    %79 = arith.extf %78 : vector<6x24x4xbf16> to vector<6x24x4xf32>
    %c2_i32_27 = arith.constant 2 : i32
    %80 = tpu.dynamic_rotate %79 by %c2_i32_27 dim 1 : vector<6x24x4xf32>, i32 -> vector<6x24x4xf32>
    %81 = arith.addf %77, %80 : vector<6x24x4xf32>
    %82 = vector.extract_strided_slice %6 {offsets = [1, 0, 60], sizes = [6, 24, 4], strides = [1, 1, 1]} : vector<8x24x100xbf16> to vector<6x24x4xbf16>
    %83 = arith.extf %82 : vector<6x24x4xbf16> to vector<6x24x4xf32>
    %84 = arith.addf %81, %83 : vector<6x24x4xf32>
    %85 = vector.extract_strided_slice %6 {offsets = [1, 0, 68], sizes = [6, 24, 4], strides = [1, 1, 1]} : vector<8x24x100xbf16> to vector<6x24x4xbf16>
    %86 = arith.extf %85 : vector<6x24x4xbf16> to vector<6x24x4xf32>
    %c1_i32_28 = arith.constant 1 : i32
    %87 = tpu.dynamic_rotate %86 by %c1_i32_28 dim 1 : vector<6x24x4xf32>, i32 -> vector<6x24x4xf32>
    %88 = arith.addf %84, %87 : vector<6x24x4xf32>
    %89 = vector.extract_strided_slice %6 {offsets = [1, 0, 76], sizes = [6, 24, 4], strides = [1, 1, 1]} : vector<8x24x100xbf16> to vector<6x24x4xbf16>
    %90 = arith.extf %89 : vector<6x24x4xbf16> to vector<6x24x4xf32>
    %c2_i32_29 = arith.constant 2 : i32
    %91 = tpu.dynamic_rotate %90 by %c2_i32_29 dim 1 : vector<6x24x4xf32>, i32 -> vector<6x24x4xf32>
    %92 = arith.addf %88, %91 : vector<6x24x4xf32>
    %c0_30 = arith.constant 0 : index
    %c1_31 = arith.constant 1 : index
    %c0_32 = arith.constant 0 : index
    %c0_33 = arith.constant 0 : index
    %c0_34 = arith.constant 0 : index
    %c0_35 = arith.constant 0 : index
    %93 = vector.load %arg6[%c0_30, %c1_31, %c0_32, %c0_33, %c0_34, %c0_35] : memref<1x2x2x6x24x4xf32, #tpu.memory_space<vmem>>, vector<1x1x1x6x24x4xf32>
    %94 = vector.shape_cast %93 : vector<1x1x1x6x24x4xf32> to vector<6x24x4xf32>
    %95 = vector.shape_cast %92 : vector<6x24x4xf32> to vector<1x1x1x6x24x4xf32>
    tpu.vector_store %arg6[%c0_30, %c1_31, %c0_32, %c0_33, %c0_34, %c0_35], %95 {strides = array<i32>} : memref<1x2x2x6x24x4xf32, #tpu.memory_space<vmem>>, vector<1x1x1x6x24x4xf32>,
    %96 = vector.extract_strided_slice %6 {offsets = [2, 0, 24], sizes = [6, 24, 4], strides = [1, 1, 1]} : vector<8x24x100xbf16> to vector<6x24x4xbf16>
    %97 = arith.extf %96 : vector<6x24x4xbf16> to vector<6x24x4xf32>
    %98 = arith.addf %10, %97 : vector<6x24x4xf32>
    %99 = vector.extract_strided_slice %6 {offsets = [2, 0, 32], sizes = [6, 24, 4], strides = [1, 1, 1]} : vector<8x24x100xbf16> to vector<6x24x4xbf16>
    %100 = arith.extf %99 : vector<6x24x4xbf16> to vector<6x24x4xf32>
    %c1_i32_36 = arith.constant 1 : i32
    %101 = tpu.dynamic_rotate %100 by %c1_i32_36 dim 1 : vector<6x24x4xf32>, i32 -> vector<6x24x4xf32>
    %102 = arith.addf %98, %101 : vector<6x24x4xf32>
    %103 = vector.extract_strided_slice %6 {offsets = [1, 0, 64], sizes = [6, 24, 4], strides = [1, 1, 1]} : vector<8x24x100xbf16> to vector<6x24x4xbf16>
    %104 = arith.extf %103 : vector<6x24x4xbf16> to vector<6x24x4xf32>
    %105 = arith.addf %102, %104 : vector<6x24x4xf32>
    %106 = vector.extract_strided_slice %6 {offsets = [1, 0, 72], sizes = [6, 24, 4], strides = [1, 1, 1]} : vector<8x24x100xbf16> to vector<6x24x4xbf16>
    %107 = arith.extf %106 : vector<6x24x4xbf16> to vector<6x24x4xf32>
    %c1_i32_37 = arith.constant 1 : i32
    %108 = tpu.dynamic_rotate %107 by %c1_i32_37 dim 1 : vector<6x24x4xf32>, i32 -> vector<6x24x4xf32>
    %109 = arith.addf %105, %108 : vector<6x24x4xf32>
    %c0_38 = arith.constant 0 : index
    %c1_39 = arith.constant 1 : index
    %c1_40 = arith.constant 1 : index
    %c0_41 = arith.constant 0 : index
    %c0_42 = arith.constant 0 : index
    %c0_43 = arith.constant 0 : index
    %110 = vector.load %arg6[%c0_38, %c1_39, %c1_40, %c0_41, %c0_42, %c0_43] : memref<1x2x2x6x24x4xf32, #tpu.memory_space<vmem>>, vector<1x1x1x6x24x4xf32>
    %111 = vector.shape_cast %110 : vector<1x1x1x6x24x4xf32> to vector<6x24x4xf32>
    %112 = vector.shape_cast %109 : vector<6x24x4xf32> to vector<1x1x1x6x24x4xf32>
    tpu.vector_store %arg6[%c0_38, %c1_39, %c1_40, %c0_41, %c0_42, %c0_43], %112 {strides = array<i32>} : memref<1x2x2x6x24x4xf32, #tpu.memory_space<vmem>>, vector<1x1x1x6x24x4xf32>,
    return
  }
  func.func @transform_0(%arg0: i32, %arg1: i32, %arg2: i32) -> (i32, i32, i32, i32) {
    %c0_i32 = arith.constant 0 : i32
    %c0_i32_0 = arith.constant 0 : i32
    %c0_i32_1 = arith.constant 0 : i32
    return %arg0, %arg1, %c0_i32, %c0_i32_0 : i32, i32, i32, i32
  }
  func.func @transform_1(%arg0: i32, %arg1: i32, %arg2: i32) -> (i32, i32, i32) {
    %c0_i32 = arith.constant 0 : i32
    %c0_i32_0 = arith.constant 0 : i32
    %c0_i32_1 = arith.constant 0 : i32
    return %arg2, %c0_i32, %c0_i32_0 : i32, i32, i32
  }
  func.func @transform_2(%arg0: i32, %arg1: i32, %arg2: i32) -> (i32, i32) {
    %c0_i32 = arith.constant 0 : i32
    %c0_i32_0 = arith.constant 0 : i32
    return %c0_i32, %arg2 : i32, i32
  }
  func.func @transform_3(%arg0: i32, %arg1: i32, %arg2: i32) -> (i32, i32, i32, i32, i32, i32) {
    %c0_i32 = arith.constant 0 : i32
    %c0_i32_0 = arith.constant 0 : i32
    %c0_i32_1 = arith.constant 0 : i32
    %c0_i32_2 = arith.constant 0 : i32
    return %arg0, %c0_i32, %c0_i32_0, %arg1, %c0_i32_1, %arg2 : i32, i32, i32, i32, i32, i32
  }
}

</mosaic_0001>

<bundles_post_ra>
// kernel: _lambda_.1
= control target key start
LH: loop header
LB: loop body
LE: loop exit
PB: predicated region body
PF: predicated region fallthrough
CT: control target
= control target key end

     0   :  { %8 = vsyncpa [#allocation3], 0  ;;  %s4989_s12 = smov 0   ;;  %s4991_s13 = smov 0   ;;  %s8200_s0 = inlined_call_operand.vmem [shape: bf16[2,3,192,4], index: 0, kind: input, shape index: {}]   ;;  %s8201_s1 = inlined_call_operand.vmem [shape: bf16[1,4,100], index: 1, kind: input, shape index: {}]   ;;  %s8202_s2 = inlined_call_operand.hbm [shape: f32[1,4], index: 2, kind: input, shape index: {}]   ;;  %s8203_s3 = inlined_call_operand.vmem [shape: f32[2,2,2,18,24,4], index: 3, kind: output, shape index: {}]  }
   0x1   :  { %s4993_s14 = smov 0   ;;  %s4995_s15 = smov 0  }
   0x2   :  { %s4997_s16 = smov 0   ;;  %s4999_s17 = smov 0  }
   0x3   :  { %s5001_s18 = smov 0  }
   0x4 LB: > { %s3369_s19 = sadd.s32 4294967295, %s4942_s18   ;;  %s29_s20 = sadd.s32 1, %s4934_s16  ;;  %s4942_s18 = sphi %s5001_s18, %s14_s18   ;;  %s4938_s17 = sphi %s4999_s17, %s8704_s17   ;;  %s4934_s16 = sphi %s4997_s16, %s8703_s16   ;;  %s4930_s15 = sphi %s4995_s15, %s8702_s15   ;;  %s4926_s14 = sphi %s4993_s14, %s8701_s14   ;;  %s4922_s13 = sphi %s4991_s13, %s8700_s13   ;;  %s4918_s12 = sphi %s4989_s12, %s8699_s12  }
   0x5   : > { %p31_p0 = scmp.ge.s32.totalorder %s29_s20, 3  ;;  %s33_s21 = sadd.s32 1, %s4938_s17 }
   0x6   : > { %s124_s22 = sadd.s32 1, %s4922_s13  ;;  %p134_p1 = scmp.ne.s32.totalorder %s4922_s13, %s4918_s12 }
   0x7   : > { %s8706_s20 = smov (%p31_p0, %s29_s20), 0  ;;  %s8708_s21 = smov (!%p31_p0, %s33_s21), %s4938_s17 }
   0x8   : > { %s118_s23 = ssub.s32 %s4934_s16, %s8706_s20  ;;  %p135_p2 = scmp.eq.s32.totalorder %s3369_s19, 5 }
   0x9   : > { %p35_p3 = scmp.ge.s32.totalorder %s8708_s21, 2  ;;  %p3371_p4 = scmp.ge.s32.totalorder %s4942_s18, 1 }
   0xa   : > { %p5036_p5 = por %p135_p2, %p134_p1  ;;  %p148_p6 = scmp.lt.s32.totalorder %s4942_s18, 7 }
   0xb   : > { %s8710_s21 = smov (%p35_p3, %s8708_s21), 0  ;;  %p5049_p8 = scmp.eq.s32.totalorder %s3369_s19, 0 }
   0xc   : > { %s8331_s24 = scalar_select %p5036_p5, 1, 0 }
   0xd   : > { %p5043_p7 = pnand %p3371_p4, %p148_p6  ;;  %s117_s26 = ssub.s32 %s4938_s17, %s8710_s21 }
   0xe   : > { %s8333_s27 = scalar_select %p5049_p8, 1, 0 }
   0xf   : > { %s8332_s25 = scalar_select %p5043_p7, 1, 0 }
  0x10   : > { %s119_s28 = sor.u32 %s118_s23, %s117_s26  ;;  %p3512_p9 = pneg %p5043_p7 }
  0x11   : > { %p122_p10 = scmp.eq.s32.totalorder %s119_s28, 0  ;;  %s4944_s29 = smov [#allocation2]  }
  0x12   : > { %s170_s30 = sshll.u32 %s4944_s29, 4  ;;  %p5057_p11 = pnand %p5049_p8, %p3512_p9  ;;  %s171_s30 = int_to_ptr.vmem [resolvable:$true] %s170_s30 }
  0x13   : > { %s5062_s5 = scalar_select %p122_p10, %s4922_s13, %s124_s22  }
  0x14   : > { %s4856_s8 = scalar_lea.hbm %s8202_s2, 16  ;;  %p4858_p13 = pneg %p5057_p11 }
  0x15   : > { %p4857_p12 = scmp.ne.s32.totalorder %s8202_s2, %s4856_s8  ;;  %p4863_p2 = scmp.lt.u32.totalorder %s4856_s8, %s8202_s2 }
  0x17   : > { %p4859_p0 = pnand %p4858_p13, %p4857_p12 }
  0x19   : > { %p4860_p1 = pneg %p4859_p0 }
  0x1b   : > { %p4865_p3 = pnand %p4863_p2, %p4860_p1 }
  0x1d   : > { %4868 = shalt.err (!%p4865_p3)
}
  0x1e   : > { %s4869_s22 = scalar_lea.vmem %s171_s30, 16  ;;  %s4876_s23 = scalar_lea.vmem %s171_s30, 32 }
  0x1f   : > { %p4870_p4 = scmp.ne.s32.totalorder %s171_s30, %s4869_s22  ;;  %p4877_p10 = scmp.lt.s32.totalorder %s171_s30, %s171_s30 }
  0x20   : > { %p4878_p5 = scmp.lt.s32.totalorder %s4876_s23, %s4869_s22 }
  0x21   : > { %p4872_p6 = pnand %p4870_p4, %p4858_p13 }
  0x22   : > { %p4879_p8 = por %p4878_p5, %p4877_p10 }
  0x23   : > { %p4873_p9 = pneg %p4872_p6 }
  0x25   : > { %p4880_p7 = pnand %p4879_p8, %p4873_p9 }
  0x27   : > { %4883 = shalt.err (!%p4880_p7)
}
  0x28   : > { %3515 = dma.hbm_to_vmem [thread:$0]  (!%p5057_p11), %s8202_s2, 16, %s171_s30, [#allocation3]  }
  0x29   : > { %p8335_p12 = scmp.ne.s32.totalorder %s8332_s25, 0 }
  0x2b   : > { %195 = sbr.rel (%p8335_p12) target bundleno = 864 (0x360), region = 32 }
  0x32   : > { %p8336_p0 = scmp.ne.s32.totalorder %s8333_s27, 0 }
  0x34   : > { %4913 = dma.done.wait (%p8336_p0), [#allocation3], 16  }
  0x35   : > { %4915 = vsyncadd (%p8336_p0), [#allocation3], 4294967280  ;;  %p226_p5 = scmp.lt.s32.totalorder %s4930_s15, 1  ;;  %p228_p7 = scmp.lt.s32.totalorder %s4926_s14, 2  ;;  %vm363_vm0 = vcmask 1041408   ;;  %vm326_vm1 = vcmask 31744  }
  0x36   : > { %v265_v0 = vld [vmem:[%s8201_s1] sm:$0x3]  ;;  %s4945_s19 = smov 112   ;;  %s4946_s22 = smov 120  }
  0x37   : > { %s227_s29 = scalar_select %p226_p5, %s4930_s15, 1  ;;  %3501 = vmatprep.subr.msk.bf16.mxu0 %vm363_vm0, %v265_v0  ;;  %3502 = vmatprep.subr.msk.bf16.mxu1 %vm363_vm0, %v265_v0  ;;  %v365_v1 = vsel %vm363_vm0, %v265_v0, 0 }
  0x38   : > { %s229_s4 = scalar_select %p228_p7, %s4926_s14, 2  ;;  %3474 = vmatpush3.bf16.msra.mxu0 %v365_v1  ;;  %3500 = vmatpush3.bf16.msra.mxu1 %v365_v1 }
  0x39   : > { %s3505_s6 = smul.u32 72, %s227_s29  ;;  %s4947_s23 = smov 80  }
  0x3a   : > { %s3504_s30 = smul.u32 24, %s229_s4  ;;  %s4948_s26 = smov 88  }
  0x3b   : > { %s4949_s28 = smov 72   ;;  %s4950_s29 = smov 40  }
  0x3c   : > { %s232_s8 = sadd.s32 %s3505_s6, %s3504_s30  ;;  %s4951_s4 = smov 48  }
  0x3d   : > { %s3377_s27 = sshll.u32 %s232_s8, 2  ;;  %s4952_s6 = smov 116  }
  0x3e   : > { %s234_s11 = scalar_lea.vmem %s8200_s0, %s3377_s27  ;;  %s4953_s30 = smov 76  }
  0x3f   : > { %v4680_v2 = vld [vmem:[%s234_s11] sm:$0xff]   ;;  %v4681_v3 = vld [vmem:[%s234_s11 + $0x30] sm:$0xff]   ;;  %v4682_v4 = vld [vmem:[%s234_s11 + $0x8] sm:$0xff]   ;;  %s4954_s7 = smov 32   ;;  %s4955_s25 = smov 44  }
  0x40   : > { %3475 = vmatprep.mubr.msk.bf16.mxu0 %vm326_vm1, %v4680_v2  ;;  %3487 = vmatprep.mubr.msk.bf16.mxu1 %vm326_vm1, %v4681_v3  ;;  %v4683_v5 = vld [vmem:[%s234_s11 + $0x38] sm:$0xff]   ;;  %v4684_v6 = vld [vmem:[%s234_s11 + $0x10] sm:$0xff]   ;;  %v4685_v7 = vld [vmem:[%s234_s11 + $0x40] sm:$0xff]   ;;  %s4956_s8 = smov 124   ;;  %s4957_s27 = smov 84  }
  0x41   : > { %3476 = vmatmul.mubr.msk.bf16.vlgmr.msra.gmra.mrb[0].mxu0 %vm326_vm1, %v4682_v4  ;;  %3488 = vmatmul.mubr.msk.bf16.vlgmr.msra.gmra.mrb[0].mxu1 %vm326_vm1, %v4683_v5  ;;  %v4686_v8 = vld [vmem:[%s234_s11 + $0x18] sm:$0xff]   ;;  %v4687_v9 = vld [vmem:[%s234_s11 + $0x48] sm:$0xff]   ;;  %v4688_v10 = vld [vmem:[%s234_s11 + $0x20] sm:$0xff]   ;;  %s4958_s9 = smov 36   ;;  %s223_s10 = sand.u32 1, %s4918_s12  }
  0x42   : > { %3479 = vmatprep.mubr.msk.bf16.mxu0 %vm326_vm1, %v4684_v6  ;;  %3491 = vmatprep.mubr.msk.bf16.mxu1 %vm326_vm1, %v4685_v7  ;;  %v4690_v11 = vld [vmem:[%s234_s11 + $0x50] sm:$0xff]   ;;  %v4689_v12 = vld [vmem:[%s234_s11 + $0x28] sm:$0xff]   ;;  %v4691_v13 = vld [vmem:[%s234_s11 + $0x58] sm:$0xff]   ;;  %s5824_s12 = smul.u32 576, %s223_s10  ;;  %p8698_p8 = scmp.ne.s32.totalorder %s8331_s24, 0 }
  0x44   : > { %s5879_s11 = scalar_lea.vmem [#allocation4], %s5824_s12 }
  0x49   : > { %3480 = vmatmul.mubr.msk.bf16.gmra.mrb[4].mxu0 %vm326_vm1, %v4686_v8  ;;  %3492 = vmatmul.mubr.msk.bf16.gmra.mrb[4].mxu1 %vm326_vm1, %v4687_v9 }
  0x4a   : > { %3483 = vmatprep.mubr.msk.bf16.mxu0 %vm326_vm1, %v4688_v10  ;;  %3495 = vmatprep.mubr.msk.bf16.mxu1 %vm326_vm1, %v4690_v11 }
  0x51   : > { %3484 = vmatmul.mubr.msk.bf16.gmra.mrb[8].mxu0 %vm326_vm1, %v4689_v12  ;;  %3496 = vmatmul.mubr.msk.bf16.gmra.mrb[8].mxu1 %vm326_vm1, %v4691_v13 }
 0x114   : > { %v3477_v14 = vpop.f32.mrb[0].mxu0  ;;  %v3489_v15 = vpop.f32.mrb[0].mxu1 }
 0x115   : > { %v401_v16 = vpop.f32.mrb[1].mxu0  ;;  %v449_v17 = vpop.f32.mrb[1].mxu1  ;;  %v505_v19 = vpack.c.bf16 %v3489_v15, %v3489_v15 }
 0x116   : > { %v5108_v18 = vpop.f32.mrb[2].mxu0  ;;  %v3490_v20 = vpop.f32.mrb[2].mxu1 }
 0x117   : > { %v404_v21 = vpop.f32.mrb[3].mxu0  ;;  %v452_v22 = vpop.f32.mrb[3].mxu1  ;;  %v5110_v24 = vunpack.c.l.bf16 %v505_v19  ;;  %v5144_v49 = vpack.i.bf16 %v5108_v18, %v3477_v14 }
 0x118   : > { %v504_v23 = vpack.c.bf16 %v452_v22, %v449_v17  ;;  %v3635_v44 = vpack.i.bf16 %v404_v21, %v401_v16 }
 0x11a   : > { %v5112_v25 = vunpack.c.l.bf16 %v504_v23  ;;  %v5114_v26 = vunpack.c.h.bf16 %v504_v23 }
 0x11c   : > { %v3481_v27 = vpop.f32.mrb[4].mxu0  ;;  %v3493_v28 = vpop.f32.mrb[4].mxu1  ;;  %v5120_v30 = vpack.i.bf16 %v5114_v26, %v5112_v25  ;;  %v5124_v31 = vpack.i.bf16 %v5110_v24, %v5114_v26 }
 0x11d   : > { %v5116_v29 = vpop.f32.mrb[5].mxu0  ;;  %v465_v32 = vpop.f32.mrb[5].mxu1 }
 0x11e   : > { %8337 = vst [vmem:[#allocation6_spill] sm:$0xff] %v5120_v30  ;;  %8338 = vst [vmem:[#allocation7_spill] sm:$0xff] %v5124_v31  ;;  %v3482_v33 = vpop.f32.mrb[6].mxu0  ;;  %v506_v34 = vpack.c.bf16 %v465_v32, %v3490_v20  ;;  %3606 = vrot.lane.b32.xlu0 %v5120_v30, %s4945_s19  ;;  %3601 = vrot.lane.b32.xlu1 %v5120_v30, %s4946_s22  ;;  %v3494_v36 = vpop.f32.mrb[6].mxu1  ;;  %v5211_v10 = vpack.i.bf16 %v5116_v29, %v5108_v18 }
 0x11f   : > { %v500_v35 = vpack.c.bf16 %v3482_v33, %v3481_v27  ;;  %v420_v37 = vpop.f32.mrb[7].mxu0  ;;  %v508_v38 = vpack.c.bf16 %v3494_v36, %v3493_v28  ;;  %v468_v39 = vpop.f32.mrb[7].mxu1 }
 0x120   : > { %v5130_v40 = vunpack.c.l.bf16 %v506_v34  ;;  %v507_v48 = vpack.c.bf16 %v468_v39, %v468_v39  ;;  %v5155_v55 = vunpack.c.h.bf16 %v506_v34  ;;  %v5181_v0 = vpack.i.bf16 %v420_v37, %v5116_v29  ;;  %8346 = vst [vmem:[#allocation15_spill] sm:$0xff] %v5211_v10 }
 0x121   : > { %v5151_v53 = vunpack.c.l.bf16 %v500_v35  ;;  %v5153_v54 = vunpack.c.l.bf16 %v508_v38  ;;  %v5157_v56 = vunpack.c.h.bf16 %v500_v35  ;;  %v5159_v57 = vunpack.c.h.bf16 %v508_v38 }
 0x122   : > { %3616 = vrot.lane.b32.xlu0 %v5124_v31, %s4947_s23  ;;  %3611 = vrot.lane.b32.xlu1 %v5124_v31, %s4948_s26  ;;  %v5138_v42 = vpack.i.bf16 %v5130_v40, %v5110_v24  ;;  %v5146_v50 = vunpack.c.l.bf16 %v507_v48  ;;  %v5227_v14 = vpack.i.bf16 %v5155_v55, %v5130_v40 }
 0x123   : > { %v5174_v62 = vpack.i.bf16 %v5151_v53, %v420_v37  ;;  %v5215_v11 = vpack.i.bf16 %v5157_v56, %v5151_v53  ;;  %v5223_v13 = vpack.i.bf16 %v5159_v57, %v5153_v54 }
 0x124   : > { %v3485_v41 = vpop.f32.mrb[8].mxu0  ;;  %8339 = vst [vmem:[#allocation8_spill] sm:$0xff] %v5138_v42  ;;  %v3497_v45 = vpop.f32.mrb[8].mxu1  ;;  %v5171_v61 = vpack.i.bf16 %v5146_v50, %v5155_v55  ;;  %v5178_v63 = vpack.i.bf16 %v5153_v54, %v5146_v50  ;;  %8349 = vst [vmem:[#allocation18_spill] sm:$0xff] %v5227_v14 }
 0x125   : > { %v433_v43 = vpop.f32.mrb[9].mxu0  ;;  %v481_v47 = vpop.f32.mrb[9].mxu1  ;;  %8341 = vst [vmem:[#allocation10_spill] sm:$0xff] %v5174_v62  ;;  %8347 = vst [vmem:[#allocation16_spill] sm:$0xff] %v5215_v11 }
 0x126   : > { %v3486_v46 = vpop.f32.mrb[10].mxu0  ;;  %3621 = vrot.lane.b32.xlu1 %v5124_v31, %s4949_s28  ;;  %3636 = vrot.lane.b32.xlu0 %v3635_v44, %s4950_s29  ;;  %v501_v51 = vpack.c.bf16 %v433_v43, %v433_v43  ;;  %v509_v58 = vpack.c.bf16 %v481_v47, %v481_v47  ;;  %8340 = vst [vmem:[#allocation9_spill] sm:$0xff] %v5171_v61  ;;  %8342 = vst [vmem:[#allocation11_spill] sm:$0xff] %v5178_v63  ;;  %v3498_v6 = vpop.f32.mrb[10].mxu1 }
 0x127   : > { %v503_v52 = vpack.c.bf16 %v3486_v46, %v3486_v46  ;;  %v436_v2 = vpop.f32.mrb[11].mxu0  ;;  %v484_v8 = vpop.f32.mrb[11].mxu1  ;;  %v511_v12 = vpack.c.bf16 %v3498_v6, %v3498_v6  ;;  %8348 = vst [vmem:[#allocation17_spill] sm:$0xff] %v5223_v13 }
 0x128   : > { %v5165_v59 = vunpack.c.l.bf16 %v501_v51  ;;  %v5186_v1 = vunpack.c.l.bf16 %v509_v58  ;;  %v502_v4 = vpack.c.bf16 %v3485_v41, %v436_v2  ;;  %v5207_v9 = vpack.c.bf16 %v3497_v45, %v484_v8 }
 0x129   : > { %v5167_v60 = vunpack.c.l.bf16 %v503_v52  ;;  %v5236_v17 = vunpack.c.l.bf16 %v511_v12 }
 0x12a   : > { %3641 = vrot.lane.b32.xlu0 %v5120_v30, %s4950_s29  ;;  %3626 = vrot.lane.b32.xlu1 %v3635_v44, %s4951_s4  ;;  %v5190_v3 = vpack.i.bf16 %v5165_v59, %v5157_v56  ;;  %v5197_v5 = vpack.i.bf16 %v5186_v1, %v5159_v57  ;;  %v5232_v15 = vunpack.c.l.bf16 %v502_v4  ;;  %v5234_v16 = vunpack.c.h.bf16 %v502_v4 }
 0x12b   : > { %v5201_v7 = vpack.i.bf16 %v5112_v25, %v5167_v60  ;;  %v8208_v18 = vunpack.c.l.bf16 %v5207_v9  ;;  %v8207_v19 = vunpack.c.h.bf16 %v5207_v9 }
 0x12c   : > { %8343 = vst [vmem:[#allocation12_spill] sm:$0xff] %v5190_v3  ;;  %8344 = vst [vmem:[#allocation13_spill] sm:$0xff] %v5197_v5  ;;  %v5246_v20 = vpack.i.bf16 %v5167_v60, %v5234_v16  ;;  %v5250_v21 = vpack.i.bf16 %v5232_v15, %v5165_v59  ;;  %v5284_v27 = vpack.i.bf16 %v5234_v16, %v5232_v15 }
 0x12d   : > { %8345 = vst [vmem:[#allocation14_spill] sm:$0xff] %v5201_v7  ;;  %v5259_v22 = vpack.i.bf16 %v8208_v18, %v5186_v1  ;;  %v5264_v23 = vpack.i.bf16 %v5236_v17, %v8207_v19 }
 0x12e   : > { %3661 = vrot.lane.b32.xlu0 %v5120_v30, %s4952_s6  ;;  %3631 = vrot.lane.b32.xlu1 %v5120_v30, %s4951_s4  ;;  %8350 = vst [vmem:[#allocation19_spill] sm:$0xff] %v5246_v20  ;;  %8351 = vst [vmem:[#allocation20_spill] sm:$0xff] %v5250_v21 }
 0x12f   : > { %8352 = vst [vmem:[#allocation21_spill] sm:$0xff] %v5259_v22  ;;  %8353 = vst [vmem:[#allocation22_spill] sm:$0xff] %v5264_v23 }
 0x130   : > { %8354 = vst [vmem:[#allocation23_spill] sm:$0xff] %v5284_v27 }
 0x132   : > { %3671 = vrot.lane.b32.xlu0 %v5124_v31, %s4953_s30  ;;  %3646 = vrot.lane.b32.xlu1 %v3635_v44, %s4954_s7 }
 0x136   : > { %3676 = vrot.lane.b32.xlu0 %v3635_v44, %s4955_s25  ;;  %3651 = vrot.lane.b32.xlu1 %v5120_v30, %s4954_s7 }
 0x13a   : > { %3681 = vrot.lane.b32.xlu0 %v5120_v30, %s4955_s25  ;;  %3656 = vrot.lane.b32.xlu1 %v5120_v30, %s4956_s8 }
 0x13e   : > { %3696 = vrot.lane.b32.xlu0 %v5138_v42, %s4946_s22  ;;  %3666 = vrot.lane.b32.xlu1 %v5124_v31, %s4957_s27  ;;  %v645_v31 = vlaneseq }
 0x142   : > { %3686 = vrot.lane.b32.xlu1 %v3635_v44, %s4958_s9  ;;  %3706 = vrot.lane.b32.xlu0 %v5211_v10, %s4948_s26 }
 0x146   : > { %3691 = vrot.lane.b32.xlu1 %v5120_v30, %s4958_s9  ;;  %3711 = vrot.lane.b32.xlu0 %v5227_v14, %s4948_s26 }
 0x14a   : > { %3701 = vrot.lane.b32.xlu1 %v5138_v42, %s4945_s19  ;;  %3726 = vrot.lane.b32.xlu0 %v5211_v10, %s4949_s28 }
 0x14e   : > { %3716 = vrot.lane.b32.xlu1 %v5211_v10, %s4947_s23  ;;  %3731 = vrot.lane.b32.xlu0 %v5227_v14, %s4949_s28 }
 0x152   : > { %3721 = vrot.lane.b32.xlu1 %v5227_v14, %s4947_s23  ;;  %3736 = vrot.lane.b32.xlu0 %v5144_v49, %s4951_s4 }
 0x156   : > { %3746 = vrot.lane.b32.xlu1 %v5144_v49, %s4950_s29  ;;  %3741 = vrot.lane.b32.xlu0 %v5138_v42, %s4951_s4 }
 0x15a   : > { %3751 = vrot.lane.b32.xlu1 %v5138_v42, %s4950_s29  ;;  %3756 = vrot.lane.b32.xlu0 %v5144_v49, %s4954_s7 }
 0x15e   : > { %3771 = vrot.lane.b32.xlu1 %v5138_v42, %s4952_s6  ;;  %3761 = vrot.lane.b32.xlu0 %v5138_v42, %s4954_s7 }
 0x162   : > { %3786 = vrot.lane.b32.xlu1 %v5211_v10, %s4953_s30  ;;  %3766 = vrot.lane.b32.xlu0 %v5138_v42, %s4956_s8 }
 0x166   : > { %3791 = vrot.lane.b32.xlu1 %v5227_v14, %s4953_s30  ;;  %3776 = vrot.lane.b32.xlu0 %v5211_v10, %s4957_s27 }
 0x16a   : > { %3796 = vrot.lane.b32.xlu1 %v5144_v49, %s4955_s25  ;;  %3781 = vrot.lane.b32.xlu0 %v5227_v14, %s4957_s27 }
 0x16e   : > { %3801 = vrot.lane.b32.xlu1 %v5138_v42, %s4955_s25  ;;  %3806 = vrot.lane.b32.xlu0 %v5144_v49, %s4958_s9 }
 0x172   : > { %3811 = vrot.lane.b32.xlu0 %v5138_v42, %s4958_s9  ;;  %3826 = vrot.lane.b32.xlu1 %v5215_v11, %s4945_s19 }
 0x176   : > { %3831 = vrot.lane.b32.xlu1 %v5223_v13, %s4945_s19  ;;  %3816 = vrot.lane.b32.xlu0 %v5215_v11, %s4946_s22 }
 0x17a   : > { %3841 = vrot.lane.b32.xlu1 %v5215_v11, %s4950_s29  ;;  %3821 = vrot.lane.b32.xlu0 %v5223_v13, %s4946_s22 }
 0x17e   : > { %3861 = vrot.lane.b32.xlu1 %v5215_v11, %s4952_s6  ;;  %3836 = vrot.lane.b32.xlu0 %v5215_v11, %s4951_s4 }
 0x182   : > { %3866 = vrot.lane.b32.xlu1 %v5223_v13, %s4952_s6  ;;  %3846 = vrot.lane.b32.xlu0 %v5215_v11, %s4954_s7 }
 0x186   : > { %3871 = vrot.lane.b32.xlu1 %v5215_v11, %s4955_s25  ;;  %3851 = vrot.lane.b32.xlu0 %v5215_v11, %s4956_s8 }
 0x18a   : > { %3881 = vrot.lane.b32.xlu1 %v5171_v61, %s4946_s22  ;;  %3856 = vrot.lane.b32.xlu0 %v5223_v13, %s4956_s8 }
 0x18e   : > { %3876 = vrot.lane.b32.xlu0 %v5215_v11, %s4958_s9  ;;  %3891 = vrot.lane.b32.xlu1 %v5174_v62, %s4948_s26 }
 0x190   : > { %v5338_v28 = vpop.permute.xlu0 %3606  ;;  %v5340_v29 = vpop.permute.xlu1 %3601 }
 0x191   : > { %v3603_v10 = vunpack.i.l.bf16 %v5340_v29  ;;  %v3609_v30 = vunpack.i.h.bf16 %v5338_v28 }
 0x192   : > { %3886 = vrot.lane.b32.xlu0 %v5171_v61, %s4945_s19  ;;  %3896 = vrot.lane.b32.xlu1 %v5178_v63, %s4948_s26 }
 0x193   : > { %v5491_v42 = vrot.slane %v3603_v10, 7 }
 0x194   : > { %v5346_v32 = vpop.permute.xlu0 %3616  ;;  %v5348_v33 = vpop.permute.xlu1 %3611 }
 0x195   : > { %8355 = vst [vmem:[#allocation24_spill] sm:$0xff] %v5348_v33 }
 0x196   : > { %3901 = vrot.lane.b32.xlu0 %v5174_v62, %s4947_s23  ;;  %3911 = vrot.lane.b32.xlu1 %v5174_v62, %s4949_s28 }
 0x198   : > { %v5354_v34 = vpop.permute.xlu1 %3621  ;;  %v5356_v35 = vpop.permute.xlu0 %3636 }
 0x19a   : > { %3906 = vrot.lane.b32.xlu0 %v5178_v63, %s4947_s23  ;;  %3916 = vrot.lane.b32.xlu1 %v5178_v63, %s4949_s28 }
 0x19c   : > { %v5362_v36 = vpop.permute.xlu0 %3641  ;;  %v5364_v37 = vpop.permute.xlu1 %3626 }
 0x19d   : > { %8356 = vst [vmem:[#allocation25_spill] sm:$0xff] %v5364_v37 }
 0x19e   : > { %3931 = vrot.lane.b32.xlu0 %v5181_v0, %s4950_s29  ;;  %3921 = vrot.lane.b32.xlu1 %v5181_v0, %s4951_s4 }
 0x1a0   : > { %v5370_v38 = vpop.permute.xlu0 %3661  ;;  %v5372_v39 = vpop.permute.xlu1 %3631 }
 0x1a1   : > { %8357 = vst [vmem:[#allocation26_spill] sm:$0xff] %v5372_v39 }
 0x1a2   : > { %3936 = vrot.lane.b32.xlu0 %v5171_v61, %s4950_s29  ;;  %3926 = vrot.lane.b32.xlu1 %v5171_v61, %s4951_s4 }
 0x1a4   : > { %v5378_v41 = vpop.permute.xlu0 %3671  ;;  %v5380_v43 = vpop.permute.xlu1 %3646 }
 0x1a6   : > { %3956 = vrot.lane.b32.xlu0 %v5171_v61, %s4952_s6  ;;  %3941 = vrot.lane.b32.xlu1 %v5181_v0, %s4954_s7 }
 0x1a8   : > { %v5386_v44 = vpop.permute.xlu0 %3676  ;;  %v5388_v45 = vpop.permute.xlu1 %3651 }
 0x1a9   : > { %8358 = vst [vmem:[#allocation27_spill] sm:$0xff] %v5386_v44 }
 0x1aa   : > { %3971 = vrot.lane.b32.xlu0 %v5174_v62, %s4953_s30  ;;  %3946 = vrot.lane.b32.xlu1 %v5171_v61, %s4954_s7 }
 0x1ac   : > { %v5394_v46 = vpop.permute.xlu0 %3681  ;;  %v5396_v47 = vpop.permute.xlu1 %3656 }
 0x1ad   : > { %8359 = vst [vmem:[#allocation28_spill] sm:$0xff] %v5394_v46  ;;  %8360 = vst [vmem:[#allocation29_spill] sm:$0xff] %v5396_v47 }
 0x1ae   : > { %3976 = vrot.lane.b32.xlu0 %v5178_v63, %s4953_s30  ;;  %3951 = vrot.lane.b32.xlu1 %v5171_v61, %s4956_s8 }
 0x1b0   : > { %v5402_v48 = vpop.permute.xlu0 %3696  ;;  %v5404_v49 = vpop.permute.xlu1 %3666 }
 0x1b1   : > { %8361 = vst [vmem:[#allocation30_spill] sm:$0xff] %v5404_v49  ;;  %v5470_v49 = vld [vmem:[#allocation2] ss:$0 sm:$0xff] }
 0x1b2   : > { %3981 = vrot.lane.b32.xlu0 %v5181_v0, %s4955_s25  ;;  %3961 = vrot.lane.b32.xlu1 %v5174_v62, %s4957_s27  ;;  %v5462_v62 = vshrl.u32 %v645_v31, 7  ;;  %8366 = vst [vmem:[#allocation35_spill] sm:$0xff] %v5470_v49  ;;  %v5483_v31 = vadd.f32 %v5470_v49, %v5157_v56  ;;  %v5499_v33 = vadd.f32 %v5470_v49, %v5155_v55  ;;  %v3608_v56 = vunpack.i.l.bf16 %v5338_v28 }
 0x1b3   : > { %v5517_v55 = vadd.f32 %v5470_v49, %v5153_v54  ;;  %v5521_v10 = vadd.f32 %v5470_v49, %v5151_v53  ;;  %v5525_v28 = vadd.f32 %v5470_v49, %v5112_v25  ;;  %v3619_v53 = vunpack.i.h.bf16 %v5346_v32 }
 0x1b4   : > { %v5410_v51 = vpop.permute.xlu1 %3686  ;;  %v5412_v52 = vpop.permute.xlu0 %3706  ;;  %vm647_vm2 = vcmp.lt.s32.totalorder %v5462_v62, 1  ;;  %8368 = vst [vmem:[#allocation37_spill] sm:$0xff] %v5499_v33  ;;  %vm756_vm3 = vcmp.lt.s32.totalorder %v5462_v62, 2  ;;  %v3618_v25 = vunpack.i.l.bf16 %v5346_v32  ;;  %v5540_v54 = vrot.slane %v3609_v30, 6 }
 0x1b5   : > { %8362 = vst [vmem:[#allocation31_spill] sm:$0xff] %v5412_v52  ;;  %8372 = vst [vmem:[#allocation41_spill] sm:$0xff] %v5517_v55  ;;  %v5554_v33 = vadd.f32 %v5470_v49, %v5186_v1  ;;  %v5562_v30 = vadd.f32 %v5470_v49, %v5234_v16  ;;  %v5566_v32 = vadd.f32 %v5470_v49, %v5232_v15 }
 0x1b6   : > { %3986 = vrot.lane.b32.xlu0 %v5171_v61, %s4955_s25  ;;  %3966 = vrot.lane.b32.xlu1 %v5178_v63, %s4957_s27  ;;  %8373 = vst [vmem:[#allocation42_spill] sm:$0xff] %v5521_v10  ;;  %v5584_v15 = vrot.slane %v3618_v25, 7  ;;  %v3664_v25 = vunpack.i.h.bf16 %v5370_v38 }
 0x1b7   : > { %8376 = vst [vmem:[#allocation45_spill] sm:$0xff] %v5554_v33  ;;  %8378 = vst [vmem:[#allocation47_spill] sm:$0xff] %v5562_v30  ;;  %v3638_v30 = vunpack.i.l.bf16 %v5356_v35 }
 0x1b8   : > { %v5418_v58 = vpop.permute.xlu1 %3691  ;;  %v5420_v2 = vpop.permute.xlu0 %3711  ;;  %8379 = vst [vmem:[#allocation48_spill] sm:$0xff] %v5566_v32  ;;  %8385 = vst [vmem:[#allocation52_spill] sm:$0xff] %v5584_v15  ;;  %v3639_v32 = vunpack.i.h.bf16 %v5356_v35  ;;  %v3643_v35 = vunpack.i.l.bf16 %v5362_v36 }
 0x1b9   : > { %8363 = vst [vmem:[#allocation32_spill] sm:$0xff] %v5420_v2 }
 0x1ba   : > { %3991 = vrot.lane.b32.xlu1 %v5181_v0, %s4958_s9  ;;  %4001 = vrot.lane.b32.xlu0 %v5190_v3, %s4948_s26 }
 0x1bc   : > { %v5426_v4 = vpop.permute.xlu1 %3701  ;;  %v5428_v6 = vpop.permute.xlu0 %3726 }
 0x1be   : > { %3996 = vrot.lane.b32.xlu1 %v5171_v61, %s4958_s9  ;;  %4006 = vrot.lane.b32.xlu0 %v5197_v5, %s4948_s26  ;;  %v5495_v61 = vadd.f32 %v5470_v49, %v5159_v57  ;;  %v5513_v57 = vadd.f32 %v5470_v49, %v5130_v40 }
 0x1c0   : > { %v5434_v8 = vpop.permute.xlu1 %3716  ;;  %v5436_v12 = vpop.permute.xlu0 %3731  ;;  %8371 = vst [vmem:[#allocation40_spill] sm:$0xff] %v5513_v57  ;;  %v5550_v57 = vadd.f32 %v5470_v49, %v5167_v60  ;;  %v8380_v60 = vunpack.c.l.bf16 %v5207_v9 }
 0x1c2   : > { %4011 = vrot.lane.b32.xlu1 %v5190_v3, %s4947_s23  ;;  %4021 = vrot.lane.b32.xlu0 %v5190_v3, %s4949_s28  ;;  %8375 = vst [vmem:[#allocation44_spill] sm:$0xff] %v5550_v57  ;;  %v5575_v1 = vadd.f32 %v5470_v49, %v8380_v60  ;;  %v5594_v60 = vadd.f32 %v5470_v49, %v5236_v17  ;;  %v3649_v17 = vunpack.i.h.bf16 %v5380_v43  ;;  %v3653_v57 = vunpack.i.l.bf16 %v5388_v45 }
 0x1c4   : > { %v5442_v0 = vpop.permute.xlu1 %3721  ;;  %v5444_v19 = vpop.permute.xlu0 %3736  ;;  %8381 = vst [vmem:[#allocation49_spill] sm:$0xff] %v5575_v1  ;;  %8388 = vst [vmem:[#allocation55_spill] sm:$0xff] %v5594_v60  ;;  %v5620_v60 = vrot.slane %v3638_v30, 7  ;;  %v3654_v1 = vunpack.i.h.bf16 %v5388_v45 }
 0x1c5   : > { %8364 = vst [vmem:[#allocation33_spill] sm:$0xff] %v5444_v19 }
 0x1c6   : > { %4016 = vrot.lane.b32.xlu1 %v5197_v5, %s4947_s23  ;;  %4026 = vrot.lane.b32.xlu0 %v5197_v5, %s4949_s28 }
 0x1c8   : > { %v5450_v18 = vpop.permute.xlu1 %3746  ;;  %v5452_v63 = vpop.permute.xlu0 %3741 }
 0x1c9   : > { %8365 = vst [vmem:[#allocation34_spill] sm:$0xff] %v5452_v63  ;;  %v3604_v63 = vunpack.i.h.bf16 %v5340_v29  ;;  %v5487_v29 = vadd.f32 %v5470_v49, %v5110_v24 }
 0x1ca   : > { %4041 = vrot.lane.b32.xlu1 %v5190_v3, %s4953_s30  ;;  %4031 = vrot.lane.b32.xlu0 %v5190_v3, %s4957_s27 }
 0x1cc   : > { %v5458_v14 = vpop.permute.xlu1 %3751  ;;  %v5460_v19 = vpop.permute.xlu0 %3756 }
 0x1ce   : > { %4046 = vrot.lane.b32.xlu1 %v5197_v5, %s4953_s30  ;;  %4036 = vrot.lane.b32.xlu0 %v5197_v5, %s4957_s27  ;;  %v5489_v5 = vrot.slane %v3604_v63, 7  ;;  %v5509_v63 = vadd.f32 %v5470_v49, %v5146_v50  ;;  %v544_v50 = vadd.f32 %v5470_v49, %v5114_v26  ;;  %v5542_v26 = vrot.slane %v3608_v56, 6 }
 0x1d0   : > { %v5472_v13 = vpop.permute.xlu1 %3771  ;;  %v5474_v3 = vpop.permute.xlu0 %3761  ;;  %8370 = vst [vmem:[#allocation39_spill] sm:$0xff] %v5509_v63  ;;  %v656_v40 = vsel %vm647_vm2, %v5491_v42, %v5489_v5  ;;  %v5558_v63 = vadd.f32 %v5470_v49, %v5165_v59  ;;  %v8382_v59 = vunpack.c.h.bf16 %v5207_v9  ;;  %v765_v9 = vsel %vm756_vm3, %v5542_v26, %v5540_v54 }
 0x1d1   : > { %8367 = vst [vmem:[#allocation36_spill] sm:$0xff] %v5472_v13  ;;  %v673_v56 = vadd.f32 %v656_v40, %v544_v50  ;;  %v3624_v50 = vunpack.i.h.bf16 %v5354_v34  ;;  %v3623_v40 = vunpack.i.l.bf16 %v5354_v34 }
 0x1d2   : > { %4056 = vrot.lane.b32.xlu1 %v5201_v7, %s4947_s23  ;;  %4051 = vrot.lane.b32.xlu0 %v5201_v7, %s4948_s26  ;;  %8377 = vst [vmem:[#allocation46_spill] sm:$0xff] %v5558_v63  ;;  %v5580_v16 = vadd.f32 %v5470_v49, %v8382_v59  ;;  %v5582_v63 = vrot.slane %v3619_v53, 7  ;;  %v3644_v53 = vunpack.i.h.bf16 %v5362_v36  ;;  %v3663_v59 = vunpack.i.l.bf16 %v5370_v38 }
 0x1d3   : > { %v5618_v36 = vrot.slane %v3639_v32, 7  ;;  %v5622_v38 = vadd.f32 %v765_v9, %v673_v56  ;;  %v5634_v32 = vrot.slane %v3623_v40, 6  ;;  %v5638_v56 = vrot.slane %v3643_v35, 7 }
 0x1d4   : > { %v5503_v11 = vpop.permute.xlu1 %3786  ;;  %v5505_v24 = vpop.permute.xlu0 %3766  ;;  %8383 = vst [vmem:[#allocation50_spill] sm:$0xff] %v5580_v16  ;;  %8384 = vst [vmem:[#allocation51_spill] sm:$0xff] %v5582_v63  ;;  %v5616_v34 = vsel %vm647_vm2, %v5584_v15, %v5582_v63  ;;  %v3673_v16 = vunpack.i.l.bf16 %v5378_v41  ;;  %v5632_v15 = vrot.slane %v3624_v50, 6  ;;  %v5636_v30 = vrot.slane %v3644_v53, 7 }
 0x1d5   : > { %8369 = vst [vmem:[#allocation38_spill] sm:$0xff] %v5505_v24  ;;  %8389 = vst [vmem:[#allocation56_spill] sm:$0xff] %v5616_v34  ;;  %v5640_v9 = vrot.slane %v3664_v25, 7  ;;  %v5656_v45 = vsel %vm647_vm2, %v5620_v60, %v5618_v36  ;;  %v5662_v53 = vrot.slane %v3654_v1, 6 }
 0x1d6   : > { %4071 = vrot.lane.b32.xlu1 %v5201_v7, %s4953_s30  ;;  %4061 = vrot.lane.b32.xlu0 %v5201_v7, %s4949_s28  ;;  %8390 = vst [vmem:[#allocation57_spill] sm:$0xff] %v5622_v38  ;;  %8393 = vst [vmem:[#allocation60_spill] sm:$0xff] %v5632_v15  ;;  %v5642_v38 = vrot.slane %v3663_v59, 7  ;;  %v5660_v40 = vrot.slane %v3673_v16, 7  ;;  %v5672_v59 = vsel %vm647_vm2, %v5638_v56, %v5636_v30 }
 0x1d7   : > { %8394 = vst [vmem:[#allocation61_spill] sm:$0xff] %v5634_v32  ;;  %8395 = vst [vmem:[#allocation62_spill] sm:$0xff] %v5636_v30  ;;  %v4694_v16 = vadd.high.f32.bf16 %v5470_v49, %v5396_v47 }
 0x1d8   : > { %v5544_v10 = vpop.permute.xlu1 %3791  ;;  %v5546_v55 = vpop.permute.xlu0 %3776  ;;  %8396 = vst [vmem:[#allocation63_spill] sm:$0xff] %v5638_v56  ;;  %8397 = vst [vmem:[#allocation64_spill] sm:$0xff] %v5640_v9  ;;  %v1551_v1 = vsel %vm647_vm2, %v5642_v38, %v5640_v9  ;;  %v3729_v56 = vunpack.i.h.bf16 %v5428_v6 }
 0x1d9   : > { %8374 = vst [vmem:[#allocation43_spill] sm:$0xff] %v5546_v55  ;;  %8398 = vst [vmem:[#allocation65_spill] sm:$0xff] %v5642_v38  ;;  %v3699_v38 = vunpack.i.h.bf16 %v5402_v48  ;;  %v5722_v9 = vadd.f32 %v4694_v16, %v1551_v1 }
 0x1da   : > { %4066 = vrot.lane.b32.xlu0 %v5201_v7, %s4957_s27  ;;  %4081 = vrot.lane.b32.xlu1 %v5246_v20, %s4946_s22  ;;  %8402 = vst [vmem:[#allocation69_spill] sm:$0xff] %v5660_v40  ;;  %8403 = vst [vmem:[#allocation70_spill] sm:$0xff] %v5662_v53 }
 0x1db   : > { %8410 = vst [vmem:[#allocation77_spill] sm:$0xff] %v5722_v9 }
 0x1dc   : > { %v5588_v7 = vpop.permute.xlu1 %3796  ;;  %v5590_v33 = vpop.permute.xlu0 %3781 }
 0x1dd   : > { %8386 = vst [vmem:[#allocation53_spill] sm:$0xff] %v5588_v7  ;;  %8387 = vst [vmem:[#allocation54_spill] sm:$0xff] %v5590_v33  ;;  %v3648_v7 = vunpack.i.l.bf16 %v5380_v43  ;;  %v3674_v43 = vunpack.i.h.bf16 %v5378_v41  ;;  %v5644_v41 = vrot.slane %v3649_v17, 6  ;;  %v5678_v17 = vsel %vm756_vm3, %v5634_v32, %v5632_v15 }
 0x1de   : > { %4086 = vrot.lane.b32.xlu1 %v5259_v22, %s4946_s22  ;;  %4076 = vrot.lane.b32.xlu0 %v5250_v21, %s4946_s22  ;;  %8406 = vst [vmem:[#allocation73_spill] sm:$0xff] %v5678_v17 }
 0x1df   : > { %8399 = vst [vmem:[#allocation66_spill] sm:$0xff] %v5644_v41  ;;  %v5646_v63 = vrot.slane %v3648_v7, 6  ;;  %v5658_v50 = vrot.slane %v3674_v43, 7  ;;  %v5664_v7 = vrot.slane %v3653_v57, 6 }
 0x1e0   : > { %v5628_v24 = vpop.permute.xlu1 %3801  ;;  %v5630_v13 = vpop.permute.xlu0 %3806 }
 0x1e1   : > { %8391 = vst [vmem:[#allocation58_spill] sm:$0xff] %v5628_v24  ;;  %8392 = vst [vmem:[#allocation59_spill] sm:$0xff] %v5630_v13  ;;  %v5684_v57 = vsel %vm756_vm3, %v5646_v63, %v5644_v41  ;;  %v5700_v32 = vsel %vm756_vm3, %v5664_v7, %v5662_v53  ;;  %v5706_v34 = vsel %vm647_vm2, %v5660_v40, %v5658_v50  ;;  %v3718_v13 = vunpack.i.l.bf16 %v5434_v8 }
 0x1e2   : > { %8400 = vst [vmem:[#allocation67_spill] sm:$0xff] %v5646_v63  ;;  %4101 = vrot.lane.b32.xlu1 %v5246_v20, %s4945_s19  ;;  %4091 = vrot.lane.b32.xlu0 %v5264_v23, %s4946_s22  ;;  %8401 = vst [vmem:[#allocation68_spill] sm:$0xff] %v5658_v50  ;;  %v5730_v41 = vrot.slane %v3699_v38, 7  ;;  %v3724_v38 = vunpack.i.h.bf16 %v5442_v0  ;;  %s4960_s22 = smov 100  }
 0x1e3   : > { %8404 = vst [vmem:[#allocation71_spill] sm:$0xff] %v5664_v7  ;;  %8407 = vst [vmem:[#allocation74_spill] sm:$0xff] %v5706_v34  ;;  %v5736_v1 = vrot.slane %v3718_v13, 7 }
 0x1e4   : > { %v5666_v35 = vpop.permute.xlu0 %3811  ;;  %v3827_v25 = vpop.permute.xlu1 %3826  ;;  %8413 = vst [vmem:[#allocation80_spill] sm:$0xff] %v5730_v41 }
 0x1e5   : > { %8405 = vst [vmem:[#allocation72_spill] sm:$0xff] %v5666_v35  ;;  %v3829_v43 = vunpack.i.h.bf16 %v3827_v25  ;;  %v3828_v24 = vunpack.i.l.bf16 %v3827_v25  ;;  %v3698_v25 = vunpack.i.l.bf16 %v5402_v48  ;;  %v3719_v35 = vunpack.i.h.bf16 %v5434_v8 }
 0x1e6   : > { %4111 = vrot.lane.b32.xlu1 %v5264_v23, %s4945_s19  ;;  %4096 = vrot.lane.b32.xlu0 %v5250_v21, %s4945_s19 }
 0x1e7   : > { %v5718_v50 = vrot.slane %v3829_v43, 6  ;;  %v5720_v40 = vrot.slane %v3828_v24, 6  ;;  %v3728_v43 = vunpack.i.l.bf16 %v5428_v6  ;;  %v5734_v24 = vrot.slane %v3719_v35, 7 }
 0x1e8   : > { %v3832_v15 = vpop.permute.xlu1 %3831  ;;  %v3817_v17 = vpop.permute.xlu0 %3816  ;;  %v3723_v6 = vunpack.i.l.bf16 %v5442_v0  ;;  %v641_v41 = vrot.slane %v3698_v25, 7  ;;  %v5763_v0 = vrot.slane %v3729_v56, 6  ;;  %v5781_v25 = vrot.slane %v3724_v38, 7 }
 0x1e9   : > { %v3819_v7 = vunpack.i.h.bf16 %v3817_v17  ;;  %v3818_v53 = vunpack.i.l.bf16 %v3817_v17  ;;  %8408 = vst [vmem:[#allocation75_spill] sm:$0xff] %v5718_v50  ;;  %8409 = vst [vmem:[#allocation76_spill] sm:$0xff] %v5720_v40  ;;  %v3834_v34 = vunpack.i.h.bf16 %v3832_v15  ;;  %v3833_v48 = vunpack.i.l.bf16 %v3832_v15 }
 0x1ea   : > { %4116 = vrot.lane.b32.xlu1 %v5284_v27, %s4948_s26  ;;  %4106 = vrot.lane.b32.xlu0 %v5259_v22, %s4945_s19  ;;  %v763_v35 = vsel %vm756_vm3, %v5720_v40, %v5718_v50  ;;  %v3733_v40 = vunpack.i.l.bf16 %v5436_v12  ;;  %v949_v56 = vsel %vm647_vm2, %v5736_v1, %v5734_v24  ;;  %v5796_v38 = vsel %vm647_vm2, %v5489_v5, %v641_v41  ;;  %s4959_s19 = smov 108   ;;  %s4962_s26 = smov 68  }
 0x1eb   : > { %v5724_v47 = vrot.slane %v3819_v7, 7  ;;  %v5726_v63 = vrot.slane %v3818_v53, 7  ;;  %v5755_v16 = vrot.slane %v3834_v34, 6  ;;  %v3789_v5 = vunpack.i.h.bf16 %v5503_v11 }
 0x1ec   : > { %v5728_v8 = vpop.permute.xlu1 %3841  ;;  %v3822_v17 = vpop.permute.xlu0 %3821 }
 0x1ed   : > { %8411 = vst [vmem:[#allocation78_spill] sm:$0xff] %v5724_v47  ;;  %8412 = vst [vmem:[#allocation79_spill] sm:$0xff] %v5726_v63  ;;  %v3824_v30 = vunpack.i.h.bf16 %v3822_v17  ;;  %v654_v15 = vsel %vm647_vm2, %v5726_v63, %v5724_v47  ;;  %v3823_v53 = vunpack.i.l.bf16 %v3822_v17  ;;  %v5757_v17 = vrot.slane %v3833_v48, 6 }
 0x1ee   : > { %4126 = vrot.lane.b32.xlu1 %v5284_v27, %s4949_s28  ;;  %4121 = vrot.lane.b32.xlu0 %v5284_v27, %s4947_s23  ;;  %v667_v7 = vadd.f32 %v654_v15, %v5483_v31  ;;  %8415 = vst [vmem:[#allocation82_spill] sm:$0xff] %v5755_v16  ;;  %v3734_v15 = vunpack.i.h.bf16 %v5436_v12  ;;  %s4961_s23 = smov 92   ;;  %s4963_s28 = smov 60  }
 0x1ef   : > { %v5749_v13 = vrot.slane %v3824_v30, 7  ;;  %8416 = vst [vmem:[#allocation83_spill] sm:$0xff] %v5757_v17  ;;  %v5759_v9 = vrot.slane %v3823_v53, 7  ;;  %v5765_v30 = vrot.slane %v3728_v43, 6  ;;  %v5785_v43 = vrot.slane %v3723_v6, 7 }
 0x1f0   : > { %v3862_v63 = vpop.permute.xlu1 %3861  ;;  %v5761_v47 = vpop.permute.xlu0 %3836  ;;  %v776_v31 = vadd.f32 %v763_v35, %v667_v7  ;;  %v767_v53 = vsel %vm756_vm3, %v5757_v17, %v5755_v16  ;;  %v5802_v6 = vsel %vm647_vm2, %v641_v41, %v5491_v42  ;;  %v5810_v17 = vrot.slane %v3733_v40, 6 }
 0x1f1   : > { %8414 = vst [vmem:[#allocation81_spill] sm:$0xff] %v5749_v13  ;;  %8417 = vst [vmem:[#allocation84_spill] sm:$0xff] %v5759_v9  ;;  %v658_v34 = vsel %vm647_vm2, %v5759_v9, %v5749_v13  ;;  %v3864_v7 = vunpack.i.h.bf16 %v3862_v63  ;;  %v3863_v35 = vunpack.i.l.bf16 %v3862_v63  ;;  %v1057_v63 = vsel %vm756_vm3, %v5765_v30, %v5763_v0 }
 0x1f2   : > { %8418 = vst [vmem:[#allocation85_spill] sm:$0xff] %v5761_v47  ;;  %4131 = vrot.lane.b32.xlu1 %v5250_v21, %s4951_s4  ;;  %4136 = vrot.lane.b32.xlu0 %v5246_v20, %s4951_s4  ;;  %v4696_v12 = vadd.high.f32.bf16 %v776_v31, %v5412_v52  ;;  %v679_v48 = vadd.f32 %v658_v34, %v5495_v61  ;;  %v5808_v34 = vrot.slane %v3734_v15, 6  ;;  %v3788_v42 = vunpack.i.l.bf16 %v5503_v11  ;;  %s4965_s4 = smov 104  }
 0x1f3   : > { %v953_v40 = vsel %vm647_vm2, %v5785_v43, %v5781_v25  ;;  %v5826_v15 = vrot.slane %v3864_v7, 7  ;;  %v3703_v52 = vunpack.i.l.bf16 %v5426_v4 }
 0x1f4   : > { %v3867_v47 = vpop.permute.xlu1 %3866  ;;  %v5791_v50 = vpop.permute.xlu0 %3846  ;;  %v962_v31 = vadd.f32 %v4696_v12, %v949_v56  ;;  %v788_v61 = vadd.f32 %v767_v53, %v679_v48  ;;  %v3689_v12 = vunpack.i.h.bf16 %v5410_v51  ;;  %v5828_v48 = vrot.slane %v3863_v35, 7 }
 0x1f5   : > { %8419 = vst [vmem:[#allocation86_spill] sm:$0xff] %v5826_v15  ;;  %v1061_v7 = vsel %vm756_vm3, %v5810_v17, %v5808_v34  ;;  %v5845_v35 = vrot.slane %v3789_v5, 7 }
 0x1f6   : > { %4146 = vrot.lane.b32.xlu1 %v5246_v20, %s4950_s29  ;;  %4141 = vrot.lane.b32.xlu0 %v5250_v21, %s4950_s29  ;;  %v1070_v41 = vadd.f32 %v1057_v63, %v962_v31  ;;  %v4697_v56 = vadd.high.f32.bf16 %v788_v61, %v5420_v2  ;;  %8420 = vst [vmem:[#allocation87_spill] sm:$0xff] %v5828_v48  ;;  %v3869_v61 = vunpack.i.h.bf16 %v3867_v47  ;;  %v3868_v63 = vunpack.i.l.bf16 %v3867_v47  ;;  %s4964_s29 = smov 52  }
 0x1f7   : > { %v3688_v2 = vunpack.i.l.bf16 %v5410_v51 }
 0x1f8   : > { %v5830_v53 = vpop.permute.xlu1 %3871  ;;  %v5832_v16 = vpop.permute.xlu0 %3851  ;;  %v4698_v11 = vadd.high.f32.bf16 %v1070_v41, %v5364_v37  ;;  %v974_v31 = vadd.f32 %v4697_v56, %v953_v40  ;;  %v5847_v41 = vrot.slane %v3788_v42, 7  ;;  %v3794_v56 = vunpack.i.h.bf16 %v5544_v10 }
 0x1f9   : > { %8421 = vst [vmem:[#allocation88_spill] sm:$0xff] %v5830_v53  ;;  %8422 = vst [vmem:[#allocation89_spill] sm:$0xff] %v5832_v16  ;;  %v3793_v40 = vunpack.i.l.bf16 %v5544_v10  ;;  %v1549_v53 = vsel %vm647_vm2, %v5828_v48, %v5826_v15  ;;  %v4699_v37 = vadd.high.f32.bf16 %v5470_v49, %v5832_v16  ;;  %v5866_v10 = vrot.slane %v3868_v63, 7  ;;  %v8472_v16 = vld [vmem:[#allocation40_spill] sm:$0xff] }
 0x1fa   : > { %4151 = vrot.lane.b32.xlu1 %v5250_v21, %s4954_s7  ;;  %4156 = vrot.lane.b32.xlu0 %v5246_v20, %s4954_s7  ;;  %v1256_v47 = vadd.f32 %v4698_v11, %v5656_v45  ;;  %v1082_v51 = vadd.f32 %v1061_v7, %v974_v31  ;;  %v5864_v31 = vrot.slane %v3869_v61, 7  ;;  %v5868_v7 = vrot.slane %v3689_v12, 7  ;;  %s4968_s7 = smov 56  }
 0x1fb   : > { %8425 = vst [vmem:[#allocation92_spill] sm:$0xff] %v5866_v10  ;;  %v1562_v9 = vadd.f32 %v4699_v37, %v1549_v53  ;;  %v5874_v48 = vrot.slane %v3688_v2, 7  ;;  %v3694_v15 = vunpack.i.h.bf16 %v5418_v58  ;;  %v752_v37 = vrot.slane %v3703_v52, 6 }
 0x1fc   : > { %v5858_v5 = vpop.permute.xlu1 %3881  ;;  %v5860_v42 = vpop.permute.xlu0 %3856  ;;  %v1364_v45 = vadd.f32 %v5684_v57, %v1256_v47  ;;  %v4700_v11 = vadd.high.f32.bf16 %v1082_v51, %v5372_v39  ;;  %8424 = vst [vmem:[#allocation91_spill] sm:$0xff] %v5864_v31  ;;  %v3693_v57 = vunpack.i.l.bf16 %v5418_v58  ;;  %v1729_v53 = vsel %vm647_vm2, %v5847_v41, %v5845_v35  ;;  %v8448_v39 = vld [vmem:[#allocation72_spill] sm:$0xff] }
 0x1fd   : > { %8423 = vst [vmem:[#allocation90_spill] sm:$0xff] %v5860_v42  ;;  %v4701_v2 = vadd.high.f32.bf16 %v1562_v9, %v5546_v55  ;;  %v4702_v61 = vadd.high.f32.bf16 %v5470_v49, %v5860_v42  ;;  %v5895_v47 = vrot.slane %v3794_v56, 7  ;;  %v5897_v51 = vrot.slane %v3793_v40, 7 }
 0x1fe   : > { %4161 = vrot.lane.b32.xlu1 %v5250_v21, %s4956_s8  ;;  %4166 = vrot.lane.b32.xlu0 %v5246_v20, %s4956_s8  ;;  %1382 = vst.msk [vmem:[%s5879_s11 + $0x8] sm:$0xff] %vm326_vm1, %v1364_v45  ;;  %v1268_v12 = vadd.f32 %v4700_v11, %v5672_v59  ;;  %v1553_v59 = vsel %vm647_vm2, %v5866_v10, %v5864_v31  ;;  %v5906_v11 = vrot.slane %v3694_v15, 7  ;;  %v5908_v55 = vrot.slane %v3693_v57, 7 }
 0x1ff   : > { %v1742_v45 = vadd.f32 %v4701_v2, %v1729_v53  ;;  %v1574_v9 = vadd.f32 %v4702_v61, %v1553_v59  ;;  %v3704_v56 = vunpack.i.h.bf16 %v5426_v4  ;;  %v759_v4 = vsel %vm756_vm3, %v5540_v54, %v752_v37 }
 0x200   : > { %v5891_v58 = vpop.permute.xlu0 %3876  ;;  %v5893_v63 = vpop.permute.xlu1 %3891  ;;  %v1376_v52 = vadd.f32 %v5700_v32, %v1268_v12  ;;  %v674_v32 = vadd.f32 %v5796_v38, %v5487_v29  ;;  %v672_v57 = vadd.f32 %v5802_v6, %v5525_v28  ;;  %v1909_v29 = vsel %vm647_vm2, %v5874_v48, %v5868_v7 }
 0x201   : > { %8426 = vst [vmem:[#allocation93_spill] sm:$0xff] %v5893_v63  ;;  %v4703_v40 = vadd.high.f32.bf16 %v1742_v45, %v5386_v44  ;;  %v4704_v12 = vadd.high.f32.bf16 %v1574_v9, %v5590_v33  ;;  %v3748_v38 = vunpack.i.l.bf16 %v5450_v18  ;;  %v1733_v2 = vsel %vm647_vm2, %v5897_v51, %v5895_v47  ;;  %v8445_v44 = vld [vmem:[#allocation71_spill] sm:$0xff]  ;;  %v8453_v63 = vld [vmem:[#allocation29_spill] sm:$0xff] }
 0x202   : > { %4171 = vrot.lane.b32.xlu1 %v5259_v22, %s4956_s8  ;;  %1394 = vst.msk [vmem:[%s5879_s11 + $0x68] sm:$0xff] %vm326_vm1, %v1376_v52  ;;  %4176 = vrot.lane.b32.xlu0 %v5264_v23, %s4956_s8  ;;  %v771_v54 = vsel %vm756_vm3, %v752_v37, %v5542_v26  ;;  %v3753_v61 = vunpack.i.l.bf16 %v5458_v14  ;;  %v1913_v52 = vsel %vm647_vm2, %v5908_v55, %v5906_v11  ;;  %v5947_v59 = vrot.slane %v3704_v56, 6  ;;  %s3507_s8 = smul.u32 (%p8698_p8), 216, %s4930_s15 }
 0x203   : > { %v1922_v28 = vadd.f32 %v4703_v40, %v1909_v29  ;;  %v1754_v6 = vadd.f32 %v4704_v12, %v1733_v2  ;;  %v3758_v45 = vunpack.i.l.bf16 %v5460_v19  ;;  %v5952_v26 = vadd.f32 %v759_v4, %v674_v32  ;;  %v8430_v32 = vld [vmem:[#allocation36_spill] sm:$0xff] }
 0x204   : > { %v5919_v53 = vpop.permute.xlu0 %3886  ;;  %v5921_v15 = vpop.permute.xlu1 %3896  ;;  %v3749_v37 = vunpack.i.h.bf16 %v5450_v18  ;;  %v3763_v9 = vunpack.i.l.bf16 %v5474_v3  ;;  %v5963_v29 = vadd.f32 %v771_v54, %v672_v57  ;;  %v1231_v2 = vrot.slane %v3748_v38, 7 }
 0x205   : > { %8427 = vst [vmem:[#allocation94_spill] sm:$0xff] %v5921_v15  ;;  %8428 = vst [vmem:[#allocation95_spill] sm:$0xff] %v5952_v26  ;;  %v4705_v40 = vadd.high.f32.bf16 %v1754_v6, %v5394_v46  ;;  %v3754_v33 = vunpack.i.h.bf16 %v5458_v14  ;;  %v3773_v4 = vunpack.i.l.bf16 %v8430_v32  ;;  %v1235_v10 = vrot.slane %v3753_v61, 7 }
 0x206   : > { %4186 = vrot.lane.b32.xlu1 %v5246_v20, %s4952_s6  ;;  %4181 = vrot.lane.b32.xlu0 %v5250_v21, %s4952_s6  ;;  %3404 = vst.msk [vmem:[%s5879_s11 + $0x98] sm:$0xff] %vm326_vm1, %v1922_v28  ;;  %8429 = vst [vmem:[#allocation96_spill] sm:$0xff] %v5963_v29  ;;  %v3759_v18 = vunpack.i.h.bf16 %v5460_v19  ;;  %v1339_v28 = vrot.slane %v3758_v45, 6  ;;  %v3774_v6 = vunpack.i.h.bf16 %v8430_v32  ;;  %v5973_v57 = vrot.slane %v3749_v37, 7  ;;  %v8433_v37 = vld [vmem:[#allocation62_spill] sm:$0xff] }
 0x207   : > { %v1934_v31 = vadd.f32 %v4705_v40, %v1913_v52  ;;  %v3764_v38 = vunpack.i.h.bf16 %v5474_v3  ;;  %v1343_v14 = vrot.slane %v3763_v9, 6  ;;  %v5985_v61 = vsel %vm647_vm2, %v5618_v36, %v1231_v2  ;;  %v8435_v9 = vld [vmem:[#allocation63_spill] sm:$0xff] }
 0x208   : > { %v5959_v12 = vpop.permute.xlu0 %3901  ;;  %v5961_v56 = vpop.permute.xlu1 %3911  ;;  %8431 = vst [vmem:[#allocation36_spill] sm:$0xff] %v5985_v61  ;;  %v5990_v52 = vsel %vm647_vm2, %v1231_v2, %v5620_v60  ;;  %v5992_v45 = vrot.slane %v3754_v33, 7  ;;  %v1539_v3 = vrot.slane %v3773_v4, 7  ;;  %v6002_v40 = vsel %vm647_vm2, %v1235_v10, %v8435_v9  ;;  %v8437_v60 = vld [vmem:[#allocation66_spill] sm:$0xff]  ;;  %v8439_v2 = vld [vmem:[#allocation67_spill] sm:$0xff] }
 0x209   : > { %3416 = vst.msk [vmem:[%s5879_s11 + $0xf8] sm:$0xff] %vm326_vm1, %v1934_v31  ;;  %8432 = vst [vmem:[#allocation97_spill] sm:$0xff] %v5990_v52  ;;  %v5997_v31 = vsel %vm647_vm2, %v8433_v37, %v1235_v10  ;;  %v6004_v36 = vrot.slane %v3759_v18, 6  ;;  %v6011_v33 = vsel %vm756_vm3, %v8437_v60, %v1339_v28  ;;  %v6016_v32 = vsel %vm756_vm3, %v1339_v28, %v8439_v2  ;;  %v8441_v37 = vld [vmem:[#allocation38_spill] sm:$0xff] }
 0x20a   : > { %4196 = vrot.lane.b32.xlu1 %v5264_v23, %s4952_s6  ;;  %4191 = vrot.lane.b32.xlu0 %v5259_v22, %s4952_s6  ;;  %8434 = vst [vmem:[#allocation62_spill] sm:$0xff] %v5997_v31  ;;  %8436 = vst [vmem:[#allocation63_spill] sm:$0xff] %v6002_v40  ;;  %v6018_v4 = vrot.slane %v3774_v6, 7  ;;  %v4706_v10 = vadd.low.f32.bf16 %v5470_v49, %v8441_v37  ;;  %v6024_v18 = vrot.slane %v3764_v38, 6  ;;  %v8442_v9 = vld [vmem:[#allocation70_spill] sm:$0xff]  ;;  %v3884_v46 = vunpack.i.h.bf16 %v5858_v5  ;;  %v8447_v38 = vld [vmem:[#allocation59_spill] sm:$0xff] }
 0x20b   : > { %8438 = vst [vmem:[#allocation66_spill] sm:$0xff] %v6011_v33  ;;  %8440 = vst [vmem:[#allocation67_spill] sm:$0xff] %v6016_v32  ;;  %v6029_v60 = vsel %vm756_vm3, %v8442_v9, %v1343_v14  ;;  %v3883_v28 = vunpack.i.l.bf16 %v5858_v5  ;;  %v6040_v31 = vsel %vm756_vm3, %v1343_v14, %v8445_v44  ;;  %v3808_v40 = vunpack.i.l.bf16 %v8447_v38  ;;  %v8449_v33 = vld [vmem:[#allocation65_spill] sm:$0xff]  ;;  %v8450_v44 = vld [vmem:[#allocation64_spill] sm:$0xff]  ;;  %s4966_s6 = smov 96  }
 0x20c   : > { %v5978_v54 = vpop.permute.xlu0 %3906  ;;  %v5980_v19 = vpop.permute.xlu1 %3916  ;;  %8443 = vst [vmem:[#allocation38_spill] sm:$0xff] %v6029_v60  ;;  %8446 = vst [vmem:[#allocation71_spill] sm:$0xff] %v6040_v31  ;;  %v3813_v15 = vunpack.i.l.bf16 %v8448_v39  ;;  %v1557_v9 = vsel %vm647_vm2, %v1539_v3, %v8449_v33  ;;  %v3889_v60 = vunpack.i.h.bf16 %v5919_v53  ;;  %v3888_v32 = vunpack.i.l.bf16 %v5919_v53 }
 0x20d   : > { %v1545_v14 = vsel %vm647_vm2, %v8450_v44, %v1539_v3  ;;  %v3844_v31 = vunpack.i.h.bf16 %v5728_v8  ;;  %v3843_v61 = vunpack.i.l.bf16 %v5728_v8  ;;  %v3809_v5 = vunpack.i.h.bf16 %v8447_v38 }
 0x20e   : > { %4201 = vrot.lane.b32.xlu1 %v5284_v27, %s4957_s27  ;;  %4206 = vrot.lane.b32.xlu0 %v5284_v27, %s4953_s30  ;;  %v6060_v33 = vadd.f32 %v4706_v10, %v1545_v14  ;;  %v642_v52 = vrot.slane %v3884_v46, 7  ;;  %v636_v53 = vrot.slane %v3883_v28, 7  ;;  %v8454_v3 = vadd.low.f32.bf16 %v5470_v49, %v8453_v63  ;;  %s4967_s30 = smov 64  }
 0x20f   : > { %v1897_v27 = vrot.slane %v3808_v40, 7  ;;  %v3814_v8 = vunpack.i.h.bf16 %v8448_v39  ;;  %v1901_v13 = vrot.slane %v3813_v15, 7  ;;  %v3849_v10 = vunpack.i.h.bf16 %v5791_v50 }
 0x210   : > { %v6033_v2 = vpop.permute.xlu0 %3931  ;;  %v6035_v6 = vpop.permute.xlu1 %3921  ;;  %8451 = vst [vmem:[#allocation59_spill] sm:$0xff] %v6060_v33  ;;  %v6070_v44 = vadd.f32 %v8454_v3, %v1557_v9  ;;  %v3848_v14 = vunpack.i.l.bf16 %v5791_v50  ;;  %v753_v38 = vrot.slane %v3889_v60, 6  ;;  %v747_v46 = vrot.slane %v3888_v32, 6  ;;  %v8466_v3 = vld [vmem:[#allocation16_spill] sm:$0xff] }
 0x211   : > { %8444 = vst [vmem:[#allocation70_spill] sm:$0xff] %v6035_v6  ;;  %v6077_v28 = vrot.slane %v3844_v31, 7  ;;  %v6079_v33 = vrot.slane %v3843_v61, 7  ;;  %v6083_v63 = vrot.slane %v3809_v5, 7  ;;  %v651_v39 = vsel %vm647_vm2, %v636_v53, %v642_v52 }
 0x212   : > { %4216 = vrot.lane.b32.xlu1 %v5246_v20, %s4955_s25  ;;  %4211 = vrot.lane.b32.xlu0 %v5250_v21, %s4955_s25  ;;  %8455 = vst [vmem:[#allocation65_spill] sm:$0xff] %v6070_v44  ;;  %v6094_v40 = vsel %vm647_vm2, %v5868_v7, %v1897_v27  ;;  %v6099_v61 = vsel %vm647_vm2, %v1897_v27, %v5874_v48  ;;  %v6101_v31 = vrot.slane %v3814_v8, 7  ;;  %v6108_v60 = vrot.slane %v3849_v10, 6  ;;  %v8467_v8 = vld [vmem:[#allocation80_spill] sm:$0xff]  ;;  %s3518_s25 = smul.u32 (%p8698_p8), 18, %s4926_s14 }
 0x213   : > { %8456 = vst [vmem:[#allocation64_spill] sm:$0xff] %v6077_v28  ;;  %8457 = vst [vmem:[#allocation29_spill] sm:$0xff] %v6079_v33  ;;  %v6106_v32 = vsel %vm647_vm2, %v5906_v11, %v1901_v13  ;;  %v6110_v9 = vrot.slane %v3848_v14, 6  ;;  %v760_v7 = vsel %vm756_vm3, %v747_v46, %v753_v38  ;;  %v6119_v27 = vsel %vm647_vm2, %v1901_v13, %v5908_v55  ;;  %v8465_v11 = vld [vmem:[#allocation39_spill] sm:$0xff] }
 0x214   : > { %v6063_v6 = vpop.permute.xlu0 %3936  ;;  %v6065_v29 = vpop.permute.xlu1 %3926  ;;  %8458 = vst [vmem:[#allocation98_spill] sm:$0xff] %v6094_v40  ;;  %8459 = vst [vmem:[#allocation99_spill] sm:$0xff] %v6099_v61  ;;  %v6125_v48 = vsel %vm647_vm2, %v6079_v33, %v6077_v28  ;;  %v677_v5 = vadd.f32 %v651_v39, %v8465_v11  ;;  %v657_v10 = vsel %vm647_vm2, %v8467_v8, %v636_v53  ;;  %v3879_v14 = vunpack.i.h.bf16 %v5891_v58  ;;  %v8469_v61 = vld [vmem:[#allocation6_spill] sm:$0xff]  ;;  %v8470_v40 = vld [vmem:[#allocation37_spill] sm:$0xff]  ;;  %s2943_s14 = sadd.s32 (%p8698_p8), %s3518_s25, %s3507_s8 }
 0x215   : > { %8452 = vst [vmem:[#allocation72_spill] sm:$0xff] %v6065_v29  ;;  %8460 = vst [vmem:[#allocation100_spill] sm:$0xff] %v6106_v32  ;;  %v663_v13 = vsel %vm647_vm2, %v642_v52, %v8467_v8  ;;  %v6146_v11 = vsel %vm756_vm3, %v6110_v9, %v6108_v60  ;;  %v3903_v44 = vunpack.i.l.bf16 %v5959_v12  ;;  %v676_v33 = vadd.f32 %v657_v10, %v8470_v40  ;;  %s3457_s15 = sshll.u32 (%p8698_p8), %s2943_s14, 3 }
 0x216   : > { %4221 = vrot.lane.b32.xlu1 %v5250_v21, %s4958_s9  ;;  %4226 = vrot.lane.b32.xlu0 %v5246_v20, %s4958_s9  ;;  %8461 = vst [vmem:[#allocation101_spill] sm:$0xff] %v6108_v60  ;;  %8462 = vst [vmem:[#allocation102_spill] sm:$0xff] %v6110_v9  ;;  %v786_v39 = vadd.f32 %v760_v7, %v677_v5  ;;  %v766_v52 = vsel %vm756_vm3, %v5947_v59, %v747_v46  ;;  %v3913_v7 = vunpack.i.l.bf16 %v5961_v56  ;;  %v8474_v46 = vld [vmem:[#allocation24_spill] sm:$0xff]  ;;  %s8051_s9 = scalar_lea.vmem (%p8698_p8), %s8203_s3, %s3457_s15 }
 0x217   : > { %8463 = vst [vmem:[#allocation103_spill] sm:$0xff] %v6119_v27  ;;  %8464 = vst [vmem:[#allocation104_spill] sm:$0xff] %v6125_v48  ;;  %v3878_v27 = vunpack.i.l.bf16 %v5891_v58  ;;  %v6162_v5 = vrot.slane %v3879_v14, 7  ;;  %v675_v40 = vadd.f32 %v663_v13, %v8472_v16  ;;  %v3904_v58 = vunpack.i.h.bf16 %v5959_v12  ;;  %v8476_v16 = vld [vmem:[#allocation8_spill] sm:$0xff] }
 0x218   : > { %v6087_v15 = vpop.permute.xlu0 %3956  ;;  %v6089_v50 = vpop.permute.xlu1 %3941  ;;  %8468 = vst [vmem:[#allocation39_spill] sm:$0xff] %v6146_v11  ;;  %v3914_v42 = vunpack.i.h.bf16 %v5961_v56  ;;  %v4710_v9 = vadd.high.f32.bf16 %v786_v39, %v8474_v46  ;;  %v6174_v60 = vadd.f32 %v766_v52, %v676_v33  ;;  %v937_v28 = vrot.slane %v3903_v44, 7  ;;  %v8475_v11 = vld [vmem:[#allocation9_spill] sm:$0xff] }
 0x219   : > { %8471 = vst [vmem:[#allocation80_spill] sm:$0xff] %v6162_v5  ;;  %v6169_v10 = vrot.slane %v3878_v27, 7  ;;  %v3908_v14 = vunpack.i.l.bf16 %v5978_v54  ;;  %v1045_v48 = vrot.slane %v3913_v7, 6  ;;  %v3918_v29 = vunpack.i.l.bf16 %v5980_v19 }
 0x21a   : > { %4236 = vrot.lane.b32.xlu1 %v5250_v21, %s4959_s19  ;;  %4231 = vrot.lane.b32.xlu0 %v8466_v3, %s4959_s19  ;;  %v772_v12 = vsel %vm756_vm3, %v753_v38, %v5947_v59  ;;  %v3909_v56 = vunpack.i.h.bf16 %v5978_v54  ;;  %v3919_v33 = vunpack.i.h.bf16 %v5980_v19  ;;  %v3934_v44 = vunpack.i.h.bf16 %v6033_v2  ;;  %v8480_v54 = vld [vmem:[#allocation56_spill] sm:$0xff] }
 0x21b   : > { %8473 = vst [vmem:[#allocation37_spill] sm:$0xff] %v6169_v10  ;;  %v3933_v27 = vunpack.i.l.bf16 %v6033_v2  ;;  %v6197_v52 = vsel %vm647_vm2, %v6169_v10, %v6162_v5  ;;  %v6199_v7 = vrot.slane %v3904_v58, 7  ;;  %v6201_v59 = vrot.slane %v3914_v42, 6 }
 0x21c   : > { %v6134_v32 = vpop.permute.xlu0 %3971  ;;  %v6136_v55 = vpop.permute.xlu1 %3946  ;;  %8479 = vst [vmem:[#allocation105_spill] sm:$0xff] %v6197_v52  ;;  %v972_v19 = vadd.f32 %v4710_v9, %v8480_v54  ;;  %v6207_v2 = vsel %vm647_vm2, %v5734_v24, %v937_v28  ;;  %v941_v38 = vrot.slane %v3908_v14, 7  ;;  %v6218_v42 = vsel %vm647_vm2, %v937_v28, %v5736_v1 }
 0x21d   : > { %v6223_v9 = vsel %vm756_vm3, %v5763_v0, %v1045_v48  ;;  %v6228_v24 = vsel %vm756_vm3, %v1045_v48, %v5765_v30  ;;  %v1049_v58 = vrot.slane %v3918_v29, 6  ;;  %v6232_v14 = vrot.slane %v3909_v56, 7  ;;  %v8484_v30 = vld [vmem:[#allocation73_spill] sm:$0xff] }
 0x21e   : > { %4246 = vrot.lane.b32.xlu1 %v8469_v61, %s4959_s19  ;;  %4241 = vrot.lane.b32.xlu0 %v5246_v20, %s4959_s19  ;;  %v1232_v1 = vrot.slane %v3934_v44, 7  ;;  %v1226_v28 = vrot.slane %v3933_v27, 7  ;;  %v3939_v0 = vunpack.i.h.bf16 %v6063_v6  ;;  %v3938_v5 = vunpack.i.l.bf16 %v6063_v6 }
 0x21f   : > { %v6243_v48 = vadd.f32 %v8484_v30, %v972_v19  ;;  %v6248_v29 = vsel %vm647_vm2, %v5781_v25, %v941_v38  ;;  %v3944_v56 = vunpack.i.h.bf16 %v6089_v50  ;;  %v6257_v6 = vsel %vm647_vm2, %v941_v38, %v5785_v43 }
 0x220   : > { %v6164_v8 = vpop.permute.xlu0 %3976  ;;  %v6166_v53 = vpop.permute.xlu1 %3951  ;;  %8486 = vst [vmem:[#allocation107_spill] sm:$0xff] %v6248_v29  ;;  %v6262_v44 = vsel %vm756_vm3, %v5808_v34, %v1049_v58  ;;  %v3959_v25 = vunpack.i.h.bf16 %v6087_v15  ;;  %v3958_v27 = vunpack.i.l.bf16 %v6087_v15  ;;  %v6276_v43 = vsel %vm647_vm2, %v1232_v1, %v5973_v57 }
 0x221   : > { %8485 = vst [vmem:[#allocation73_spill] sm:$0xff] %v6243_v48  ;;  %8487 = vst [vmem:[#allocation108_spill] sm:$0xff] %v6262_v44  ;;  %v6280_v34 = vsel %vm647_vm2, %v1226_v28, %v1232_v1  ;;  %v6287_v15 = vsel %vm647_vm2, %v5973_v57, %v1226_v28  ;;  %v1236_v30 = vrot.slane %v3939_v0, 7  ;;  %v1340_v52 = vrot.slane %v3944_v56, 6 }
 0x222   : > { %4256 = vrot.lane.b32.xlu1 %v8475_v11, %s4959_s19  ;;  %4251 = vrot.lane.b32.xlu0 %v8476_v16, %s4959_s19  ;;  %v1540_v1 = vrot.slane %v3959_v25, 7  ;;  %v1534_v48 = vrot.slane %v3958_v27, 7  ;;  %v3974_v44 = vunpack.i.h.bf16 %v6134_v32  ;;  %v3978_v57 = vunpack.i.l.bf16 %v6164_v8 }
 0x223   : > { %v6319_v25 = vsel %vm756_vm3, %v1340_v52, %v6004_v36 }
 0x224   : > { %v6189_v13 = vpop.permute.xlu0 %3981  ;;  %v6191_v39 = vpop.permute.xlu1 %3961 }
 0x225   : > { %8477 = vst [vmem:[#allocation40_spill] sm:$0xff] %v6189_v13  ;;  %8478 = vst [vmem:[#allocation24_spill] sm:$0xff] %v6191_v39  ;;  %v6211_v13 = vadd.f32 %v772_v12, %v675_v40  ;;  %v8481_v40 = vld [vmem:[#allocation17_spill] sm:$0xff]  ;;  %v6234_v12 = vrot.slane %v3919_v33, 6  ;;  %v3943_v33 = vunpack.i.l.bf16 %v6089_v50  ;;  %v6271_v50 = vsel %vm756_vm3, %v1049_v58, %v5810_v17 }
 0x226   : > { %4266 = vrot.lane.b32.xlu1 %v5259_v22, %s4959_s19  ;;  %4261 = vrot.lane.b32.xlu0 %v8481_v40, %s4959_s19  ;;  %8488 = vst [vmem:[#allocation109_spill] sm:$0xff] %v6271_v50  ;;  %v1230_v17 = vrot.slane %v3938_v5, 7  ;;  %v3973_v58 = vunpack.i.l.bf16 %v6134_v32  ;;  %v3948_v39 = vunpack.i.l.bf16 %v6136_v55  ;;  %v4712_v5 = vadd.high.f32.bf16 %v5470_v49, %v6166_v53 }
 0x228   : > { %v6236_v54 = vpop.permute.xlu0 %3986  ;;  %v6238_v10 = vpop.permute.xlu1 %3966  ;;  %v6309_v56 = vsel %vm647_vm2, %v1230_v17, %v1236_v30  ;;  %v6314_v32 = vsel %vm647_vm2, %v5992_v45, %v1230_v17  ;;  %v1338_v50 = vrot.slane %v3948_v39, 6  ;;  %v3979_v17 = vunpack.i.h.bf16 %v6164_v8 }
 0x229   : > { %8482 = vst [vmem:[#allocation56_spill] sm:$0xff] %v6236_v54  ;;  %8483 = vst [vmem:[#allocation106_spill] sm:$0xff] %v6238_v10  ;;  %v1334_v54 = vrot.slane %v3943_v33, 6  ;;  %v3949_v10 = vunpack.i.h.bf16 %v6136_v55  ;;  %v6305_v55 = vsel %vm647_vm2, %v1236_v30, %v5992_v45  ;;  %v1717_v33 = vrot.slane %v3973_v58, 7 }
 0x22a   : > { %4276 = vrot.lane.b32.xlu1 %v8466_v3, %s4960_s22  ;;  %4271 = vrot.lane.b32.xlu0 %v5264_v23, %s4959_s19  ;;  %8489 = vst [vmem:[#allocation110_spill] sm:$0xff] %v6305_v55  ;;  %8490 = vst [vmem:[#allocation111_spill] sm:$0xff] %v6314_v32  ;;  %v6332_v30 = vrot.slane %v3974_v44, 7  ;;  %v1546_v58 = vsel %vm647_vm2, %v1534_v48, %v1540_v1 }
 0x22b   : > { %v6323_v27 = vsel %vm756_vm3, %v1334_v54, %v1340_v52  ;;  %v1344_v55 = vrot.slane %v3949_v10, 6  ;;  %v6330_v45 = vsel %vm756_vm3, %v6004_v36, %v1334_v54  ;;  %v1721_v10 = vrot.slane %v3978_v57, 7 }
 0x22c   : > { %v3992_v19 = vpop.permute.xlu1 %3991  ;;  %v6282_v38 = vpop.permute.xlu0 %4001  ;;  %v1572_v39 = vadd.f32 %v4712_v5, %v1546_v58  ;;  %v4713_v52 = vadd.low.f32.bf16 %v5470_v49, %v6166_v53  ;;  %v1558_v36 = vsel %vm647_vm2, %v1540_v1, %v6018_v4  ;;  %v6347_v8 = vsel %vm647_vm2, %v5845_v35, %v1717_v33 }
 0x22d   : > { %8491 = vst [vmem:[#allocation112_spill] sm:$0xff] %v6347_v8  ;;  %v6352_v54 = vsel %vm647_vm2, %v1717_v33, %v5847_v41  ;;  %v1552_v53 = vsel %vm647_vm2, %v6018_v4, %v1534_v48  ;;  %v3994_v44 = vunpack.i.h.bf16 %v3992_v19  ;;  %v6360_v57 = vsel %vm756_vm3, %v1344_v55, %v6024_v18  ;;  %v8499_v33 = vld [vmem:[#allocation30_spill] sm:$0xff] }
 0x22e   : > { %4286 = vrot.lane.b32.xlu1 %v5246_v20, %s4960_s22  ;;  %4281 = vrot.lane.b32.xlu0 %v5250_v21, %s4960_s22  ;;  %8492 = vst [vmem:[#allocation113_spill] sm:$0xff] %v6352_v54  ;;  %8493 = vst [vmem:[#allocation114_spill] sm:$0xff] %v6360_v57  ;;  %v6364_v1 = vsel %vm756_vm3, %v1338_v50, %v1344_v55  ;;  %v6369_v35 = vsel %vm756_vm3, %v6024_v18, %v1338_v50  ;;  %v3993_v41 = vunpack.i.l.bf16 %v3992_v19 }
 0x22f   : > { %8494 = vst [vmem:[#allocation115_spill] sm:$0xff] %v6369_v35  ;;  %v6373_v4 = vrot.slane %v3979_v17, 7  ;;  %v8495_v48 = vadd.high.f32.bf16 %v5470_v49, %v8441_v37  ;;  %v6385_v55 = vsel %vm647_vm2, %v5895_v47, %v1721_v10  ;;  %v6387_v18 = vadd.f32 %v4713_v52, %v1552_v53 }
 0x230   : > { %v3997_v28 = vpop.permute.xlu1 %3996  ;;  %v6300_v0 = vpop.permute.xlu0 %4006  ;;  %8497 = vst [vmem:[#allocation117_spill] sm:$0xff] %v6385_v55  ;;  %v4714_v17 = vadd.high.f32.bf16 %v1572_v39, %v8499_v33  ;;  %v6393_v58 = vsel %vm647_vm2, %v1721_v10, %v5897_v51  ;;  %v1898_v54 = vrot.slane %v3994_v44, 7  ;;  %v8502_v10 = vld [vmem:[#allocation74_spill] sm:$0xff] }
 0x231   : > { %v6380_v5 = vadd.f32 %v8495_v48, %v1558_v36  ;;  %8498 = vst [vmem:[#allocation118_spill] sm:$0xff] %v6387_v18  ;;  %8500 = vst [vmem:[#allocation119_spill] sm:$0xff] %v6393_v58  ;;  %v3999_v37 = vunpack.i.h.bf16 %v3997_v28  ;;  %v1892_v36 = vrot.slane %v3993_v41, 7  ;;  %v3998_v48 = vunpack.i.l.bf16 %v3997_v28 }
 0x232   : > { %4296 = vrot.lane.b32.xlu1 %v8476_v16, %s4960_s22  ;;  %4291 = vrot.lane.b32.xlu0 %v8469_v61, %s4960_s22  ;;  %v6404_v44 = vadd.f32 %v4714_v17, %v8502_v10  ;;  %v6409_v28 = vsel %vm647_vm2, %v1898_v54, %v6083_v63 }
 0x233   : > { %8496 = vst [vmem:[#allocation116_spill] sm:$0xff] %v6380_v5  ;;  %8504 = vst [vmem:[#allocation121_spill] sm:$0xff] %v6409_v28  ;;  %v6413_v41 = vsel %vm647_vm2, %v1892_v36, %v1898_v54  ;;  %v6420_v17 = vsel %vm647_vm2, %v6083_v63, %v1892_v36 }
 0x234   : > { %v4012_v32 = vpop.permute.xlu1 %4011  ;;  %v4022_v29 = vpop.permute.xlu0 %4021  ;;  %8503 = vst [vmem:[#allocation74_spill] sm:$0xff] %v6404_v44  ;;  %8505 = vst [vmem:[#allocation122_spill] sm:$0xff] %v6413_v41 }
 0x235   : > { %v4014_v47 = vunpack.i.h.bf16 %v4012_v32  ;;  %v4013_v55 = vunpack.i.l.bf16 %v4012_v32  ;;  %v4024_v52 = vunpack.i.h.bf16 %v4022_v29  ;;  %v4023_v53 = vunpack.i.l.bf16 %v4022_v29  ;;  %8506 = vst [vmem:[#allocation123_spill] sm:$0xff] %v6420_v17 }
 0x236   : > { %4306 = vrot.lane.b32.xlu1 %v8481_v40, %s4960_s22  ;;  %4301 = vrot.lane.b32.xlu0 %v8475_v11, %s4960_s22  ;;  %v1902_v32 = vrot.slane %v3999_v37, 7  ;;  %v1896_v29 = vrot.slane %v3998_v48, 7 }
 0x237   : > { %v938_v10 = vrot.slane %v4014_v47, 7  ;;  %v932_v51 = vrot.slane %v4013_v55, 7  ;;  %v1046_v54 = vrot.slane %v4024_v52, 6  ;;  %v1040_v37 = vrot.slane %v4023_v53, 6 }
 0x238   : > { %v4017_v50 = vpop.permute.xlu1 %4016  ;;  %v4027_v19 = vpop.permute.xlu0 %4026  ;;  %v6429_v18 = vsel %vm647_vm2, %v1902_v32, %v6101_v31  ;;  %v6433_v55 = vsel %vm647_vm2, %v1896_v29, %v1902_v32  ;;  %v6438_v36 = vsel %vm647_vm2, %v6101_v31, %v1896_v29 }
 0x239   : > { %v4019_v58 = vunpack.i.h.bf16 %v4017_v50  ;;  %v4018_v49 = vunpack.i.l.bf16 %v4017_v50  ;;  %v4029_v44 = vunpack.i.h.bf16 %v4027_v19  ;;  %v4028_v48 = vunpack.i.l.bf16 %v4027_v19  ;;  %8508 = vst [vmem:[#allocation125_spill] sm:$0xff] %v6429_v18  ;;  %8509 = vst [vmem:[#allocation126_spill] sm:$0xff] %v6433_v55 }
 0x23a   : > { %4316 = vrot.lane.b32.xlu1 %v5264_v23, %s4960_s22  ;;  %4311 = vrot.lane.b32.xlu0 %v5259_v22, %s4960_s22  ;;  %8510 = vst [vmem:[#allocation127_spill] sm:$0xff] %v6438_v36  ;;  %v6445_v52 = vsel %vm647_vm2, %v938_v10, %v6199_v7  ;;  %v6449_v53 = vsel %vm647_vm2, %v932_v51, %v938_v10 }
 0x23b   : > { %v942_v19 = vrot.slane %v4019_v58, 7  ;;  %v936_v47 = vrot.slane %v4018_v49, 7  ;;  %v6456_v49 = vsel %vm647_vm2, %v6199_v7, %v932_v51  ;;  %v6461_v31 = vsel %vm756_vm3, %v1046_v54, %v6201_v59 }
 0x23c   : > { %v4042_v39 = vpop.permute.xlu1 %4041  ;;  %v6399_v8 = vpop.permute.xlu0 %4031  ;;  %v6465_v58 = vsel %vm756_vm3, %v1040_v37, %v1046_v54  ;;  %v1044_v29 = vrot.slane %v4028_v48, 6  ;;  %v6472_v7 = vsel %vm756_vm3, %v6201_v59, %v1040_v37 }
 0x23d   : > { %8501 = vst [vmem:[#allocation120_spill] sm:$0xff] %v6399_v8  ;;  %v4044_v28 = vunpack.i.h.bf16 %v4042_v39  ;;  %v4043_v63 = vunpack.i.l.bf16 %v4042_v39  ;;  %v1050_v39 = vrot.slane %v4029_v44, 6  ;;  %v6477_v51 = vsel %vm647_vm2, %v942_v19, %v6232_v14 }
 0x23e   : > { %4326 = vrot.lane.b32.xlu1 %v5250_v21, %s4961_s23  ;;  %4321 = vrot.lane.b32.xlu0 %v8466_v3, %s4961_s23  ;;  %v6481_v54 = vsel %vm647_vm2, %v936_v47, %v942_v19 }
 0x23f   : > { %v1718_v36 = vrot.slane %v4044_v28, 7  ;;  %v1712_v18 = vrot.slane %v4043_v63, 7  ;;  %v6486_v28 = vsel %vm647_vm2, %v6232_v14, %v936_v47  ;;  %v6493_v59 = vsel %vm756_vm3, %v1050_v39, %v6234_v12 }
 0x240   : > { %v4047_v33 = vpop.permute.xlu1 %4046  ;;  %v6424_v50 = vpop.permute.xlu0 %4036  ;;  %8512 = vst [vmem:[#allocation129_spill] sm:$0xff] %v6493_v59  ;;  %v6499_v37 = vsel %vm756_vm3, %v1044_v29, %v1050_v39  ;;  %v6504_v14 = vsel %vm756_vm3, %v6234_v12, %v1044_v29  ;;  %v8562_v59 = vld [vmem:[#allocation96_spill] sm:$0xff] }
 0x241   : > { %8507 = vst [vmem:[#allocation124_spill] sm:$0xff] %v6424_v50  ;;  %v4049_v32 = vunpack.i.h.bf16 %v4047_v33  ;;  %v4048_v55 = vunpack.i.l.bf16 %v4047_v33  ;;  %8513 = vst [vmem:[#allocation130_spill] sm:$0xff] %v6504_v14  ;;  %v6509_v47 = vsel %vm647_vm2, %v1718_v36, %v6332_v30  ;;  %v6520_v12 = vsel %vm647_vm2, %v6332_v30, %v1712_v18 }
 0x242   : > { %4336 = vrot.lane.b32.xlu1 %v8469_v61, %s4961_s23  ;;  %4331 = vrot.lane.b32.xlu0 %v5246_v20, %s4961_s23  ;;  %8514 = vst [vmem:[#allocation131_spill] sm:$0xff] %v6509_v47  ;;  %8516 = vst [vmem:[#allocation133_spill] sm:$0xff] %v6520_v12  ;;  %v8534_v20 = vld [vmem:[#allocation68_spill] sm:$0xff] }
 0x243   : > { %v1722_v33 = vrot.slane %v4049_v32, 7  ;;  %v6513_v32 = vsel %vm647_vm2, %v1712_v18, %v1718_v36  ;;  %v1716_v41 = vrot.slane %v4048_v55, 7  ;;  %v8518_v55 = vld [vmem:[#allocation51_spill] sm:$0xff] }
 0x244   : > { %v4057_v44 = vpop.permute.xlu1 %4056  ;;  %v6467_v10 = vpop.permute.xlu0 %4051  ;;  %8515 = vst [vmem:[#allocation132_spill] sm:$0xff] %v6513_v32 }
 0x245   : > { %8511 = vst [vmem:[#allocation128_spill] sm:$0xff] %v6467_v10  ;;  %v4059_v17 = vunpack.i.h.bf16 %v4057_v44  ;;  %v4058_v39 = vunpack.i.l.bf16 %v4057_v44  ;;  %v4716_v36 = vadd.high.f32.bf16 %v6211_v13, %v6467_v10  ;;  %v6538_v12 = vsel %vm647_vm2, %v1716_v41, %v1722_v33 }
 0x246   : > { %4346 = vrot.lane.b32.xlu1 %v8475_v11, %s4961_s23  ;;  %4341 = vrot.lane.b32.xlu0 %v8476_v16, %s4961_s23  ;;  %8520 = vst [vmem:[#allocation135_spill] sm:$0xff] %v6538_v12  ;;  %v8531_v11 = vld [vmem:[#allocation69_spill] sm:$0xff] }
 0x247   : > { %v928_v48 = vrot.slane %v4059_v17, 7  ;;  %v6525_v17 = vsel %vm647_vm2, %v1722_v33, %v6373_v4  ;;  %v8524_v33 = vld [vmem:[#allocation15_spill] sm:$0xff] }
 0x248   : > { %v4072_v63 = vpop.permute.xlu1 %4071  ;;  %v4062_v19 = vpop.permute.xlu0 %4061  ;;  %8517 = vst [vmem:[#allocation134_spill] sm:$0xff] %v6525_v17  ;;  %v8521_v17 = vld [vmem:[#allocation52_spill] sm:$0xff] }
 0x249   : > { %v4074_v50 = vunpack.i.h.bf16 %v4072_v63  ;;  %v4064_v16 = vunpack.i.h.bf16 %v4062_v19  ;;  %v958_v29 = vsel %vm647_vm2, %v8518_v55, %v928_v48  ;;  %v4073_v44 = vunpack.i.l.bf16 %v4072_v63 }
 0x24a   : > { %4356 = vrot.lane.b32.xlu1 %v5259_v22, %s4961_s23  ;;  %4351 = vrot.lane.b32.xlu0 %v8481_v40, %s4961_s23  ;;  %v4063_v47 = vunpack.i.l.bf16 %v4062_v19  ;;  %v952_v13 = vsel %vm647_vm2, %v928_v48, %v8521_v17  ;;  %v6546_v55 = vsel %vm647_vm2, %v6373_v4, %v1716_v41  ;;  %v970_v12 = vadd.f32 %v4716_v36, %v958_v29  ;;  %v8529_v29 = vld [vmem:[#allocation61_spill] sm:$0xff] }
 0x24b   : > { %v1036_v22 = vrot.slane %v4064_v16, 6  ;;  %8522 = vst [vmem:[#allocation52_spill] sm:$0xff] %v6546_v55  ;;  %v6548_v16 = vrot.slane %v4058_v39, 7  ;;  %v1708_v19 = vrot.slane %v4074_v50, 7  ;;  %v6556_v17 = vrot.slane %v4073_v44, 7 }
 0x24c   : > { %v6534_v30 = vpop.permute.xlu0 %4066  ;;  %v4082_v18 = vpop.permute.xlu1 %4081  ;;  %v6558_v4 = vrot.slane %v4063_v47, 6  ;;  %v8528_v63 = vadd.low.f32.bf16 %v6174_v60, %v8474_v46  ;;  %v8539_v60 = vld [vmem:[#allocation81_spill] sm:$0xff] }
 0x24d   : > { %8519 = vst [vmem:[#allocation51_spill] sm:$0xff] %v6534_v30  ;;  %v4084_v32 = vunpack.i.h.bf16 %v4082_v18  ;;  %v4083_v40 = vunpack.i.l.bf16 %v4082_v18  ;;  %8523 = vst [vmem:[#allocation136_spill] sm:$0xff] %v6548_v16  ;;  %v8527_v18 = vld [vmem:[#allocation60_spill] sm:$0xff]  ;;  %v1060_v47 = vsel %vm756_vm3, %v1036_v22, %v8529_v29 }
 0x24e   : > { %4366 = vrot.lane.b32.xlu1 %v8524_v33, %s4962_s26  ;;  %4361 = vrot.lane.b32.xlu0 %v5264_v23, %s4961_s23  ;;  %8525 = vst [vmem:[#allocation15_spill] sm:$0xff] %v6556_v17  ;;  %8526 = vst [vmem:[#allocation137_spill] sm:$0xff] %v6558_v4  ;;  %v1066_v50 = vsel %vm756_vm3, %v8527_v18, %v1036_v22  ;;  %v971_v55 = vadd.f32 %v8528_v63, %v952_v13  ;;  %v8530_v23 = vld [vmem:[#allocation12_spill] sm:$0xff]  ;;  %v8533_v63 = vld [vmem:[#allocation10_spill] sm:$0xff] }
 0x24f   : > { %v640_v8 = vrot.slane %v4084_v32, 7  ;;  %v634_v48 = vrot.slane %v4083_v40, 7  ;;  %v6576_v18 = vsel %vm647_vm2, %v1708_v19, %v8531_v11  ;;  %v6585_v22 = vsel %vm647_vm2, %v8534_v20, %v1708_v19 }
 0x250   : > { %v4087_v41 = vpop.permute.xlu1 %4086  ;;  %v4077_v39 = vpop.permute.xlu0 %4076  ;;  %8532 = vst [vmem:[#allocation60_spill] sm:$0xff] %v6576_v18  ;;  %8535 = vst [vmem:[#allocation61_spill] sm:$0xff] %v6585_v22  ;;  %v6588_v11 = vadd.f32 %v1066_v50, %v970_v12  ;;  %v6590_v18 = vadd.f32 %v1060_v47, %v971_v55  ;;  %v8542_v55 = vld [vmem:[#allocation45_spill] sm:$0xff]  ;;  %v8543_v47 = vld [vmem:[#allocation78_spill] sm:$0xff] }
 0x251   : > { %v649_v40 = vsel %vm647_vm2, %v634_v48, %v640_v8  ;;  %v4088_v32 = vunpack.i.l.bf16 %v4087_v41  ;;  %v4079_v36 = vunpack.i.h.bf16 %v4077_v39  ;;  %v4089_v44 = vunpack.i.h.bf16 %v4087_v41  ;;  %v8536_v41 = vld [vmem:[#allocation44_spill] sm:$0xff] }
 0x252   : > { %v4078_v17 = vunpack.i.l.bf16 %v4077_v39  ;;  %4376 = vrot.lane.b32.xlu1 %v8530_v23, %s4962_s26  ;;  %4371 = vrot.lane.b32.xlu0 %v8533_v63, %s4962_s26  ;;  %v671_v39 = vadd.f32 %v649_v40, %v8536_v41  ;;  %8537 = vst [vmem:[#allocation12_spill] sm:$0xff] %v6588_v11  ;;  %8538 = vst [vmem:[#allocation69_spill] sm:$0xff] %v6590_v18  ;;  %v8541_v40 = vld [vmem:[#allocation41_spill] sm:$0xff]  ;;  %v8544_v41 = vld [vmem:[#allocation14_spill] sm:$0xff] }
 0x253   : > { %v643_v46 = vrot.slane %v4088_v32, 7  ;;  %v628_v13 = vrot.slane %v4079_v36, 7  ;;  %v8540_v36 = vld [vmem:[#allocation84_spill] sm:$0xff] }
 0x254   : > { %v639_v29 = vrot.slane %v4078_v17, 7  ;;  %v4102_v61 = vpop.permute.xlu1 %4101  ;;  %v4092_v3 = vpop.permute.xlu0 %4091  ;;  %v632_v17 = vrot.slane %v4089_v44, 7  ;;  %v8547_v44 = vld [vmem:[#allocation46_spill] sm:$0xff] }
 0x255   : > { %v652_v32 = vsel %vm647_vm2, %v8539_v60, %v643_v46  ;;  %v664_v5 = vsel %vm647_vm2, %v643_v46, %v8540_v36  ;;  %v655_v20 = vsel %vm647_vm2, %v628_v13, %v634_v48  ;;  %v661_v19 = vsel %vm647_vm2, %v640_v8, %v628_v13  ;;  %v8545_v46 = vld [vmem:[#allocation47_spill] sm:$0xff] }
 0x256   : > { %v6603_v12 = vadd.f32 %v664_v5, %v8541_v40  ;;  %v6606_v50 = vadd.f32 %v652_v32, %v8542_v55  ;;  %v648_v60 = vsel %vm647_vm2, %v8543_v47, %v639_v29  ;;  %4386 = vrot.lane.b32.xlu1 %v8544_v41, %s4962_s26  ;;  %v670_v36 = vadd.f32 %v655_v20, %v8545_v46  ;;  %v8546_v48 = vld [vmem:[#allocation79_spill] sm:$0xff]  ;;  %v8549_v32 = vld [vmem:[#allocation48_spill] sm:$0xff] }
 0x257   : > { %v660_v8 = vsel %vm647_vm2, %v639_v29, %v8546_v48  ;;  %v668_v13 = vadd.f32 %v648_v60, %v8547_v44  ;;  %v4104_v5 = vunpack.i.h.bf16 %v4102_v61  ;;  %v8548_v40 = vld [vmem:[#allocation23_spill] sm:$0xff]  ;;  %v669_v55 = vadd.f32 %v661_v19, %v8549_v32  ;;  %v8550_v60 = vld [vmem:[#allocation18_spill] sm:$0xff]  ;;  %v8553_v32 = vld [vmem:[#allocation49_spill] sm:$0xff] }
 0x258   : > { %4381 = vrot.lane.b32.xlu0 %v8548_v40, %s4962_s26  ;;  %v4103_v22 = vunpack.i.l.bf16 %v4102_v61  ;;  %v4094_v21 = vunpack.i.h.bf16 %v4092_v3  ;;  %v4093_v47 = vunpack.i.l.bf16 %v4092_v3  ;;  %v4112_v30 = vpop.permute.xlu1 %4111  ;;  %v4097_v18 = vpop.permute.xlu0 %4096  ;;  %v8551_v44 = vld [vmem:[#allocation42_spill] sm:$0xff]  ;;  %v8552_v19 = vld [vmem:[#allocation7_spill] sm:$0xff] }
 0x259   : > { %v751_v35 = vrot.slane %v4104_v5, 6  ;;  %v4114_v10 = vunpack.i.h.bf16 %v4112_v30  ;;  %v4113_v20 = vunpack.i.l.bf16 %v4112_v30  ;;  %v4099_v46 = vunpack.i.h.bf16 %v4097_v18 }
 0x25a   : > { %v745_v26 = vrot.slane %v4103_v22, 6  ;;  %v644_v57 = vrot.slane %v4094_v21, 7  ;;  %v638_v29 = vrot.slane %v4093_v47, 7  ;;  %v4098_v48 = vunpack.i.l.bf16 %v4097_v18  ;;  %4396 = vrot.lane.b32.xlu1 %v8550_v60, %s4962_s26 }
 0x25b   : > { %v666_v11 = vadd.f32 %v660_v8, %v8551_v44  ;;  %v6624_v16 = vrot.slane %v4114_v10, 6  ;;  %v6626_v61 = vrot.slane %v4113_v20, 6  ;;  %v739_v3 = vrot.slane %v4099_v46, 6  ;;  %v8554_v20 = vld [vmem:[#allocation50_spill] sm:$0xff]  ;;  %v8555_v44 = vld [vmem:[#allocation55_spill] sm:$0xff] }
 0x25c   : > { %4391 = vrot.lane.b32.xlu0 %v8552_v19, %s4962_s26  ;;  %v758_v30 = vsel %vm756_vm3, %v745_v26, %v751_v35  ;;  %v665_v21 = vsel %vm647_vm2, %v644_v57, %v632_v17  ;;  %v653_v18 = vsel %vm647_vm2, %v638_v29, %v644_v57  ;;  %v659_v22 = vsel %vm647_vm2, %v632_v17, %v638_v29  ;;  %v6638_v10 = vpop.permute.xlu1 %4116  ;;  %v4107_v8 = vpop.permute.xlu0 %4106 }
 0x25d   : > { %v780_v5 = vadd.f32 %v758_v30, %v671_v39  ;;  %v6641_v47 = vadd.f32 %v665_v21, %v8553_v32  ;;  %v6644_v46 = vadd.f32 %v659_v22, %v8554_v20  ;;  %v683_v14 = vadd.f32 %v653_v18, %v8555_v44  ;;  %v8556_v30 = vld [vmem:[#allocation13_spill] sm:$0xff]  ;;  %v8557_v20 = vld [vmem:[#allocation11_spill] sm:$0xff] }
 0x25e   : > { %v762_v57 = vsel %vm756_vm3, %v6626_v61, %v6624_v16  ;;  %v764_v17 = vsel %vm756_vm3, %v739_v3, %v745_v26  ;;  %v770_v29 = vsel %vm756_vm3, %v751_v35, %v739_v3  ;;  %v750_v39 = vrot.slane %v4098_v48, 6  ;;  %4406 = vrot.lane.b32.xlu1 %v8556_v30, %s4962_s26  ;;  %v8558_v44 = vld [vmem:[#allocation75_spill] sm:$0xff]  ;;  %v8559_v26 = vld [vmem:[#allocation76_spill] sm:$0xff] }
 0x25f   : > { %v4719_v21 = vadd.high.f32.bf16 %v780_v5, %v6282_v38  ;;  %v792_v22 = vadd.f32 %v762_v57, %v683_v14  ;;  %v778_v32 = vadd.f32 %v770_v29, %v669_v55  ;;  %v779_v18 = vadd.f32 %v764_v17, %v670_v36  ;;  %v8560_v57 = vld [vmem:[#allocation93_spill] sm:$0xff] }
 0x260   : > { %4401 = vrot.lane.b32.xlu0 %v8557_v20, %s4962_s26  ;;  %v757_v4 = vsel %vm756_vm3, %v8558_v44, %v750_v39  ;;  %v769_v35 = vsel %vm756_vm3, %v750_v39, %v8559_v26  ;;  %v6666_v48 = vpop.permute.xlu1 %4126  ;;  %v6668_v3 = vpop.permute.xlu0 %4121  ;;  %v8561_v44 = vld [vmem:[#allocation57_spill] sm:$0xff]  ;;  %v4724_v39 = vadd.low.f32.bf16 %v8562_v59, %v6638_v10  ;;  %v8591_v59 = vld [vmem:[#allocation12_spill] sm:$0xff] }
 0x261   : > { %v966_v5 = vadd.f32 %v4719_v21, %v6449_v53  ;;  %v4720_v14 = vadd.high.f32.bf16 %v792_v22, %v6300_v0  ;;  %v775_v36 = vadd.f32 %v769_v35, %v666_v11  ;;  %v777_v55 = vadd.f32 %v757_v4, %v668_v13  ;;  %v8563_v11 = vld [vmem:[#allocation31_spill] sm:$0xff] }
 0x262   : > { %v4721_v17 = vadd.high.f32.bf16 %v778_v32, %v8560_v57  ;;  %v4722_v29 = vadd.low.f32.bf16 %v779_v18, %v6282_v38  ;;  %v4723_v30 = vadd.high.f32.bf16 %v8561_v44, %v6638_v10  ;;  %4416 = vrot.lane.b32.xlu1 %v8533_v63, %s4963_s28  ;;  %v4109_v32 = vunpack.i.h.bf16 %v4107_v8 }
 0x263   : > { %v1074_v53 = vadd.f32 %v6465_v58, %v966_v5  ;;  %v978_v21 = vadd.f32 %v4720_v14, %v6481_v54  ;;  %v4725_v4 = vadd.low.f32.bf16 %v775_v36, %v8563_v11  ;;  %v4726_v13 = vadd.low.f32.bf16 %v777_v55, %v8560_v57  ;;  %v8564_v58 = vld [vmem:[#allocation70_spill] sm:$0xff] }
 0x264   : > { %4411 = vrot.lane.b32.xlu0 %v8524_v33, %s4963_s28  ;;  %v964_v38 = vadd.f32 %v4721_v17, %v6445_v52  ;;  %v965_v22 = vadd.f32 %v4722_v29, %v6456_v49  ;;  %v4108_v18 = vunpack.i.l.bf16 %v4107_v8  ;;  %v6688_v26 = vpop.permute.xlu1 %4131  ;;  %v6690_v35 = vpop.permute.xlu0 %4136  ;;  %v743_v57 = vrot.slane %v4109_v32, 6  ;;  %v8565_v17 = vld [vmem:[#allocation72_spill] sm:$0xff]  ;;  %v8568_v32 = vld [vmem:[#allocation82_spill] sm:$0xff] }
 0x265   : > { %v4727_v5 = vadd.high.f32.bf16 %v1074_v53, %v8564_v58  ;;  %v1086_v54 = vadd.f32 %v6499_v37, %v978_v21  ;;  %v961_v14 = vadd.f32 %v4725_v4, %v6218_v42  ;;  %v963_v36 = vadd.f32 %v4726_v13, %v6207_v2  ;;  %v8566_v2 = vld [vmem:[#allocation33_spill] sm:$0xff] }
 0x266   : > { %v1072_v55 = vadd.f32 %v6461_v31, %v964_v38  ;;  %v1073_v52 = vadd.f32 %v6472_v7, %v965_v22  ;;  %v754_v49 = vrot.slane %v4108_v18, 6  ;;  %4426 = vrot.lane.b32.xlu1 %v8548_v40, %s4963_s28  ;;  %v768_v7 = vsel %vm756_vm3, %v743_v57, %v6626_v61  ;;  %v8567_v4 = vld [vmem:[#allocation25_spill] sm:$0xff]  ;;  %v8569_v18 = vld [vmem:[#allocation83_spill] sm:$0xff] }
 0x267   : > { %v1260_v8 = vadd.f32 %v4727_v5, %v6280_v34  ;;  %v4728_v29 = vadd.high.f32.bf16 %v1086_v54, %v8565_v17  ;;  %v1069_v53 = vadd.f32 %v6228_v24, %v961_v14  ;;  %v1071_v37 = vadd.f32 %v6223_v9, %v963_v36 }
 0x268   : > { %4421 = vrot.lane.b32.xlu0 %v8530_v23, %s4963_s28  ;;  %v4729_v42 = vadd.high.f32.bf16 %v1072_v55, %v8566_v2  ;;  %v4730_v31 = vadd.low.f32.bf16 %v1073_v52, %v8564_v58  ;;  %v774_v34 = vsel %vm756_vm3, %v6624_v16, %v743_v57  ;;  %v6714_v21 = vpop.permute.xlu1 %4146  ;;  %v6716_v24 = vpop.permute.xlu0 %4141  ;;  %v761_v16 = vsel %vm756_vm3, %v8568_v32, %v754_v49 }
 0x269   : > { %v1368_v9 = vadd.f32 %v6323_v27, %v1260_v8  ;;  %v1272_v11 = vadd.f32 %v4728_v29, %v6309_v56  ;;  %v4731_v13 = vadd.low.f32.bf16 %v1069_v53, %v8567_v4  ;;  %v4732_v38 = vadd.low.f32.bf16 %v1071_v37, %v8566_v2  ;;  %v8570_v27 = vld [vmem:[#allocation97_spill] sm:$0xff]  ;;  %v8573_v8 = vld [vmem:[#allocation66_spill] sm:$0xff]  ;;  %v8574_v53 = vld [vmem:[#allocation32_spill] sm:$0xff] }
 0x26a   : > { %v1258_v22 = vadd.f32 %v4729_v42, %v6276_v43  ;;  %v1259_v61 = vadd.f32 %v4730_v31, %v6287_v15  ;;  %v773_v58 = vsel %vm756_vm3, %v754_v49, %v8569_v18  ;;  %4436 = vrot.lane.b32.xlu1 %v8552_v19, %s4963_s28  ;;  %v8571_v15 = vld [vmem:[#allocation36_spill] sm:$0xff]  ;;  %v789_v55 = vadd.f32 %v761_v16, %v6606_v50  ;;  %v8575_v50 = vld [vmem:[#allocation94_spill] sm:$0xff] }
 0x26b   : > { %1386 = vst.msk [vmem:[%s5879_s11 + $0x28] sm:$0xff] %vm326_vm1, %v1368_v9  ;;  %v1380_v56 = vadd.f32 %v6364_v1, %v1272_v11  ;;  %v1255_v43 = vadd.f32 %v4731_v13, %v8570_v27  ;;  %v1257_v5 = vadd.f32 %v4732_v38, %v8571_v15  ;;  %v787_v54 = vadd.f32 %v773_v58, %v6603_v12  ;;  %v8572_v12 = vld [vmem:[#allocation67_spill] sm:$0xff]  ;;  %v8579_v58 = vld [vmem:[#allocation129_spill] sm:$0xff] }
 0x26c   : > { %4431 = vrot.lane.b32.xlu0 %v8544_v41, %s4963_s28  ;;  %v1366_v14 = vadd.f32 %v6319_v25, %v1258_v22  ;;  %v1367_v36 = vadd.f32 %v6330_v45, %v1259_v61  ;;  %v790_v1 = vadd.f32 %v774_v34, %v6641_v47  ;;  %v6744_v52 = vpop.permute.xlu1 %4151  ;;  %v6746_v57 = vpop.permute.xlu0 %4156  ;;  %v791_v25 = vadd.f32 %v768_v7, %v6644_v46  ;;  %v8576_v9 = vld [vmem:[#allocation107_spill] sm:$0xff] }
 0x26d   : > { %1398 = vst.msk [vmem:[%s5879_s11 + $0x88] sm:$0xff] %vm326_vm1, %v1380_v56  ;;  %v1363_v49 = vadd.f32 %v8572_v12, %v1255_v43  ;;  %v1365_v29 = vadd.f32 %v8573_v8, %v1257_v5  ;;  %v4733_v45 = vadd.low.f32.bf16 %v787_v54, %v8574_v53  ;;  %v4734_v47 = vadd.low.f32.bf16 %v789_v55, %v8575_v50  ;;  %v8582_v5 = vld [vmem:[#allocation26_spill] sm:$0xff] }
 0x26e   : > { %1384 = vst.msk [vmem:[%s5879_s11 + $0x18] sm:$0xff] %vm326_vm1, %v1366_v14  ;;  %1385 = vst.msk [vmem:[%s5879_s11 + $0x20] sm:$0xff] %vm326_vm1, %v1367_v36  ;;  %v4735_v37 = vadd.high.f32.bf16 %v790_v1, %v8575_v50  ;;  %v4129_v2 = vunpack.i.h.bf16 %v6666_v48  ;;  %v4128_v42 = vunpack.i.l.bf16 %v6666_v48  ;;  %4446 = vrot.lane.b32.xlu1 %v8557_v20, %s4963_s28  ;;  %v4736_v46 = vadd.low.f32.bf16 %v791_v25, %v6300_v0  ;;  %v8583_v14 = vld [vmem:[#allocation136_spill] sm:$0xff]  ;;  %v8584_v1 = vld [vmem:[#allocation13_spill] sm:$0xff] }
 0x26f   : > { %1381 = vst.msk [vmem:[%s5879_s11] sm:$0xff] %vm326_vm1, %v1363_v49  ;;  %1383 = vst.msk [vmem:[%s5879_s11 + $0x10] sm:$0xff] %vm326_vm1, %v1365_v29  ;;  %v973_v31 = vadd.f32 %v4733_v45, %v6257_v6  ;;  %v4124_v7 = vunpack.i.h.bf16 %v6668_v3  ;;  %v4123_v34 = vunpack.i.l.bf16 %v6668_v3  ;;  %v975_v48 = vadd.f32 %v4734_v47, %v8576_v9  ;;  %v8577_v6 = vld [vmem:[#allocation109_spill] sm:$0xff]  ;;  %v8578_v3 = vld [vmem:[#allocation108_spill] sm:$0xff] }
 0x270   : > { %4441 = vrot.lane.b32.xlu0 %v8550_v60, %s4963_s28  ;;  %v976_v11 = vadd.f32 %v4735_v37, %v6477_v51  ;;  %v1041_v4 = vrot.slane %v4129_v2, 6  ;;  %v1035_v13 = vrot.slane %v4128_v42, 6  ;;  %v6776_v38 = vpop.permute.xlu1 %4161  ;;  %v6778_v22 = vpop.permute.xlu0 %4166  ;;  %v977_v0 = vadd.f32 %v4736_v46, %v6486_v28  ;;  %v8580_v51 = vld [vmem:[#allocation137_spill] sm:$0xff]  ;;  %v8581_v28 = vld [vmem:[#allocation130_spill] sm:$0xff]  ;;  %v8586_v50 = vld [vmem:[#allocation63_spill] sm:$0xff] }
 0x271   : > { %v1081_v61 = vadd.f32 %v8577_v6, %v973_v31  ;;  %v933_v32 = vrot.slane %v4124_v7, 7  ;;  %v927_v16 = vrot.slane %v4123_v34, 7  ;;  %v1083_v18 = vadd.f32 %v8578_v3, %v975_v48  ;;  %v8585_v12 = vld [vmem:[#allocation34_spill] sm:$0xff]  ;;  %v8594_v6 = vld [vmem:[#allocation85_spill] sm:$0xff] }
 0x272   : > { %v1084_v56 = vadd.f32 %v8579_v58, %v976_v11  ;;  %v1059_v27 = vsel %vm756_vm3, %v1035_v13, %v1041_v4  ;;  %v1065_v43 = vsel %vm756_vm3, %v8580_v51, %v1035_v13  ;;  %4456 = vrot.lane.b32.xlu1 %v8524_v33, %s4964_s29  ;;  %v1085_v15 = vadd.f32 %v8581_v28, %v977_v0  ;;  %v8587_v42 = vld [vmem:[#allocation62_spill] sm:$0xff] }
 0x273   : > { %v4737_v54 = vadd.low.f32.bf16 %v1081_v61, %v8582_v5  ;;  %v945_v36 = vsel %vm647_vm2, %v933_v32, %v8583_v14  ;;  %v951_v55 = vsel %vm647_vm2, %v927_v16, %v933_v32  ;;  %v4738_v49 = vadd.low.f32.bf16 %v1083_v18, %v8585_v12  ;;  %v8588_v31 = vld [vmem:[#allocation110_spill] sm:$0xff]  ;;  %v8595_v32 = vld [vmem:[#allocation95_spill] sm:$0xff] }
 0x274   : > { %4451 = vrot.lane.b32.xlu0 %v8584_v1, %s4963_s28  ;;  %v4739_v8 = vadd.high.f32.bf16 %v1084_v56, %v8585_v12  ;;  %v957_v29 = vsel %vm647_vm2, %v8583_v14, %v927_v16  ;;  %v968_v25 = vadd.f32 %v4723_v30, %v951_v55  ;;  %v6808_v53 = vpop.permute.xlu1 %4171  ;;  %v4740_v45 = vadd.low.f32.bf16 %v1085_v15, %v8565_v17  ;;  %v6815_v2 = vpop.permute.xlu0 %4176  ;;  %v8589_v30 = vld [vmem:[#allocation111_spill] sm:$0xff]  ;;  %v8593_v13 = vld [vmem:[#allocation114_spill] sm:$0xff]  ;;  %v8596_v16 = vld [vmem:[#allocation128_spill] sm:$0xff] }
 0x275   : > { %v1267_v47 = vadd.f32 %v4737_v54, %v8586_v50  ;;  %v967_v37 = vadd.f32 %v4724_v39, %v957_v29  ;;  %v1269_v46 = vadd.f32 %v4738_v49, %v8587_v42  ;;  %v8590_v17 = vld [vmem:[#allocation71_spill] sm:$0xff]  ;;  %v4741_v10 = vadd.high.f32.bf16 %v8591_v59, %v6688_v26  ;;  %v8592_v39 = vld [vmem:[#allocation38_spill] sm:$0xff]  ;;  %v8599_v15 = vld [vmem:[#allocation104_spill] sm:$0xff] }
 0x276   : > { %v1270_v7 = vadd.f32 %v4739_v8, %v8588_v31  ;;  %v1076_v34 = vadd.f32 %v1059_v27, %v968_v25  ;;  %4466 = vrot.lane.b32.xlu1 %v8530_v23, %s4964_s29  ;;  %v1271_v44 = vadd.f32 %v4740_v45, %v8589_v30  ;;  %v8597_v3 = vadd.low.f32.bf16 %v8595_v32, %v8596_v16  ;;  %v8598_v56 = vld [vmem:[#allocation115_spill] sm:$0xff]  ;;  %v8601_v55 = vld [vmem:[#allocation69_spill] sm:$0xff]  ;;  %v3115_v62 = vld [vmem:[%s5879_s11] sm:$0xff] (%p8698_p8) }
 0x277   : > { %v1375_v9 = vadd.f32 %v8590_v17, %v1267_v47  ;;  %v1075_v48 = vadd.f32 %v1065_v43, %v967_v37  ;;  %v1377_v11 = vadd.f32 %v8592_v39, %v1269_v46  ;;  %v1053_v43 = vsel %vm756_vm3, %v1041_v4, %v8580_v51  ;;  %v8600_v4 = vld [vmem:[#allocation73_spill] sm:$0xff]  ;;  %3116 = vst [vmem:[%s8051_s9] sm:$0xff] (%p8698_p8), %v3115_v62 }
 0x278   : > { %4461 = vrot.lane.b32.xlu0 %v8533_v63, %s4964_s29  ;;  %v1378_v0 = vadd.f32 %v8593_v13, %v1270_v7  ;;  %v4742_v61 = vadd.high.f32.bf16 %v1076_v34, %v8594_v6  ;;  %v969_v18 = vadd.f32 %v8597_v3, %v945_v36  ;;  %v6833_v58 = vpop.permute.xlu1 %4186  ;;  %v1379_v27 = vadd.f32 %v8598_v56, %v1271_v44  ;;  %v6841_v28 = vpop.permute.xlu0 %4181  ;;  %v8604_v59 = vld [vmem:[#allocation29_spill] sm:$0xff]  ;;  %v8606_v56 = vld [vmem:[#allocation102_spill] sm:$0xff] }
 0x279   : > { %1393 = vst.msk [vmem:[%s5879_s11 + $0x60] sm:$0xff] %vm326_vm1, %v1375_v9  ;;  %1395 = vst.msk [vmem:[%s5879_s11 + $0x70] sm:$0xff] %vm326_vm1, %v1377_v11  ;;  %v4149_v14 = vunpack.i.h.bf16 %v6714_v21  ;;  %v4148_v36 = vunpack.i.l.bf16 %v6714_v21  ;;  %v4743_v51 = vadd.high.f32.bf16 %v8600_v4, %v6690_v35  ;;  %v4744_v12 = vadd.low.f32.bf16 %v8601_v55, %v6690_v35  ;;  %v8602_v21 = vld [vmem:[#allocation39_spill] sm:$0xff]  ;;  %v8603_v9 = vld [vmem:[#allocation64_spill] sm:$0xff] }
 0x27a   : > { %1396 = vst.msk [vmem:[%s5879_s11 + $0x78] sm:$0xff] %vm326_vm1, %v1378_v0  ;;  %v1262_v5 = vadd.f32 %v4742_v61, %v8599_v15  ;;  %v1077_v54 = vadd.f32 %v1053_v43, %v969_v18  ;;  %4476 = vrot.lane.b32.xlu1 %v8544_v41, %s4964_s29  ;;  %1397 = vst.msk [vmem:[%s5879_s11 + $0x80] sm:$0xff] %vm326_vm1, %v1379_v27  ;;  %v4144_v49 = vunpack.i.h.bf16 %v6716_v24  ;;  %v4143_v8 = vunpack.i.l.bf16 %v6716_v24  ;;  %v8607_v4 = vld [vmem:[#allocation51_spill] sm:$0xff]  ;;  %v8642_v55 = vld [vmem:[#allocation92_spill] sm:$0xff] }
 0x27b   : > { %v1234_v45 = vrot.slane %v4149_v14, 7  ;;  %v1228_v50 = vrot.slane %v4148_v36, 7  ;;  %v4746_v42 = vadd.low.f32.bf16 %v1075_v48, %v8594_v6  ;;  %v4154_v35 = vunpack.i.h.bf16 %v6744_v52 }
 0x27c   : > { %4471 = vrot.lane.b32.xlu0 %v8548_v40, %s4964_s29  ;;  %v1370_v29 = vadd.f32 %v8602_v21, %v1262_v5  ;;  %v4745_v25 = vadd.low.f32.bf16 %v1077_v54, %v6688_v26  ;;  %v6864_v47 = vpop.permute.xlu1 %4196  ;;  %v1222_v37 = vrot.slane %v4144_v49, 7  ;;  %v1233_v46 = vrot.slane %v4143_v8, 7  ;;  %v6868_v31 = vpop.permute.xlu0 %4191 }
 0x27d   : > { %v1240_v24 = vsel %vm647_vm2, %v1228_v50, %v1234_v45  ;;  %v4153_v7 = vunpack.i.l.bf16 %v6744_v52  ;;  %v4159_v26 = vunpack.i.h.bf16 %v6746_v57  ;;  %v4158_v34 = vunpack.i.l.bf16 %v6746_v57 }
 0x27e   : > { %1388 = vst.msk [vmem:[%s5879_s11 + $0x38] sm:$0xff] %vm326_vm1, %v1370_v29  ;;  %4486 = vrot.lane.b32.xlu1 %v8550_v60, %s4964_s29  ;;  %v1266_v30 = vadd.f32 %v4743_v51, %v1240_v24  ;;  %v1246_v44 = vsel %vm647_vm2, %v1222_v37, %v1228_v50  ;;  %v1252_v17 = vsel %vm647_vm2, %v1234_v45, %v1222_v37  ;;  %v1330_v6 = vrot.slane %v4154_v35, 6  ;;  %v8608_v51 = vld [vmem:[#allocation59_spill] sm:$0xff]  ;;  %v6921_v29 = vld [vmem:[#allocation2] ss:$0 sm:$0xff]  ;;  %v8609_v37 = vld [vmem:[#allocation20_spill] sm:$0xff] }
 0x27f   : > { %v1239_v48 = vsel %vm647_vm2, %v8603_v9, %v1233_v46  ;;  %v1264_v52 = vadd.f32 %v4741_v10, %v1252_v17  ;;  %v1251_v57 = vsel %vm647_vm2, %v1233_v46, %v8604_v59  ;;  %v1265_v11 = vadd.f32 %v4744_v12, %v1246_v44  ;;  %v8605_v10 = vld [vmem:[#allocation101_spill] sm:$0xff]  ;;  %v8610_v46 = vld [vmem:[#allocation16_spill] sm:$0xff] }
 0x280   : > { %4481 = vrot.lane.b32.xlu0 %v8552_v19, %s4964_s29  ;;  %v1263_v39 = vadd.f32 %v4745_v25, %v1239_v48  ;;  %v6891_v13 = vpop.permute.xlu1 %4201  ;;  %v1261_v0 = vadd.f32 %v4746_v42, %v1251_v57  ;;  %v1341_v61 = vrot.slane %v4153_v7, 6  ;;  %v1342_v32 = vrot.slane %v4159_v26, 6  ;;  %v6893_v16 = vpop.permute.xlu0 %4206 }
 0x281   : > { %v1336_v3 = vrot.slane %v4158_v34, 6  ;;  %v4748_v25 = vadd.high.f32.bf16 %v6921_v29, %v6776_v38  ;;  %v4749_v45 = vadd.low.f32.bf16 %v6921_v29, %v6776_v38  ;;  %v4750_v50 = vadd.high.f32.bf16 %v6921_v29, %v6778_v22 }
 0x282   : > { %4496 = vrot.lane.b32.xlu1 %v8584_v1, %s4964_s29  ;;  %v1347_v18 = vsel %vm756_vm3, %v8605_v10, %v1341_v61  ;;  %v1359_v27 = vsel %vm756_vm3, %v1341_v61, %v8606_v56  ;;  %v1360_v43 = vsel %vm756_vm3, %v1342_v32, %v1330_v6  ;;  %v4189_v42 = vunpack.i.h.bf16 %v6833_v58  ;;  %v8614_v56 = vld [vmem:[#allocation87_spill] sm:$0xff] }
 0x283   : > { %v1369_v15 = vadd.f32 %v1359_v27, %v1261_v0  ;;  %v1371_v5 = vadd.f32 %v1347_v18, %v1263_v39  ;;  %v1348_v54 = vsel %vm756_vm3, %v1336_v3, %v1342_v32  ;;  %v1354_v14 = vsel %vm756_vm3, %v1330_v6, %v1336_v3  ;;  %v8612_v0 = vld [vmem:[#allocation19_spill] sm:$0xff]  ;;  %v8613_v3 = vld [vmem:[#allocation86_spill] sm:$0xff] }
 0x284   : > { %4491 = vrot.lane.b32.xlu0 %v8557_v20, %s4964_s29  ;;  %v6911_v36 = vpop.permute.xlu1 %4216  ;;  %v1372_v12 = vadd.f32 %v1360_v43, %v1264_v52  ;;  %v1373_v49 = vadd.f32 %v1354_v14, %v1265_v11  ;;  %v1374_v8 = vadd.f32 %v1348_v54, %v1266_v30  ;;  %v6915_v21 = vpop.permute.xlu0 %4211  ;;  %v4751_v38 = vadd.low.f32.bf16 %v6921_v29, %v6778_v22  ;;  %v8616_v54 = vld [vmem:[#allocation89_spill] sm:$0xff] }
 0x285   : > { %1387 = vst.msk [vmem:[%s5879_s11 + $0x30] sm:$0xff] %vm326_vm1, %v1369_v15  ;;  %1389 = vst.msk [vmem:[%s5879_s11 + $0x40] sm:$0xff] %vm326_vm1, %v1371_v5  ;;  %v4188_v35 = vunpack.i.l.bf16 %v6833_v58  ;;  %v4184_v24 = vunpack.i.h.bf16 %v6841_v28  ;;  %v4183_v7 = vunpack.i.l.bf16 %v6841_v28  ;;  %v4752_v34 = vadd.high.f32.bf16 %v6921_v29, %v6808_v53  ;;  %v8611_v28 = vld [vmem:[#allocation6_spill] sm:$0xff]  ;;  %v8615_v5 = vld [vmem:[#allocation35_spill] sm:$0xff] }
 0x286   : > { %4506 = vrot.lane.b32.xlu1 %v8609_v37, %s4965_s4  ;;  %1390 = vst.msk [vmem:[%s5879_s11 + $0x48] sm:$0xff] %vm326_vm1, %v1372_v12  ;;  %1391 = vst.msk [vmem:[%s5879_s11 + $0x50] sm:$0xff] %vm326_vm1, %v1373_v49  ;;  %v4753_v30 = vadd.low.f32.bf16 %v6921_v29, %v6808_v53  ;;  %v4754_v44 = vadd.high.f32.bf16 %v6921_v29, %v6815_v2  ;;  %v1538_v17 = vrot.slane %v4189_v42, 7  ;;  %v4199_v52 = vunpack.i.h.bf16 %v6864_v47  ;;  %v8648_v53 = vld [vmem:[#allocation126_spill] sm:$0xff] }
 0x287   : > { %1392 = vst.msk [vmem:[%s5879_s11 + $0x58] sm:$0xff] %vm326_vm1, %v1374_v8  ;;  %v1532_v22 = vrot.slane %v4188_v35, 7  ;;  %v1526_v58 = vrot.slane %v4184_v24, 7  ;;  %v1537_v48 = vrot.slane %v4183_v7, 7  ;;  %v4755_v59 = vadd.low.f32.bf16 %v6921_v29, %v6815_v2  ;;  %v8618_v35 = vld [vmem:[#allocation9_spill] sm:$0xff]  ;;  %v8619_v24 = vld [vmem:[#allocation120_spill] sm:$0xff] }
 0x288   : > { %4501 = vrot.lane.b32.xlu0 %v8610_v46, %s4965_s4  ;;  %v6945_v26 = vpop.permute.xlu1 %4221  ;;  %v6953_v9 = vpop.permute.xlu0 %4226  ;;  %v4198_v57 = vunpack.i.l.bf16 %v6864_v47  ;;  %v4194_v39 = vunpack.i.h.bf16 %v6868_v31  ;;  %v4193_v11 = vunpack.i.l.bf16 %v6868_v31  ;;  %v8617_v14 = vadd.low.f32.bf16 %v8615_v5, %v8616_v54  ;;  %v8627_v54 = vld [vmem:[#allocation133_spill] sm:$0xff] }
 0x289   : > { %v1544_v6 = vsel %vm647_vm2, %v1532_v22, %v1538_v17  ;;  %v1550_v61 = vsel %vm647_vm2, %v1526_v58, %v1532_v22  ;;  %v1556_v32 = vsel %vm647_vm2, %v1538_v17, %v1526_v58  ;;  %v1543_v47 = vsel %vm647_vm2, %v8613_v3, %v1537_v48  ;;  %v8622_v58 = vld [vmem:[#allocation43_spill] sm:$0xff] }
 0x28a   : > { %4516 = vrot.lane.b32.xlu1 %v8611_v28, %s4965_s4  ;;  %v1566_v18 = vadd.f32 %v4750_v50, %v1544_v6  ;;  %v1564_v31 = vadd.f32 %v4748_v25, %v1556_v32  ;;  %v1555_v27 = vsel %vm647_vm2, %v1537_v48, %v8614_v56  ;;  %v1563_v43 = vadd.f32 %v4749_v45, %v1543_v47  ;;  %v8620_v25 = vld [vmem:[#allocation24_spill] sm:$0xff]  ;;  %v8624_v3 = vld [vmem:[#allocation131_spill] sm:$0xff] }
 0x28b   : > { %v1561_v12 = vadd.f32 %v8617_v14, %v1555_v27  ;;  %v1565_v49 = vadd.f32 %v4751_v38, %v1550_v61  ;;  %v1542_v8 = vrot.slane %v4199_v52, 7  ;;  %v1536_v42 = vrot.slane %v4198_v57, 7  ;;  %v8621_v45 = vld [vmem:[#allocation8_spill] sm:$0xff]  ;;  %v8626_v27 = vld [vmem:[#allocation113_spill] sm:$0xff] }
 0x28c   : > { %4511 = vrot.lane.b32.xlu0 %v8612_v0, %s4965_s4  ;;  %v6974_v10 = vpop.permute.xlu1 %4236  ;;  %v6979_v15 = vpop.permute.xlu0 %4231  ;;  %v4756_v50 = vadd.high.f32.bf16 %v1566_v18, %v8619_v24  ;;  %v4757_v7 = vadd.high.f32.bf16 %v1564_v31, %v8620_v25  ;;  %v4758_v17 = vadd.low.f32.bf16 %v1563_v43, %v8620_v25  ;;  %v1530_v22 = vrot.slane %v4194_v39, 7  ;;  %v8623_v61 = vld [vmem:[#allocation132_spill] sm:$0xff]  ;;  %v8630_v25 = vld [vmem:[#allocation53_spill] sm:$0xff] }
 0x28d   : > { %v4759_v48 = vadd.low.f32.bf16 %v1561_v12, %v8622_v58  ;;  %v4760_v6 = vadd.low.f32.bf16 %v1565_v49, %v8619_v24  ;;  %v1548_v38 = vsel %vm647_vm2, %v1536_v42, %v1542_v8  ;;  %v1541_v52 = vrot.slane %v4193_v11, 7  ;;  %v8625_v18 = vld [vmem:[#allocation112_spill] sm:$0xff]  ;;  %v8628_v49 = vld [vmem:[#allocation21_spill] sm:$0xff] }
 0x28e   : > { %4526 = vrot.lane.b32.xlu1 %v8618_v35, %s4965_s4  ;;  %v1746_v32 = vadd.f32 %v4756_v50, %v8623_v61  ;;  %v1744_v47 = vadd.f32 %v4757_v7, %v8624_v3  ;;  %v1743_v31 = vadd.f32 %v4758_v17, %v8625_v18  ;;  %v1578_v39 = vadd.f32 %v4754_v44, %v1548_v38  ;;  %v8629_v24 = vld [vmem:[#allocation40_spill] sm:$0xff]  ;;  %v8635_v3 = vld [vmem:[#allocation122_spill] sm:$0xff]  ;;  %v8636_v18 = vld [vmem:[#allocation121_spill] sm:$0xff] }
 0x28f   : > { %v1741_v43 = vadd.f32 %v4759_v48, %v8626_v27  ;;  %v1745_v14 = vadd.f32 %v4760_v6, %v8627_v54  ;;  %v1554_v12 = vsel %vm647_vm2, %v1530_v22, %v1536_v42  ;;  %v1560_v11 = vsel %vm647_vm2, %v1542_v8, %v1530_v22  ;;  %v8631_v17 = vld [vmem:[#allocation124_spill] sm:$0xff]  ;;  %v8632_v48 = vld [vmem:[#allocation17_spill] sm:$0xff]  ;;  %v8633_v6 = vld [vmem:[#allocation27_spill] sm:$0xff] }
 0x290   : > { %4521 = vrot.lane.b32.xlu0 %v8621_v45, %s4965_s4  ;;  %v6995_v57 = vpop.permute.xlu1 %4246  ;;  %v7000_v56 = vpop.permute.xlu0 %4241  ;;  %v4761_v50 = vadd.high.f32.bf16 %v1746_v32, %v8629_v24  ;;  %v4762_v7 = vadd.high.f32.bf16 %v1744_v47, %v8630_v25  ;;  %v4763_v44 = vadd.low.f32.bf16 %v1743_v31, %v8630_v25  ;;  %v4764_v58 = vadd.high.f32.bf16 %v1578_v39, %v8631_v17  ;;  %v8634_v22 = vld [vmem:[#allocation91_spill] sm:$0xff]  ;;  %v8637_v39 = vld [vmem:[#allocation98_spill] sm:$0xff] }
 0x291   : > { %v4765_v38 = vadd.low.f32.bf16 %v1741_v43, %v8633_v6  ;;  %v4766_v42 = vadd.low.f32.bf16 %v1745_v14, %v8629_v24  ;;  %v1576_v8 = vadd.f32 %v4752_v34, %v1560_v11  ;;  %v1547_v61 = vsel %vm647_vm2, %v8634_v22, %v1541_v52  ;;  %v8638_v54 = vld [vmem:[#allocation135_spill] sm:$0xff]  ;;  %v8641_v6 = vld [vmem:[#allocation106_spill] sm:$0xff] }
 0x292   : > { %4536 = vrot.lane.b32.xlu1 %v8628_v49, %s4965_s4  ;;  %v1926_v47 = vadd.f32 %v4761_v50, %v8635_v3  ;;  %v1924_v31 = vadd.f32 %v4762_v7, %v8636_v18  ;;  %v1923_v27 = vadd.f32 %v4763_v44, %v8637_v39  ;;  %v1758_v43 = vadd.f32 %v4764_v58, %v8638_v54  ;;  %v8639_v14 = vld [vmem:[#allocation99_spill] sm:$0xff]  ;;  %v8643_v7 = vld [vmem:[#allocation56_spill] sm:$0xff]  ;;  %v8644_v58 = vld [vmem:[#allocation90_spill] sm:$0xff] }
 0x293   : > { %v1921_v34 = vadd.f32 %v4765_v38, %v8639_v14  ;;  %v8640_v11 = vld [vmem:[#allocation123_spill] sm:$0xff]  ;;  %v4767_v22 = vadd.high.f32.bf16 %v1576_v8, %v8641_v6  ;;  %v1559_v50 = vsel %vm647_vm2, %v1541_v52, %v8642_v55  ;;  %v8645_v38 = vadd.low.f32.bf16 %v8615_v5, %v8644_v58  ;;  %v8646_v52 = vld [vmem:[#allocation22_spill] sm:$0xff] }
 0x294   : > { %4531 = vrot.lane.b32.xlu0 %v8632_v48, %s4965_s4  ;;  %v7021_v32 = vpop.permute.xlu1 %4256  ;;  %v7027_v25 = vpop.permute.xlu0 %4251  ;;  %v1925_v24 = vadd.f32 %v4766_v42, %v8640_v11  ;;  %3408 = vst.msk [vmem:[%s5879_s11 + $0xb8] sm:$0xff] %vm326_vm1, %v1926_v47  ;;  %3406 = vst.msk [vmem:[%s5879_s11 + $0xa8] sm:$0xff] %vm326_vm1, %v1924_v31  ;;  %v4768_v44 = vadd.high.f32.bf16 %v1758_v43, %v8643_v7  ;;  %v1575_v55 = vadd.f32 %v4753_v30, %v1547_v61  ;;  %v8647_v8 = vld [vmem:[#allocation134_spill] sm:$0xff]  ;;  %v8651_v43 = vld [vmem:[#allocation60_spill] sm:$0xff] }
 0x295   : > { %3405 = vst.msk [vmem:[%s5879_s11 + $0xa0] sm:$0xff] %vm326_vm1, %v1923_v27  ;;  %v1573_v42 = vadd.f32 %v8645_v38, %v1559_v50  ;;  %3403 = vst.msk [vmem:[%s5879_s11 + $0x90] sm:$0xff] %vm326_vm1, %v1921_v34  ;;  %v1756_v3 = vadd.f32 %v4767_v22, %v8647_v8  ;;  %v4209_v5 = vunpack.i.h.bf16 %v6893_v16  ;;  %v8649_v61 = vld [vmem:[#allocation54_spill] sm:$0xff]  ;;  %v4208_v54 = vunpack.i.l.bf16 %v6893_v16  ;;  %v8656_v22 = vld [vmem:[#allocation117_spill] sm:$0xff] }
 0x296   : > { %4546 = vrot.lane.b32.xlu1 %v8610_v46, %s4966_s6  ;;  %v1577_v46 = vadd.f32 %v4755_v59, %v1554_v12  ;;  %3407 = vst.msk [vmem:[%s5879_s11 + $0xb0] sm:$0xff] %vm326_vm1, %v1925_v24  ;;  %v1938_v30 = vadd.f32 %v4768_v44, %v8648_v53  ;;  %v4770_v2 = vadd.low.f32.bf16 %v1575_v55, %v8641_v6  ;;  %v8650_v31 = vld [vmem:[#allocation58_spill] sm:$0xff]  ;;  %v8657_v44 = vld [vmem:[#allocation52_spill] sm:$0xff]  ;;  %v8658_v16 = vld [vmem:[#allocation65_spill] sm:$0xff] }
 0x297   : > { %v4769_v18 = vadd.low.f32.bf16 %v1573_v42, %v8649_v61  ;;  %v4772_v39 = vadd.high.f32.bf16 %v1756_v3, %v8650_v31  ;;  %v1713_v27 = vrot.slane %v4209_v5, 7  ;;  %v8652_v14 = vld [vmem:[#allocation118_spill] sm:$0xff]  ;;  %v4773_v38 = vadd.low.f32.bf16 %v8658_v16, %v6891_v13  ;;  %v8659_v42 = vld [vmem:[#allocation125_spill] sm:$0xff]  ;;  %v8662_v5 = vld [vmem:[#allocation116_spill] sm:$0xff] }
 0x298   : > { %4541 = vrot.lane.b32.xlu0 %v8646_v52, %s4965_s4  ;;  %v7061_v47 = vpop.permute.xlu1 %4266  ;;  %v4771_v59 = vadd.low.f32.bf16 %v1577_v46, %v8631_v17  ;;  %v7067_v12 = vpop.permute.xlu0 %4261  ;;  %v8653_v34 = vld [vmem:[#allocation30_spill] sm:$0xff]  ;;  %3420 = vst.msk [vmem:[%s5879_s11 + $0x118] sm:$0xff] %vm326_vm1, %v1938_v30  ;;  %v8655_v17 = vld [vmem:[#allocation119_spill] sm:$0xff]  ;;  %v1755_v50 = vadd.f32 %v4770_v2, %v8656_v22  ;;  %v8660_v46 = vld [vmem:[#allocation77_spill] sm:$0xff]  ;;  %v1707_v8 = vrot.slane %v4208_v54, 7  ;;  %v8663_v53 = vadd.high.f32.bf16 %v8662_v5, %v8607_v4 }
 0x299   : > { %v8654_v11 = vadd.low.f32.bf16 %v8652_v14, %v8653_v34  ;;  %v1753_v6 = vadd.f32 %v4769_v18, %v8655_v17  ;;  %v1936_v55 = vadd.f32 %v4772_v39, %v8659_v42  ;;  %v8661_v3 = vld [vmem:[#allocation61_spill] sm:$0xff]  ;;  %v8664_v18 = vld [vmem:[#allocation28_spill] sm:$0xff]  ;;  %v8665_v54 = vld [vmem:[#allocation15_spill] sm:$0xff]  ;;  %v4223_v42 = vunpack.i.l.bf16 %v6945_v26 }
 0x29a   : > { %4556 = vrot.lane.b32.xlu1 %v8612_v0, %s4966_s6  ;;  %v1757_v58 = vadd.f32 %v4771_v59, %v8657_v44  ;;  %v4774_v0 = vadd.high.f32.bf16 %v8660_v46, %v6891_v13  ;;  %v1750_v30 = vadd.f32 %v8663_v53, %v8661_v3  ;;  %v4776_v59 = vadd.low.f32.bf16 %v1755_v50, %v8650_v31  ;;  %v8666_v31 = vld [vmem:[#allocation103_spill] sm:$0xff]  ;;  %v8667_v34 = vld [vmem:[#allocation100_spill] sm:$0xff] }
 0x29b   : > { %v7075_v24 = vadd.f32 %v8654_v11, %v8651_v43  ;;  %v4775_v2 = vadd.low.f32.bf16 %v1753_v6, %v8664_v18  ;;  %3418 = vst.msk [vmem:[%s5879_s11 + $0x108] sm:$0xff] %vm326_vm1, %v1936_v55  ;;  %v1731_v13 = vsel %vm647_vm2, %v1707_v8, %v1713_v27  ;;  %v1737_v43 = vsel %vm647_vm2, %v8665_v54, %v1707_v8  ;;  %v8668_v11 = vld [vmem:[#allocation127_spill] sm:$0xff]  ;;  %v8671_v46 = vld [vmem:[#allocation88_spill] sm:$0xff]  ;;  %v8672_v18 = vld [vmem:[#allocation105_spill] sm:$0xff] }
 0x29c   : > { %4551 = vrot.lane.b32.xlu0 %v8609_v37, %s4966_s6  ;;  %v7095_v61 = vpop.permute.xlu1 %4276  ;;  %v4777_v37 = vadd.low.f32.bf16 %v1757_v58, %v8643_v7  ;;  %v7100_v39 = vpop.permute.xlu0 %4271  ;;  %v1935_v7 = vadd.f32 %v4776_v59, %v8667_v34  ;;  %v1747_v6 = vadd.f32 %v4773_v38, %v1737_v43  ;;  %v1748_v22 = vadd.f32 %v4774_v0, %v1731_v13 }
 0x29d   : > { %v1933_v14 = vadd.f32 %v4775_v2, %v8666_v31  ;;  %v1725_v50 = vsel %vm647_vm2, %v1713_v27, %v8665_v54  ;;  %v4224_v44 = vunpack.i.h.bf16 %v6945_v26  ;;  %v4229_v27 = vunpack.i.h.bf16 %v6953_v9 }
 0x29e   : > { %4566 = vrot.lane.b32.xlu1 %v8621_v45, %s4966_s6  ;;  %v1937_v17 = vadd.f32 %v4777_v37, %v8668_v11  ;;  %3417 = vst.msk [vmem:[%s5879_s11 + $0x100] sm:$0xff] %vm326_vm1, %v1935_v7  ;;  %v8669_v45 = vld [vmem:[#allocation74_spill] sm:$0xff]  ;;  %v4779_v0 = vadd.high.f32.bf16 %v1748_v22, %v8671_v46  ;;  %v4780_v8 = vadd.low.f32.bf16 %v7075_v24, %v6911_v36  ;;  %v4228_v5 = vunpack.i.l.bf16 %v6953_v9  ;;  %v8673_v9 = vld [vmem:[#allocation80_spill] sm:$0xff] }
 0x29f   : > { %3415 = vst.msk [vmem:[%s5879_s11 + $0xf0] sm:$0xff] %vm326_vm1, %v1933_v14  ;;  %v4778_v16 = vadd.high.f32.bf16 %v8669_v45, %v6911_v36  ;;  %v1888_v3 = vrot.slane %v4224_v44, 7  ;;  %v1899_v26 = vrot.slane %v4223_v42, 7  ;;  %v1900_v53 = vrot.slane %v4229_v27, 7 }
 0x2a0   : > { %4561 = vrot.lane.b32.xlu0 %v8611_v28, %s4966_s6  ;;  %v7120_v58 = vpop.permute.xlu1 %4286  ;;  %3419 = vst.msk [vmem:[%s5879_s11 + $0x110] sm:$0xff] %vm326_vm1, %v1937_v17  ;;  %v8670_v28 = vadd.low.f32.bf16 %v8608_v51, %v8607_v4  ;;  %v7135_v55 = vpop.permute.xlu0 %4281  ;;  %v4781_v4 = vadd.high.f32.bf16 %v1750_v30, %v6915_v21  ;;  %v4782_v51 = vadd.low.f32.bf16 %v1747_v6, %v8671_v46  ;;  %v1894_v24 = vrot.slane %v4228_v5, 7  ;;  %v8674_v30 = vld [vmem:[#allocation37_spill] sm:$0xff] }
 0x2a1   : > { %v1928_v2 = vadd.f32 %v4779_v0, %v8672_v18  ;;  %v1917_v37 = vsel %vm647_vm2, %v1899_v26, %v8674_v30  ;;  %v4787_v22 = vadd.low.f32.bf16 %v6921_v29, %v6979_v15 }
 0x2a2   : > { %v1749_v38 = vadd.f32 %v8670_v28, %v1725_v50  ;;  %4576 = vrot.lane.b32.xlu1 %v8632_v48, %s4966_s6  ;;  %v1905_v48 = vsel %vm647_vm2, %v8673_v9, %v1899_v26  ;;  %v1906_v43 = vsel %vm647_vm2, %v1894_v24, %v1900_v53  ;;  %v1912_v31 = vsel %vm647_vm2, %v1888_v3, %v1894_v24 }
 0x2a3   : > { %3410 = vst.msk [vmem:[%s5879_s11 + $0xc8] sm:$0xff] %vm326_vm1, %v1928_v2  ;;  %v1931_v34 = vadd.f32 %v4780_v8, %v1912_v31  ;;  %v1932_v7 = vadd.f32 %v4778_v16, %v1906_v43  ;;  %v4278_v8 = vunpack.i.l.bf16 %v7095_v61  ;;  %v4288_v26 = vunpack.i.l.bf16 %v7120_v58 }
 0x2a4   : > { %4571 = vrot.lane.b32.xlu0 %v8618_v35, %s4966_s6  ;;  %v4783_v36 = vadd.low.f32.bf16 %v1749_v38, %v6915_v21  ;;  %v7149_v59 = vpop.permute.xlu1 %4296  ;;  %v1918_v35 = vsel %vm647_vm2, %v1900_v53, %v1888_v3  ;;  %v7159_v13 = vpop.permute.xlu0 %4291  ;;  %v1927_v21 = vadd.f32 %v4782_v51, %v1917_v37  ;;  %v4279_v38 = vunpack.i.h.bf16 %v7095_v61 }
 0x2a5   : > { %v1930_v14 = vadd.f32 %v4781_v4, %v1918_v35  ;;  %3413 = vst.msk [vmem:[%s5879_s11 + $0xe0] sm:$0xff] %vm326_vm1, %v1931_v34  ;;  %3414 = vst.msk [vmem:[%s5879_s11 + $0xe8] sm:$0xff] %vm326_vm1, %v1932_v7  ;;  %v4289_v61 = vunpack.i.h.bf16 %v7120_v58  ;;  %v4298_v24 = vunpack.i.l.bf16 %v7149_v59  ;;  %v2091_v37 = vrot.slane %v4288_v26, 7 }
 0x2a6   : > { %v1929_v54 = vadd.f32 %v4783_v36, %v1905_v48  ;;  %4586 = vrot.lane.b32.xlu1 %v8646_v52, %s4966_s6  ;;  %3409 = vst.msk [vmem:[%s5879_s11 + $0xc0] sm:$0xff] %vm326_vm1, %v1927_v21  ;;  %v2090_v2 = vrot.slane %v4279_v38, 7  ;;  %v4283_v36 = vunpack.i.l.bf16 %v7135_v55  ;;  %v2084_v48 = vrot.slane %v4278_v8, 7 }
 0x2a7   : > { %3412 = vst.msk [vmem:[%s5879_s11 + $0xd8] sm:$0xff] %vm326_vm1, %v1930_v14  ;;  %v2097_v30 = vrot.slane %v4289_v61, 7  ;;  %v4299_v21 = vunpack.i.h.bf16 %v7149_v59  ;;  %v4294_v43 = vunpack.i.h.bf16 %v7159_v13  ;;  %v4293_v14 = vunpack.i.l.bf16 %v7159_v13 }
 0x2a8   : > { %4581 = vrot.lane.b32.xlu0 %v8628_v49, %s4966_s6  ;;  %3411 = vst.msk [vmem:[%s5879_s11 + $0xd0] sm:$0xff] %vm326_vm1, %v1929_v54  ;;  %v7175_v11 = vpop.permute.xlu1 %4306  ;;  %v7185_v17 = vpop.permute.xlu0 %4301  ;;  %v2096_v58 = vrot.slane %v4283_v36, 7  ;;  %v2098_v54 = vrot.slane %v4298_v24, 7 }
 0x2a9   : > { %v4309_v7 = vunpack.i.h.bf16 %v7175_v11  ;;  %v2086_v8 = vrot.slane %v4293_v14, 7  ;;  %v4308_v61 = vunpack.i.l.bf16 %v7175_v11  ;;  %v4304_v13 = vunpack.i.h.bf16 %v7185_v17 }
 0x2aa   : > { %4596 = vrot.lane.b32.xlu1 %v8533_v63, %s4967_s30  ;;  %v7257_v59 = vsel %vm647_vm2, %v2090_v2, %v2096_v58  ;;  %v7261_v34 = vsel %vm647_vm2, %v2096_v58, %v2084_v48  ;;  %v4303_v26 = vunpack.i.l.bf16 %v7185_v17 }
 0x2ab   : > { %v7279_v11 = vsel %vm647_vm2, %v2098_v54, %v2086_v8  ;;  %v2094_v58 = vrot.slane %v4309_v7, 7  ;;  %v2099_v17 = vrot.slane %v4304_v13, 7  ;;  %v7297_v13 = vsel %vm647_vm2, %v2091_v37, %v2097_v30 }
 0x2ac   : > { %4591 = vrot.lane.b32.xlu0 %v8524_v33, %s4967_s30  ;;  %v4317_v45 = vpop.permute.xlu1 %4316  ;;  %v7206_v42 = vpop.permute.xlu0 %4311  ;;  %v2093_v5 = vrot.slane %v4303_v26, 7 }
 0x2ad   : > { %v4319_v24 = vunpack.i.h.bf16 %v4317_v45  ;;  %v4314_v27 = vunpack.i.h.bf16 %v7206_v42  ;;  %v4313_v7 = vunpack.i.l.bf16 %v7206_v42 }
 0x2ae   : > { %4606 = vrot.lane.b32.xlu1 %v8524_v33, %s4968_s7  ;;  %v4284_v33 = vunpack.i.h.bf16 %v7135_v55 }
 0x2af   : > { %v2101_v4 = vrot.slane %v4319_v24, 7  ;;  %v2100_v24 = vrot.slane %v4313_v7, 7 }
 0x2b0   : > { %4601 = vrot.lane.b32.xlu0 %v8530_v23, %s4967_s30  ;;  %v7230_v53 = vpop.permute.xlu1 %4326  ;;  %v7236_v9 = vpop.permute.xlu0 %4321  ;;  %v2085_v35 = vrot.slane %v4284_v33, 7  ;;  %v2087_v33 = vrot.slane %v4299_v21, 7 }
 0x2b1   : > { %v7326_v51 = vsel %vm647_vm2, %v2094_v58, %v2100_v24 }
 0x2b2   : > { %4616 = vrot.lane.b32.xlu1 %v8530_v23, %s4968_s7  ;;  %v7246_v55 = vsel %vm647_vm2, %v2085_v35, %v2091_v37  ;;  %v7250_v31 = vsel %vm647_vm2, %v2097_v30, %v2085_v35  ;;  %v4318_v35 = vunpack.i.l.bf16 %v4317_v45  ;;  %v2108_v45 = vsel %vm647_vm2, %v2084_v48, %v2090_v2 }
 0x2b3   : > { %v7301_v2 = vsel %vm647_vm2, %v2087_v33, %v2093_v5  ;;  %v2089_v48 = vrot.slane %v4314_v27, 7  ;;  %v4329_v30 = vunpack.i.h.bf16 %v7230_v53 }
 0x2b4   : > { %4611 = vrot.lane.b32.xlu0 %v8533_v63, %s4968_s7  ;;  %v7253_v23 = vpop.permute.xlu1 %4336  ;;  %v2092_v63 = vrot.slane %v4294_v43, 7  ;;  %v7264_v38 = vpop.permute.xlu0 %4331  ;;  %v2088_v43 = vrot.slane %v4308_v61, 7  ;;  %v2095_v21 = vrot.slane %v4318_v35, 7  ;;  %v4328_v35 = vunpack.i.l.bf16 %v7230_v53 }
 0x2b5   : > { %v7320_v27 = vsel %vm647_vm2, %v2101_v4, %v2089_v48  ;;  %v4323_v61 = vunpack.i.l.bf16 %v7236_v9  ;;  %v4339_v18 = vunpack.i.h.bf16 %v7253_v23  ;;  %v7338_v53 = vsel %vm647_vm2, %v2093_v5, %v2099_v17 }
 0x2b6   : > { %4626 = vrot.lane.b32.xlu1 %v8544_v41, %s4968_s7  ;;  %v7273_v36 = vsel %vm647_vm2, %v2092_v63, %v2098_v54  ;;  %v7288_v54 = vsel %vm647_vm2, %v2099_v17, %v2087_v33  ;;  %v7307_v42 = vsel %vm647_vm2, %v2086_v8, %v2092_v63  ;;  %v7311_v26 = vsel %vm647_vm2, %v2088_v43, %v2094_v58 }
 0x2b7   : > { %v7316_v33 = vsel %vm647_vm2, %v2089_v48, %v2095_v21  ;;  %v4324_v63 = vunpack.i.h.bf16 %v7236_v9  ;;  %v7330_v7 = vsel %vm647_vm2, %v2100_v24, %v2088_v43  ;;  %v7342_v48 = vsel %vm647_vm2, %v2095_v21, %v2101_v4 }
 0x2b8   : > { %4621 = vrot.lane.b32.xlu0 %v8548_v40, %s4968_s7  ;;  %v4347_v14 = vpop.permute.xlu1 %4346  ;;  %v4342_v46 = vpop.permute.xlu0 %4341  ;;  %v4338_v58 = vunpack.i.l.bf16 %v7253_v23  ;;  %v4334_v43 = vunpack.i.h.bf16 %v7264_v38  ;;  %v2193_v9 = vrot.slane %v4329_v30, 6  ;;  %v4333_v24 = vunpack.i.l.bf16 %v7264_v38 }
 0x2b9   : > { %v4349_v50 = vunpack.i.h.bf16 %v4347_v14  ;;  %v4348_v44 = vunpack.i.l.bf16 %v4347_v14  ;;  %v2204_v5 = vrot.slane %v4328_v35, 6  ;;  %v2198_v17 = vrot.slane %v4324_v63, 6 }
 0x2ba   : > { %4636 = vrot.lane.b32.xlu1 %v8550_v60, %s4968_s7  ;;  %v4344_v3 = vunpack.i.h.bf16 %v4342_v46  ;;  %v4343_v52 = vunpack.i.l.bf16 %v4342_v46  ;;  %v2192_v21 = vrot.slane %v4323_v61, 6  ;;  %v2200_v49 = vrot.slane %v4339_v18, 6 }
 0x2bb   : > { %v7351_v23 = vrot.slane %v4338_v58, 6  ;;  %v2205_v16 = vrot.slane %v4334_v43, 6  ;;  %v2199_v30 = vrot.slane %v4333_v24, 6  ;;  %v7357_v14 = vrot.slane %v4349_v50, 6 }
 0x2bc   : > { %4631 = vrot.lane.b32.xlu0 %v8552_v19, %s4968_s7  ;;  %v4357_v37 = vpop.permute.xlu1 %4356  ;;  %v4352_v8 = vpop.permute.xlu0 %4351  ;;  %v7359_v35 = vrot.slane %v4348_v44, 6  ;;  %v2120_v18 = vadd.f32 %v4787_v22, %v7261_v34  ;;  %v2206_v63 = vrot.slane %v4343_v52, 6  ;;  %v2216_v50 = vsel %vm756_vm3, %v2192_v21, %v2198_v17 }
 0x2bd   : > { %v4359_v28 = vunpack.i.h.bf16 %v4357_v37  ;;  %v4358_v38 = vunpack.i.l.bf16 %v4357_v37  ;;  %v4354_v6 = vunpack.i.h.bf16 %v4352_v8  ;;  %v4353_v46 = vunpack.i.l.bf16 %v4352_v8 }
 0x2be   : > { %4646 = vrot.lane.b32.xlu1 %v8584_v1, %s4968_s7  ;;  %v8675_v37 = vadd.high.f32.bf16 %v6921_v29, %v6979_v15  ;;  %v2222_v44 = vsel %vm756_vm3, %v2204_v5, %v2192_v21  ;;  %v2217_v21 = vsel %vm756_vm3, %v2193_v9, %v2199_v30 }
 0x2bf   : > { %v7380_v22 = vrot.slane %v4359_v28, 6  ;;  %v7382_v52 = vrot.slane %v4358_v38, 6  ;;  %v2196_v15 = vrot.slane %v4353_v46, 6  ;;  %v7388_v34 = vadd.f32 %v2222_v44, %v2120_v18 }
 0x2c0   : > { %4641 = vrot.lane.b32.xlu0 %v8557_v20, %s4968_s7  ;;  %v7349_v0 = vpop.permute.xlu1 %4366  ;;  %v4362_v4 = vpop.permute.xlu0 %4361  ;;  %v2121_v58 = vadd.f32 %v8675_v37, %v2108_v45  ;;  %v8676_v45 = vadd.low.f32.bf16 %v6921_v29, %v7000_v56 }
 0x2c1   : > { %v4364_v8 = vunpack.i.h.bf16 %v4362_v4  ;;  %v4363_v43 = vunpack.i.l.bf16 %v4362_v4 }
 0x2c2   : > { %4656 = vrot.lane.b32.xlu1 %v8544_v41, %s4967_s30  ;;  %v7367_v41 = vrot.slane %v4344_v3, 6  ;;  %v7384_v3 = vrot.slane %v4354_v6, 6  ;;  %v2124_v24 = vadd.f32 %v8676_v45, %v7246_v55  ;;  %v7400_v6 = vadd.f32 %v2216_v50, %v2121_v58 }
 0x2c3   : > { %v4802_v55 = vadd.low.f32.bf16 %v7388_v34, %v7349_v0  ;;  %v7410_v46 = vrot.slane %v4364_v8, 6  ;;  %v2203_v18 = vrot.slane %v4363_v43, 6  ;;  %v8679_v58 = vadd.high.f32.bf16 %v6921_v29, %v6974_v10 }
 0x2c4   : > { %4651 = vrot.lane.b32.xlu0 %v8548_v40, %s4967_s30  ;;  %v7365_v61 = vpop.permute.xlu1 %4376  ;;  %v7372_v40 = vpop.permute.xlu0 %4371  ;;  %v2223_v8 = vsel %vm756_vm3, %v2205_v16, %v2193_v9  ;;  %v2212_v9 = vsel %vm756_vm3, %v2200_v49, %v2206_v63 }
 0x2c5   : > { %v2123_v50 = vadd.f32 %v8679_v58, %v7250_v31 }
 0x2c6   : > { %4666 = vrot.lane.b32.xlu1 %v8550_v60, %s4967_s30  ;;  %v8677_v60 = vadd.high.f32.bf16 %v6921_v29, %v7000_v56  ;;  %v4803_v56 = vadd.high.f32.bf16 %v7400_v6, %v7349_v0 }
 0x2c8   : > { %4661 = vrot.lane.b32.xlu0 %v8552_v19, %s4967_s30  ;;  %v2125_v28 = vadd.f32 %v8677_v60, %v7297_v13  ;;  %v7398_v4 = vpop.permute.xlu1 %4386  ;;  %v2211_v19 = vsel %vm756_vm3, %v2199_v30, %v2205_v16  ;;  %v7416_v13 = vadd.f32 %v2217_v21, %v2124_v24  ;;  %v8678_v30 = vadd.low.f32.bf16 %v6921_v29, %v6974_v10 }
 0x2c9   : > { %v8680_v10 = vadd.low.f32.bf16 %v6921_v29, %v7027_v25  ;;  %v8682_v60 = vadd.low.f32.bf16 %v6921_v29, %v6995_v57 }
 0x2ca   : > { %v7406_v38 = vpop.permute.xlu0 %4381  ;;  %4676 = vrot.lane.b32.xlu1 %v8584_v1, %s4967_s30  ;;  %v2122_v37 = vadd.f32 %v8678_v30, %v7257_v59  ;;  %v7428_v44 = vadd.f32 %v2211_v19, %v2125_v28  ;;  %v2210_v1 = vsel %vm756_vm3, %v2198_v17, %v2204_v5  ;;  %v4804_v59 = vadd.low.f32.bf16 %v7416_v13, %v7365_v61 }
 0x2cb   : > { %v2128_v31 = vadd.f32 %v8680_v10, %v7273_v36  ;;  %v2225_v5 = vsel %vm756_vm3, %v7357_v14, %v7367_v41  ;;  %v7458_v36 = vadd.f32 %v2223_v8, %v2123_v50  ;;  %v2126_v28 = vadd.f32 %v8682_v60, %v7279_v11 }
 0x2cc   : > { %4671 = vrot.lane.b32.xlu0 %v8557_v20, %s4967_s30  ;;  %v7434_v43 = vpop.permute.xlu1 %4396  ;;  %v8681_v20 = vadd.high.f32.bf16 %v6921_v29, %v7027_v25  ;;  %v4805_v16 = vadd.high.f32.bf16 %v7428_v44, %v7365_v61  ;;  %v7456_v17 = vadd.f32 %v2210_v1, %v2122_v37  ;;  %v2218_v25 = vsel %vm756_vm3, %v7351_v23, %v2200_v49 }
 0x2cd   : > { %v8683_v19 = vadd.high.f32.bf16 %v6921_v29, %v6995_v57  ;;  %v4807_v49 = vadd.high.f32.bf16 %v7458_v36, %v7372_v40  ;;  %v2224_v50 = vsel %vm756_vm3, %v2206_v63, %v7351_v23  ;;  %v8685_v8 = vadd.high.f32.bf16 %v6921_v29, %v7067_v12 }
 0x2ce   : > { %v2129_v45 = vadd.f32 %v8681_v20, %v7288_v54  ;;  %v7446_v24 = vpop.permute.xlu0 %4391  ;;  %v7463_v54 = vadd.f32 %v2212_v9, %v2128_v31  ;;  %v4806_v37 = vadd.low.f32.bf16 %v7456_v17, %v7372_v40  ;;  %v2220_v23 = vsel %vm756_vm3, %v2196_v15, %v7384_v3 }
 0x2cf   : > { %v2127_v21 = vadd.f32 %v8683_v19, %v7307_v42  ;;  %v8684_v42 = vadd.low.f32.bf16 %v6921_v29, %v7067_v12  ;;  %v2133_v10 = vadd.f32 %v8685_v8, %v7311_v26  ;;  %v2226_v63 = vsel %vm756_vm3, %v7382_v52, %v2196_v15 }
 0x2d0   : > { %v7473_v30 = vpop.permute.xlu1 %4406  ;;  %v7479_v58 = vadd.f32 %v2225_v5, %v2129_v45  ;;  %v4808_v57 = vadd.low.f32.bf16 %v7463_v54, %v7398_v4  ;;  %v7504_v20 = vadd.f32 %v2224_v50, %v2126_v28  ;;  %v2213_v12 = vsel %vm756_vm3, %v7359_v35, %v7357_v14 }
 0x2d1   : > { %v2132_v1 = vadd.f32 %v8684_v42, %v7330_v7  ;;  %v7506_v45 = vadd.f32 %v2218_v25, %v2127_v21  ;;  %v8686_v9 = vadd.low.f32.bf16 %v6921_v29, %v7021_v32  ;;  %v8687_v15 = vadd.high.f32.bf16 %v6921_v29, %v7021_v32 }
 0x2d2   : > { %v7484_v11 = vpop.permute.xlu0 %4401  ;;  %v4809_v31 = vadd.high.f32.bf16 %v7479_v58, %v7398_v4  ;;  %v2219_v25 = vsel %vm756_vm3, %v7367_v41, %v7359_v35  ;;  %v4810_v14 = vadd.low.f32.bf16 %v7504_v20, %v7406_v38  ;;  %v7528_v19 = vadd.f32 %v2220_v23, %v2133_v10 }
 0x2d3   : > { %v7512_v7 = vadd.f32 %v2226_v63, %v2132_v1  ;;  %v2130_v5 = vadd.f32 %v8686_v9, %v7301_v2  ;;  %v2131_v60 = vadd.f32 %v8687_v15, %v7338_v53  ;;  %v4811_v21 = vadd.high.f32.bf16 %v7506_v45, %v7406_v38 }
 0x2d4   : > { %v4417_v26 = vpop.permute.xlu1 %4416  ;;  %v8688_v32 = vadd.low.f32.bf16 %v6921_v29, %v7100_v39  ;;  %v8689_v35 = vadd.high.f32.bf16 %v6921_v29, %v7100_v39  ;;  %v2215_v10 = vsel %vm756_vm3, %v2203_v18, %v7410_v46  ;;  %v2227_v15 = vsel %vm756_vm3, %v7410_v46, %v7380_v22 }
 0x2d5   : > { %v7544_v42 = vadd.f32 %v2219_v25, %v2130_v5  ;;  %v7546_v8 = vadd.f32 %v2213_v12, %v2131_v60  ;;  %v8691_v12 = vadd.high.f32.bf16 %v6921_v29, %v7061_v47  ;;  %v4418_v60 = vunpack.i.l.bf16 %v4417_v26 }
 0x2d6   : > { %v4412_v28 = vpop.permute.xlu0 %4411  ;;  %v2136_v53 = vadd.f32 %v8688_v32, %v7316_v33  ;;  %v2137_v41 = vadd.f32 %v8689_v35, %v7342_v48  ;;  %v2221_v33 = vsel %vm756_vm3, %v7380_v22, %v2203_v18  ;;  %v8690_v48 = vadd.low.f32.bf16 %v6921_v29, %v7061_v47 }
 0x2d7   : > { %v2135_v9 = vadd.f32 %v8691_v12, %v7320_v27  ;;  %v4815_v5 = vadd.high.f32.bf16 %v7546_v8, %v7446_v24  ;;  %v2214_v18 = vsel %vm756_vm3, %v7384_v3, %v7382_v52  ;;  %v4419_v25 = vunpack.i.h.bf16 %v4417_v26 }
 0x2d8   : > { %v4427_v1 = vpop.permute.xlu1 %4426  ;;  %v2134_v63 = vadd.f32 %v8690_v48, %v7326_v51  ;;  %v7574_v51 = vadd.f32 %v2221_v33, %v2136_v53  ;;  %v4414_v32 = vunpack.i.h.bf16 %v4412_v28  ;;  %v4413_v29 = vunpack.i.l.bf16 %v4412_v28 }
 0x2d9   : > { %v7576_v27 = vadd.f32 %v2215_v10, %v2137_v41  ;;  %v2384_v35 = vrot.slane %v4418_v60, 7  ;;  %v4429_v48 = vunpack.i.h.bf16 %v4427_v1  ;;  %v4428_v12 = vunpack.i.l.bf16 %v4427_v1 }
 0x2da   : > { %v4422_v23 = vpop.permute.xlu0 %4421  ;;  %v7578_v50 = vadd.f32 %v2214_v18, %v2134_v63  ;;  %v7580_v52 = vadd.f32 %v2227_v15, %v2135_v9  ;;  %v2378_v3 = vrot.slane %v4414_v32, 7  ;;  %v2372_v39 = vrot.slane %v4413_v29, 7 }
 0x2db   : > { %v2380_v22 = vrot.slane %v4429_v48, 7  ;;  %v2374_v46 = vrot.slane %v4428_v12, 7  ;;  %v4424_v53 = vunpack.i.h.bf16 %v4422_v23  ;;  %v4423_v33 = vunpack.i.l.bf16 %v4422_v23 }
 0x2dc   : > { %v4437_v47 = vpop.permute.xlu1 %4436  ;;  %v4817_v28 = vadd.high.f32.bf16 %v7576_v27, %v7473_v30  ;;  %v2373_v41 = vrot.slane %v4419_v25, 7  ;;  %v2402_v1 = vsel %vm647_vm2, %v2384_v35, %v2372_v39  ;;  %v2396_v23 = vsel %vm647_vm2, %v2372_v39, %v2378_v3 }
 0x2dd   : > { %v4439_v18 = vunpack.i.h.bf16 %v4437_v47  ;;  %v2390_v60 = vsel %vm647_vm2, %v2378_v3, %v2384_v35  ;;  %v7599_v25 = vadd.f32 %v4802_v55, %v2402_v1  ;;  %v2385_v32 = vrot.slane %v4424_v53, 7 }
 0x2de   : > { %v4432_v2 = vpop.permute.xlu0 %4431  ;;  %v2379_v29 = vrot.slane %v4423_v33, 7  ;;  %v2398_v48 = vsel %vm647_vm2, %v2374_v46, %v2380_v22  ;;  %v4438_v12 = vunpack.i.l.bf16 %v4437_v47  ;;  %v2409_v39 = vadd.f32 %v4803_v56, %v2396_v23 }
 0x2df   : > { %v4434_v26 = vunpack.i.h.bf16 %v4432_v2  ;;  %v4433_v9 = vunpack.i.l.bf16 %v4432_v2  ;;  %v2403_v35 = vsel %vm647_vm2, %v2385_v32, %v2373_v41  ;;  %v2387_v33 = vrot.slane %v4439_v18, 7 }
 0x2e0   : > { %v4447_v10 = vpop.permute.xlu1 %4446  ;;  %v2391_v55 = vsel %vm647_vm2, %v2379_v29, %v2385_v32  ;;  %v2397_v53 = vsel %vm647_vm2, %v2373_v41, %v2379_v29  ;;  %v2381_v47 = vrot.slane %v4438_v12, 7  ;;  %v7615_v0 = vadd.f32 %v4806_v37, %v2390_v60 }
 0x2e1   : > { %v4449_v3 = vunpack.i.h.bf16 %v4447_v10  ;;  %v4448_v63 = vunpack.i.l.bf16 %v4447_v10  ;;  %v7620_v6 = vadd.f32 %v4811_v21, %v2398_v48  ;;  %v2375_v56 = vrot.slane %v4434_v26, 7 }
 0x2e2   : > { %v4442_v15 = vpop.permute.xlu0 %4441  ;;  %v2386_v2 = vrot.slane %v4433_v9, 7  ;;  %v7625_v10 = vadd.f32 %v4807_v49, %v2403_v35  ;;  %v7630_v17 = vadd.f32 %v4804_v59, %v2397_v53  ;;  %v2413_v37 = vadd.f32 %v4805_v16, %v2391_v55 }
 0x2e3   : > { %v4444_v41 = vunpack.i.h.bf16 %v4442_v15  ;;  %v4443_v23 = vunpack.i.l.bf16 %v4442_v15  ;;  %v2377_v45 = vrot.slane %v4449_v3, 7  ;;  %v2388_v21 = vrot.slane %v4448_v63, 7 }
 0x2e4   : > { %v4457_v34 = vpop.permute.xlu1 %4456  ;;  %v2393_v40 = vsel %vm647_vm2, %v2381_v47, %v2387_v33  ;;  %v2399_v36 = vsel %vm647_vm2, %v2375_v56, %v2381_v47  ;;  %v2405_v49 = vsel %vm647_vm2, %v2387_v33, %v2375_v56  ;;  %v2392_v13 = vsel %vm647_vm2, %v2380_v22, %v2386_v2 }
 0x2e5   : > { %v4459_v18 = vunpack.i.h.bf16 %v4457_v34  ;;  %v2404_v61 = vsel %vm647_vm2, %v2386_v2, %v2374_v46  ;;  %v2382_v44 = vrot.slane %v4444_v41, 7  ;;  %v2376_v16 = vrot.slane %v4443_v23, 7 }
 0x2e6   : > { %v4452_v1 = vpop.permute.xlu0 %4451  ;;  %v4458_v9 = vunpack.i.l.bf16 %v4457_v34  ;;  %v7648_v29 = vadd.f32 %v4815_v5, %v2393_v40  ;;  %v7653_v22 = vadd.f32 %v4808_v57, %v2392_v13  ;;  %v7658_v46 = vadd.f32 %v4809_v31, %v2405_v49 }
 0x2e7   : > { %v2486_v63 = vrot.slane %v4459_v18, 6  ;;  %v4454_v15 = vunpack.i.h.bf16 %v4452_v1  ;;  %v4453_v60 = vunpack.i.l.bf16 %v4452_v1  ;;  %v2414_v35 = vadd.f32 %v4810_v14, %v2404_v61 }
 0x2e8   : > { %v4467_v26 = vpop.permute.xlu1 %4466  ;;  %v8692_v8 = vadd.low.f32.bf16 %v7544_v42, %v7446_v24  ;;  %v2400_v54 = vsel %vm647_vm2, %v2376_v16, %v2382_v44  ;;  %v2480_v57 = vrot.slane %v4458_v9, 6  ;;  %v7674_v24 = vsel %vm647_vm2, %v2382_v44, %v2388_v21 }
 0x2e9   : > { %v4469_v32 = vunpack.i.h.bf16 %v4467_v26  ;;  %v4468_v48 = vunpack.i.l.bf16 %v4467_v26  ;;  %v2389_v34 = vrot.slane %v4454_v15, 7  ;;  %v2383_v4 = vrot.slane %v4453_v60, 7 }
 0x2ea   : > { %v4462_v59 = vpop.permute.xlu0 %4461  ;;  %v7666_v5 = vadd.f32 %v8692_v8, %v2399_v36  ;;  %v2504_v55 = vsel %vm756_vm3, %v2480_v57, %v2486_v63  ;;  %v7678_v42 = vsel %vm647_vm2, %v2388_v21, %v2376_v16  ;;  %v8693_v53 = vadd.high.f32.bf16 %v7528_v19, %v7434_v43 }
 0x2eb   : > { %v2493_v58 = vrot.slane %v4469_v32, 6  ;;  %v2487_v31 = vrot.slane %v4468_v48, 6  ;;  %v4464_v38 = vunpack.i.h.bf16 %v4462_v59  ;;  %v4463_v20 = vunpack.i.l.bf16 %v4462_v59 }
 0x2ec   : > { %v4477_v12 = vpop.permute.xlu1 %4476  ;;  %v2421_v33 = vadd.f32 %v8693_v53, %v2400_v54  ;;  %v2517_v47 = vadd.f32 %v2504_v55, %v2409_v39  ;;  %v7685_v56 = vsel %vm647_vm2, %v2389_v34, %v2377_v45  ;;  %v2395_v2 = vsel %vm647_vm2, %v2383_v4, %v2389_v34 }
 0x2ed   : > { %v4479_v14 = vunpack.i.h.bf16 %v4477_v12  ;;  %v7691_v41 = vsel %vm647_vm2, %v2377_v45, %v2383_v4  ;;  %v2499_v23 = vsel %vm756_vm3, %v2487_v31, %v2493_v58  ;;  %v2481_v39 = vrot.slane %v4464_v38, 6 }
 0x2ee   : > { %v4472_v3 = vpop.permute.xlu0 %4471  ;;  %3422 = vst.msk [vmem:[%s5879_s11 + $0x128] sm:$0xff] %vm326_vm1, %v2517_v47  ;;  %v2521_v19 = vadd.f32 %v2499_v23, %v2413_v37  ;;  %v2492_v21 = vrot.slane %v4463_v20, 6  ;;  %v4478_v40 = vunpack.i.l.bf16 %v4477_v12  ;;  %v2425_v23 = vadd.f32 %v4817_v28, %v2395_v2 }
 0x2ef   : > { %v2483_v26 = vrot.slane %v4479_v14, 6  ;;  %v4474_v36 = vunpack.i.h.bf16 %v4472_v3  ;;  %v4473_v49 = vunpack.i.l.bf16 %v4472_v3  ;;  %v2505_v45 = vsel %vm756_vm3, %v2481_v39, %v2487_v31 }
 0x2f0   : > { %v4487_v1 = vpop.permute.xlu1 %4486  ;;  %3426 = vst.msk [vmem:[%s5879_s11 + $0x148] sm:$0xff] %vm326_vm1, %v2521_v19  ;;  %v2511_v59 = vsel %vm756_vm3, %v2493_v58, %v2481_v39  ;;  %v2498_v37 = vsel %vm756_vm3, %v2486_v63, %v2492_v21  ;;  %v2510_v61 = vsel %vm756_vm3, %v2492_v21, %v2480_v57  ;;  %v2520_v60 = vadd.f32 %v2505_v45, %v7630_v17 }
 0x2f1   : > { %v4489_v13 = vunpack.i.h.bf16 %v4487_v1  ;;  %v2516_v16 = vadd.f32 %v2510_v61, %v7599_v25  ;;  %v2518_v9 = vadd.f32 %v2498_v37, %v7615_v0  ;;  %v2519_v15 = vadd.f32 %v2511_v59, %v7625_v10 }
 0x2f2   : > { %v4482_v18 = vpop.permute.xlu0 %4481  ;;  %v2494_v48 = vrot.slane %v4478_v40, 6  ;;  %v2488_v12 = vrot.slane %v4474_v36, 6  ;;  %v2482_v8 = vrot.slane %v4473_v49, 6  ;;  %3425 = vst.msk [vmem:[%s5879_s11 + $0x140] sm:$0xff] %vm326_vm1, %v2520_v60  ;;  %v4488_v25 = vunpack.i.l.bf16 %v4487_v1 }
 0x2f3   : > { %v2490_v54 = vrot.slane %v4489_v13, 6  ;;  %3421 = vst.msk [vmem:[%s5879_s11 + $0x120] sm:$0xff] %vm326_vm1, %v2516_v16  ;;  %3423 = vst.msk [vmem:[%s5879_s11 + $0x130] sm:$0xff] %vm326_vm1, %v2518_v9  ;;  %v4484_v63 = vunpack.i.h.bf16 %v4482_v18  ;;  %v4483_v0 = vunpack.i.l.bf16 %v4482_v18  ;;  %v8694_v45 = vadd.low.f32.bf16 %v7512_v7, %v7434_v43 }
 0x2f4   : > { %v4497_v44 = vpop.permute.xlu1 %4496  ;;  %3424 = vst.msk [vmem:[%s5879_s11 + $0x138] sm:$0xff] %vm326_vm1, %v2519_v15  ;;  %v2500_v10 = vsel %vm756_vm3, %v2488_v12, %v2494_v48  ;;  %v2506_v17 = vsel %vm756_vm3, %v2482_v8, %v2488_v12  ;;  %v2512_v3 = vsel %vm756_vm3, %v2494_v48, %v2482_v8  ;;  %v2484_v38 = vrot.slane %v4488_v25, 6  ;;  %v7809_v48 = vld [vmem:[#allocation2] ss:$0 sm:$0xff] }
 0x2f5   : > { %v4499_v57 = vunpack.i.h.bf16 %v4497_v44  ;;  %v4498_v34 = vunpack.i.l.bf16 %v4497_v44  ;;  %v2522_v58 = vadd.f32 %v2512_v3, %v2414_v35  ;;  %v2523_v31 = vadd.f32 %v2506_v17, %v7620_v6 }
 0x2f6   : > { %v4492_v32 = vpop.permute.xlu0 %4491  ;;  %v2524_v55 = vadd.f32 %v2500_v10, %v7653_v22  ;;  %v2495_v14 = vrot.slane %v4484_v63, 6  ;;  %v2489_v53 = vrot.slane %v4483_v0, 6  ;;  %v2508_v6 = vsel %vm756_vm3, %v2484_v38, %v2490_v54 }
 0x2f7   : > { %v2497_v47 = vrot.slane %v4499_v57, 6  ;;  %v2491_v1 = vrot.slane %v4498_v34, 6  ;;  %3427 = vst.msk [vmem:[%s5879_s11 + $0x150] sm:$0xff] %vm326_vm1, %v2522_v58  ;;  %3428 = vst.msk [vmem:[%s5879_s11 + $0x158] sm:$0xff] %vm326_vm1, %v2523_v31  ;;  %v4494_v22 = vunpack.i.h.bf16 %v4492_v32  ;;  %v4493_v35 = vunpack.i.l.bf16 %v4492_v32 }
 0x2f8   : > { %v7725_v4 = vpop.permute.xlu1 %4506  ;;  %3429 = vst.msk [vmem:[%s5879_s11 + $0x160] sm:$0xff] %vm326_vm1, %v2524_v55  ;;  %v2529_v18 = vadd.f32 %v2508_v6, %v2421_v33  ;;  %v2513_v19 = vsel %vm756_vm3, %v2495_v14, %v2483_v26  ;;  %v2501_v27 = vsel %vm756_vm3, %v2489_v53, %v2495_v14  ;;  %v2507_v28 = vsel %vm756_vm3, %v2483_v26, %v2489_v53 }
 0x2f9   : > { %v2525_v39 = vadd.f32 %v2513_v19, %v7658_v46  ;;  %v2526_v21 = vadd.f32 %v2507_v28, %v7666_v5  ;;  %v2527_v33 = vadd.f32 %v2501_v27, %v7648_v29  ;;  %v2503_v40 = vsel %vm756_vm3, %v2491_v1, %v2497_v47 }
 0x2fa   : > { %v7729_v20 = vpop.permute.xlu0 %4501  ;;  %3434 = vst.msk [vmem:[%s5879_s11 + $0x188] sm:$0xff] %vm326_vm1, %v2529_v18  ;;  %v2533_v49 = vadd.f32 %v2503_v40, %v2425_v23  ;;  %v2485_v26 = vrot.slane %v4494_v22, 6  ;;  %v2496_v13 = vrot.slane %v4493_v35, 6  ;;  %v2420_v46 = vadd.f32 %v8694_v45, %v7678_v42 }
 0x2fb   : > { %v8695_v5 = vadd.low.f32.bf16 %v7578_v50, %v7484_v11  ;;  %v8696_v59 = vadd.high.f32.bf16 %v7580_v52, %v7484_v11  ;;  %v8697_v61 = vadd.low.f32.bf16 %v7574_v51, %v7473_v30  ;;  %3430 = vst.msk [vmem:[%s5879_s11 + $0x168] sm:$0xff] %vm326_vm1, %v2525_v39  ;;  %3431 = vst.msk [vmem:[%s5879_s11 + $0x170] sm:$0xff] %vm326_vm1, %v2526_v21 }
 0x2fc   : > { %v7748_v2 = vpop.permute.xlu1 %4516  ;;  %3432 = vst.msk [vmem:[%s5879_s11 + $0x178] sm:$0xff] %vm326_vm1, %v2527_v33  ;;  %3438 = vst.msk [vmem:[%s5879_s11 + $0x1a8] sm:$0xff] %vm326_vm1, %v2533_v49  ;;  %v2509_v43 = vsel %vm756_vm3, %v2485_v26, %v2491_v1  ;;  %v2515_v11 = vsel %vm756_vm3, %v2497_v47, %v2485_v26  ;;  %v2502_v30 = vsel %vm756_vm3, %v2490_v54, %v2496_v13 }
 0x2fd   : > { %v2422_v29 = vadd.f32 %v8695_v5, %v7674_v24  ;;  %v2423_v37 = vadd.f32 %v8696_v59, %v7685_v56  ;;  %v2424_v44 = vadd.f32 %v8697_v61, %v7691_v41  ;;  %v2514_v7 = vsel %vm756_vm3, %v2496_v13, %v2484_v38 }
 0x2fe   : > { %v7755_v36 = vpop.permute.xlu0 %4511  ;;  %v2528_v51 = vadd.f32 %v2514_v7, %v2420_v46  ;;  %v4820_v12 = vadd.high.f32.bf16 %v7809_v48, %v7725_v4  ;;  %v4821_v8 = vadd.low.f32.bf16 %v7809_v48, %v7725_v4  ;;  %v4822_v54 = vadd.high.f32.bf16 %v7809_v48, %v7729_v20 }
 0x2ff   : > { %v2530_v52 = vadd.f32 %v2502_v30, %v2422_v29  ;;  %v2531_v24 = vadd.f32 %v2515_v11, %v2423_v37  ;;  %v2532_v42 = vadd.f32 %v2509_v43, %v2424_v44  ;;  %v4823_v25 = vadd.low.f32.bf16 %v7809_v48, %v7729_v20 }
 0x300   : > { %v7791_v50 = vpop.permute.xlu1 %4526  ;;  %3433 = vst.msk [vmem:[%s5879_s11 + $0x180] sm:$0xff] %vm326_vm1, %v2528_v51  ;;  %v4824_v63 = vadd.high.f32.bf16 %v7809_v48, %v7748_v2  ;;  %v4825_v0 = vadd.low.f32.bf16 %v7809_v48, %v7748_v2  ;;  %v4826_v3 = vadd.high.f32.bf16 %v7809_v48, %v7755_v36  ;;  %v4827_v34 = vadd.low.f32.bf16 %v7809_v48, %v7755_v36 }
 0x301   : > { %3435 = vst.msk [vmem:[%s5879_s11 + $0x190] sm:$0xff] %vm326_vm1, %v2530_v52  ;;  %3436 = vst.msk [vmem:[%s5879_s11 + $0x198] sm:$0xff] %vm326_vm1, %v2531_v24  ;;  %v4828_v58 = vadd.high.f32.bf16 %v7809_v48, %v7791_v50  ;;  %v4829_v55 = vadd.low.f32.bf16 %v7809_v48, %v7791_v50 }
 0x302   : > { %v7793_v56 = vpop.permute.xlu0 %4521  ;;  %3437 = vst.msk [vmem:[%s5879_s11 + $0x1a0] sm:$0xff] %vm326_vm1, %v2532_v42 }
 0x303   : > { %v4830_v38 = vadd.high.f32.bf16 %v7809_v48, %v7793_v56  ;;  %v4831_v14 = vadd.low.f32.bf16 %v7809_v48, %v7793_v56 }
 0x304   : > { %v7803_v41 = vpop.permute.xlu1 %4536 }
 0x305   : > { %v4832_v35 = vadd.high.f32.bf16 %v7809_v48, %v7803_v41  ;;  %v4833_v39 = vadd.low.f32.bf16 %v7809_v48, %v7803_v41 }
 0x306   : > { %v7805_v16 = vpop.permute.xlu0 %4531 }
 0x307   : > { %v4834_v26 = vadd.high.f32.bf16 %v7809_v48, %v7805_v16  ;;  %v4835_v13 = vadd.low.f32.bf16 %v7809_v48, %v7805_v16 }
 0x308   : > { %v4547_v9 = vpop.permute.xlu1 %4546 }
 0x309   : > { %v4549_v57 = vunpack.i.h.bf16 %v4547_v9  ;;  %v4548_v10 = vunpack.i.l.bf16 %v4547_v9 }
 0x30a   : > { %v7807_v15 = vpop.permute.xlu0 %4541 }
 0x30b   : > { %v2685_v1 = vrot.slane %v4549_v57, 7  ;;  %v2679_v23 = vrot.slane %v4548_v10, 7  ;;  %v4836_v43 = vadd.high.f32.bf16 %v7809_v48, %v7807_v15  ;;  %v4837_v11 = vadd.low.f32.bf16 %v7809_v48, %v7807_v15 }
 0x30c   : > { %v4557_v60 = vpop.permute.xlu1 %4556 }
 0x30d   : > { %v4559_v53 = vunpack.i.h.bf16 %v4557_v60  ;;  %v4558_v6 = vunpack.i.l.bf16 %v4557_v60  ;;  %v2703_v5 = vsel %vm647_vm2, %v2679_v23, %v2685_v1 }
 0x30e   : > { %v4552_v32 = vpop.permute.xlu0 %4551 }
 0x30f   : > { %v4553_v20 = vunpack.i.l.bf16 %v4552_v32  ;;  %v4554_v47 = vunpack.i.h.bf16 %v4552_v32  ;;  %v2692_v33 = vrot.slane %v4559_v53, 7  ;;  %v2686_v45 = vrot.slane %v4558_v6, 7 }
 0x310   : > { %v4567_v17 = vpop.permute.xlu1 %4566  ;;  %v2716_v32 = vadd.f32 %v4822_v54, %v2703_v5 }
 0x311   : > { %v4568_v18 = vunpack.i.l.bf16 %v4567_v17  ;;  %v2691_v21 = vrot.slane %v4553_v20, 7  ;;  %v2680_v40 = vrot.slane %v4554_v47, 7  ;;  %v4569_v29 = vunpack.i.h.bf16 %v4567_v17 }
 0x312   : > { %v4562_v31 = vpop.permute.xlu0 %4561  ;;  %v2698_v57 = vsel %vm647_vm2, %v2686_v45, %v2692_v33 }
 0x313   : > { %v4564_v19 = vunpack.i.h.bf16 %v4562_v31  ;;  %v4563_v27 = vunpack.i.l.bf16 %v4562_v31  ;;  %v2693_v59 = vrot.slane %v4568_v18, 7  ;;  %v2697_v7 = vsel %vm647_vm2, %v2685_v1, %v2691_v21 }
 0x314   : > { %v4577_v22 = vpop.permute.xlu1 %4576  ;;  %v2710_v24 = vsel %vm647_vm2, %v2692_v33, %v2680_v40  ;;  %v2709_v42 = vsel %vm647_vm2, %v2691_v21, %v2679_v23  ;;  %v2704_v10 = vsel %vm647_vm2, %v2680_v40, %v2686_v45  ;;  %v7865_v17 = vrot.slane %v4569_v29, 7 }
 0x315   : > { %v4579_v36 = vunpack.i.h.bf16 %v4577_v22  ;;  %v4578_v49 = vunpack.i.l.bf16 %v4577_v22  ;;  %v2687_v37 = vrot.slane %v4564_v19, 7  ;;  %v2681_v61 = vrot.slane %v4563_v27, 7 }
 0x316   : > { %v4572_v28 = vpop.permute.xlu0 %4571  ;;  %v2717_v31 = vadd.f32 %v4821_v8, %v2697_v7  ;;  %v2718_v54 = vadd.f32 %v4820_v12, %v2710_v24  ;;  %v2715_v23 = vadd.f32 %v4823_v25, %v2709_v42  ;;  %v2719_v18 = vadd.f32 %v4827_v34, %v2704_v10 }
 0x317   : > { %v4574_v30 = vunpack.i.h.bf16 %v4572_v28  ;;  %v7851_v51 = vrot.slane %v4579_v36, 7  ;;  %v7853_v52 = vrot.slane %v4578_v49, 7  ;;  %v4573_v9 = vunpack.i.l.bf16 %v4572_v28 }
 0x318   : > { %v4587_v46 = vpop.permute.xlu1 %4586  ;;  %v2699_v53 = vsel %vm647_vm2, %v2687_v37, %v2693_v59  ;;  %v2705_v47 = vsel %vm647_vm2, %v2681_v61, %v2687_v37  ;;  %v2711_v6 = vsel %vm647_vm2, %v2693_v59, %v2681_v61  ;;  %v2720_v8 = vadd.f32 %v4826_v3, %v2698_v57 }
 0x319   : > { %v7871_v1 = vrot.slane %v4574_v30, 7  ;;  %v4589_v22 = vunpack.i.h.bf16 %v4587_v46  ;;  %v2707_v19 = vsel %vm647_vm2, %v7853_v52, %v7851_v51  ;;  %v2688_v27 = vrot.slane %v4573_v9, 7 }
 0x31a   : > { %v4582_v44 = vpop.permute.xlu0 %4581  ;;  %v7882_v21 = vadd.f32 %v4831_v14, %v2699_v53  ;;  %v7887_v4 = vadd.f32 %v4824_v63, %v2705_v47  ;;  %v4588_v12 = vunpack.i.l.bf16 %v4587_v46  ;;  %v7892_v3 = vadd.f32 %v4825_v0, %v2711_v6 }
 0x31b   : > { %v4584_v34 = vunpack.i.h.bf16 %v4582_v44  ;;  %v4583_v36 = vunpack.i.l.bf16 %v4582_v44  ;;  %v2712_v14 = vsel %vm647_vm2, %v7871_v1, %v7865_v17  ;;  %v7898_v49 = vadd.f32 %v4834_v26, %v2707_v19 }
 0x31c   : > { %v7859_v60 = vpop.permute.xlu1 %4596  ;;  %v2696_v63 = vrot.slane %v4589_v22, 7  ;;  %v2690_v61 = vrot.slane %v4588_v12, 7 }
 0x31d   : > { %v2684_v24 = vrot.slane %v4584_v34, 7  ;;  %v2695_v42 = vrot.slane %v4583_v36, 7  ;;  %v4839_v57 = vadd.low.f32.bf16 %v2717_v31, %v7859_v60  ;;  %v4841_v6 = vadd.high.f32.bf16 %v2718_v54, %v7859_v60 }
 0x31e   : > { %v4592_v20 = vpop.permute.xlu0 %4591  ;;  %v2702_v56 = vsel %vm647_vm2, %v2690_v61, %v2696_v63 }
 0x31f   : > { %v4838_v5 = vadd.high.f32.bf16 %v2716_v32, %v4592_v20  ;;  %v4842_v22 = vadd.low.f32.bf16 %v2715_v23, %v4592_v20 }
 0x320   : > { %v4607_v28 = vpop.permute.xlu1 %4606 }
 0x321   : > { %v4609_v25 = vunpack.i.h.bf16 %v4607_v28  ;;  %v4608_v33 = vunpack.i.l.bf16 %v4607_v28 }
 0x322   : > { %v4602_v40 = vpop.permute.xlu0 %4601 }
 0x323   : > { %v2865_v45 = vrot.slane %v4609_v25, 7  ;;  %v2859_v46 = vrot.slane %v4608_v33, 7  ;;  %v4840_v32 = vadd.high.f32.bf16 %v2720_v8, %v4602_v40  ;;  %v4843_v19 = vadd.low.f32.bf16 %v2719_v18, %v4602_v40 }
 0x324   : > { %v4617_v29 = vpop.permute.xlu1 %4616 }
 0x325   : > { %v2883_v2 = vsel %vm647_vm2, %v2859_v46, %v2865_v45  ;;  %v4619_v0 = vunpack.i.h.bf16 %v4617_v29  ;;  %v4618_v59 = vunpack.i.l.bf16 %v4617_v29  ;;  %v2700_v29 = vsel %vm647_vm2, %v2688_v27, %v7871_v1 }
 0x326   : > { %v4612_v37 = vpop.permute.xlu0 %4611  ;;  %v2896_v44 = vadd.f32 %v4838_v5, %v2883_v2  ;;  %v2724_v5 = vadd.f32 %v4830_v38, %v2712_v14  ;;  %v2706_v2 = vsel %vm647_vm2, %v7865_v17, %v2688_v27  ;;  %v2713_v14 = vsel %vm647_vm2, %v2695_v42, %v7853_v52 }
 0x327   : > { %v4614_v30 = vunpack.i.h.bf16 %v4612_v37  ;;  %v4613_v7 = vunpack.i.l.bf16 %v4612_v37  ;;  %v2872_v26 = vrot.slane %v4619_v0, 7  ;;  %v2866_v9 = vrot.slane %v4618_v59, 7 }
 0x328   : > { %3440 = vst.msk [vmem:[%s5879_s11 + $0x1b8] sm:$0xff] %vm326_vm1, %v2896_v44  ;;  %v4627_v47 = vpop.permute.xlu1 %4626  ;;  %v2708_v0 = vsel %vm647_vm2, %v2684_v24, %v2690_v61  ;;  %v2701_v1 = vsel %vm647_vm2, %v7851_v51, %v2695_v42  ;;  %v2714_v27 = vsel %vm647_vm2, %v2696_v63, %v2684_v24  ;;  %v2726_v52 = vadd.f32 %v4828_v58, %v2700_v29 }
 0x329   : > { %v2860_v10 = vrot.slane %v4614_v30, 7  ;;  %v2871_v53 = vrot.slane %v4613_v7, 7  ;;  %v2878_v28 = vsel %vm647_vm2, %v2866_v9, %v2872_v26  ;;  %v4628_v40 = vunpack.i.l.bf16 %v4627_v47 }
 0x32a   : > { %v4622_v12 = vpop.permute.xlu0 %4621  ;;  %v2900_v25 = vadd.f32 %v4840_v32, %v2878_v28  ;;  %v4629_v59 = vunpack.i.h.bf16 %v4627_v47  ;;  %v2727_v51 = vadd.f32 %v4835_v13, %v2713_v14  ;;  %v2725_v42 = vadd.f32 %v4829_v55, %v2706_v2 }
 0x32b   : > { %v2884_v31 = vsel %vm647_vm2, %v2860_v10, %v2866_v9  ;;  %v2890_v8 = vsel %vm647_vm2, %v2872_v26, %v2860_v10  ;;  %v2877_v33 = vsel %vm647_vm2, %v2865_v45, %v2871_v53  ;;  %v2889_v60 = vsel %vm647_vm2, %v2871_v53, %v2859_v46 }
 0x32c   : > { %v2897_v20 = vadd.f32 %v4839_v57, %v2877_v33  ;;  %v2898_v54 = vadd.f32 %v4841_v6, %v2890_v8  ;;  %v2899_v23 = vadd.f32 %v4843_v19, %v2884_v31  ;;  %3444 = vst.msk [vmem:[%s5879_s11 + $0x1d8] sm:$0xff] %vm326_vm1, %v2900_v25  ;;  %v2895_v18 = vadd.f32 %v4842_v22, %v2889_v60  ;;  %v4637_v36 = vpop.permute.xlu1 %4636 }
 0x32d   : > { %v4624_v34 = vunpack.i.h.bf16 %v4622_v12  ;;  %v4623_v45 = vunpack.i.l.bf16 %v4622_v12  ;;  %v4639_v37 = vunpack.i.h.bf16 %v4637_v36  ;;  %v4638_v17 = vunpack.i.l.bf16 %v4637_v36 }
 0x32e   : > { %3441 = vst.msk [vmem:[%s5879_s11 + $0x1c0] sm:$0xff] %vm326_vm1, %v2897_v20  ;;  %3442 = vst.msk [vmem:[%s5879_s11 + $0x1c8] sm:$0xff] %vm326_vm1, %v2898_v54  ;;  %v4632_v46 = vpop.permute.xlu0 %4631  ;;  %v2873_v44 = vrot.slane %v4628_v40, 7  ;;  %v2731_v63 = vadd.f32 %v4837_v11, %v2708_v0  ;;  %v2732_v57 = vadd.f32 %v4836_v43, %v2702_v56  ;;  %v7965_v58 = vadd.f32 %v4833_v39, %v2701_v1 }
 0x32f   : > { %3443 = vst.msk [vmem:[%s5879_s11 + $0x1d0] sm:$0xff] %vm326_vm1, %v2899_v23  ;;  %3439 = vst.msk [vmem:[%s5879_s11 + $0x1b0] sm:$0xff] %vm326_vm1, %v2895_v18  ;;  %v4634_v38 = vunpack.i.h.bf16 %v4632_v46  ;;  %v2867_v30 = vrot.slane %v4624_v34, 7  ;;  %v4633_v7 = vunpack.i.l.bf16 %v4632_v46  ;;  %v2861_v9 = vrot.slane %v4623_v45, 7 }
 0x330   : > { %v4647_v26 = vpop.permute.xlu1 %4646  ;;  %v7970_v16 = vadd.f32 %v4832_v35, %v2714_v27  ;;  %v2862_v50 = vrot.slane %v4629_v59, 7  ;;  %v2869_v55 = vrot.slane %v4639_v37, 7  ;;  %v2863_v13 = vrot.slane %v4638_v17, 7 }
 0x331   : > { %v2874_v24 = vrot.slane %v4634_v38, 7  ;;  %v4649_v32 = vunpack.i.h.bf16 %v4647_v26  ;;  %v2868_v11 = vrot.slane %v4633_v7, 7  ;;  %v4648_v10 = vunpack.i.l.bf16 %v4647_v26 }
 0x332   : > { %v4642_v61 = vpop.permute.xlu0 %4641  ;;  %v2879_v15 = vsel %vm647_vm2, %v2867_v30, %v2873_v44  ;;  %v2885_v39 = vsel %vm647_vm2, %v2861_v9, %v2867_v30  ;;  %v2891_v41 = vsel %vm647_vm2, %v2873_v44, %v2861_v9  ;;  %v2887_v28 = vsel %vm647_vm2, %v2863_v13, %v2869_v55  ;;  %v3117_v9 = vld [vmem:[%s5879_s11 + $0x8] sm:$0xff] (%p8698_p8) }
 0x333   : > { %v4643_v53 = vunpack.i.l.bf16 %v4642_v61  ;;  %v4644_v48 = vunpack.i.h.bf16 %v4642_v61  ;;  %v2892_v35 = vsel %vm647_vm2, %v2874_v24, %v2862_v50  ;;  %v2876_v6 = vrot.slane %v4649_v32, 7  ;;  %v3119_v61 = vld [vmem:[%s5879_s11 + $0x10] sm:$0xff] (%p8698_p8)  ;;  %v3141_v32 = vld [vmem:[%s5879_s11 + $0x68] sm:$0xff] (%p8698_p8)  ;;  %3118 = vst [vmem:[%s8051_s9 + $0x8] sm:$0xff] (%p8698_p8), %v3117_v9 }
 0x334   : > { %v4657_v47 = vpop.permute.xlu1 %4656  ;;  %v2870_v12 = vrot.slane %v4648_v10, 7  ;;  %v3145_v10 = vld [vmem:[%s5879_s11 + $0x78] sm:$0xff] (%p8698_p8)  ;;  %3120 = vst [vmem:[%s8051_s9 + $0x10] sm:$0xff] (%p8698_p8), %v3119_v61  ;;  %3142 = vst [vmem:[%s8051_s9 + $0x68] sm:$0xff] (%p8698_p8), %v3141_v32 }
 0x335   : > { %v4844_v22 = vadd.low.f32.bf16 %v7882_v21, %v4657_v47  ;;  %v4845_v19 = vadd.high.f32.bf16 %v2724_v5, %v4657_v47  ;;  %v2875_v25 = vrot.slane %v4643_v53, 7  ;;  %v2864_v34 = vrot.slane %v4644_v48, 7  ;;  %v3147_v53 = vld [vmem:[%s5879_s11 + $0x80] sm:$0xff] (%p8698_p8)  ;;  %v3149_v47 = vld [vmem:[%s5879_s11 + $0x88] sm:$0xff] (%p8698_p8)  ;;  %3146 = vst [vmem:[%s8051_s9 + $0x78] sm:$0xff] (%p8698_p8), %v3145_v10  ;;  %v3159_v48 = vld [vmem:[%s5879_s11 + $0xb0] sm:$0xff] (%p8698_p8) }
 0x336   : > { %v4652_v43 = vpop.permute.xlu0 %4651  ;;  %v2882_v1 = vsel %vm647_vm2, %v2870_v12, %v2876_v6  ;;  %3148 = vst [vmem:[%s8051_s9 + $0x80] sm:$0xff] (%p8698_p8), %v3147_v53  ;;  %3150 = vst [vmem:[%s8051_s9 + $0x88] sm:$0xff] (%p8698_p8), %v3149_v47 }
 0x337   : > { %v4846_v31 = vadd.low.f32.bf16 %v7892_v3, %v4652_v43  ;;  %v4847_v8 = vadd.high.f32.bf16 %v7887_v4, %v4652_v43  ;;  %v2903_v60 = vadd.f32 %v4844_v22, %v2879_v15  ;;  %v2904_v20 = vadd.f32 %v4845_v19, %v2892_v35  ;;  %v3151_v15 = vld [vmem:[%s5879_s11 + $0x90] sm:$0xff] (%p8698_p8)  ;;  %v3153_v43 = vld [vmem:[%s5879_s11 + $0x98] sm:$0xff] (%p8698_p8)  ;;  %3160 = vst [vmem:[%s8051_s9 + $0x1d0] sm:$0xff] (%p8698_p8), %v3159_v48  ;;  %v3165_v22 = vld [vmem:[%s5879_s11 + $0xc8] sm:$0xff] (%p8698_p8) }
 0x338   : > { %v4667_v33 = vpop.permute.xlu1 %4666  ;;  %v2880_v3 = vsel %vm647_vm2, %v2868_v11, %v2874_v24  ;;  %v2886_v4 = vsel %vm647_vm2, %v2862_v50, %v2868_v11  ;;  %v2893_v36 = vsel %vm647_vm2, %v2875_v25, %v2863_v13  ;;  %v2888_v59 = vsel %vm647_vm2, %v2864_v34, %v2870_v12  ;;  %v3127_v24 = vld [vmem:[%s5879_s11 + $0x30] sm:$0xff] (%p8698_p8)  ;;  %v3139_v13 = vld [vmem:[%s5879_s11 + $0x60] sm:$0xff] (%p8698_p8)  ;;  %3152 = vst [vmem:[%s8051_s9 + $0x1b0] sm:$0xff] (%p8698_p8), %v3151_v15  ;;  %v3161_v35 = vld [vmem:[%s5879_s11 + $0xb8] sm:$0xff] (%p8698_p8) }
 0x339   : > { %v2901_v23 = vadd.f32 %v4846_v31, %v2891_v41  ;;  %v2902_v18 = vadd.f32 %v4847_v8, %v2885_v39  ;;  %3447 = vst.msk [vmem:[%s5879_s11 + $0x1f0] sm:$0xff] %vm326_vm1, %v2903_v60  ;;  %3448 = vst.msk [vmem:[%s5879_s11 + $0x1f8] sm:$0xff] %vm326_vm1, %v2904_v20  ;;  %v4848_v21 = vadd.low.f32.bf16 %v2727_v51, %v4667_v33  ;;  %v3121_v51 = vld [vmem:[%s5879_s11 + $0x18] sm:$0xff] (%p8698_p8)  ;;  %v3135_v50 = vld [vmem:[%s5879_s11 + $0x50] sm:$0xff] (%p8698_p8) }
 0x33a   : > { %v4662_v54 = vpop.permute.xlu0 %4661  ;;  %v4849_v40 = vadd.high.f32.bf16 %v7898_v49, %v4667_v33  ;;  %v2881_v30 = vsel %vm647_vm2, %v2869_v55, %v2875_v25  ;;  %v2894_v7 = vsel %vm647_vm2, %v2876_v6, %v2864_v34  ;;  %v3137_v55 = vld [vmem:[%s5879_s11 + $0x58] sm:$0xff] (%p8698_p8)  ;;  %v3143_v11 = vld [vmem:[%s5879_s11 + $0x70] sm:$0xff] (%p8698_p8)  ;;  %v3155_v39 = vld [vmem:[%s5879_s11 + $0xa0] sm:$0xff] (%p8698_p8)  ;;  %3122 = vst [vmem:[%s8051_s9 + $0x18] sm:$0xff] (%p8698_p8), %v3121_v51 }
 0x33b   : > { %3445 = vst.msk [vmem:[%s5879_s11 + $0x1e0] sm:$0xff] %vm326_vm1, %v2901_v23  ;;  %3446 = vst.msk [vmem:[%s5879_s11 + $0x1e8] sm:$0xff] %vm326_vm1, %v2902_v18  ;;  %v4850_v5 = vadd.low.f32.bf16 %v2725_v42, %v4662_v54  ;;  %v4851_v45 = vadd.high.f32.bf16 %v2726_v52, %v4662_v54  ;;  %v2907_v46 = vadd.f32 %v4848_v21, %v2893_v36  ;;  %v3123_v42 = vld [vmem:[%s5879_s11 + $0x20] sm:$0xff] (%p8698_p8)  ;;  %v3157_v41 = vld [vmem:[%s5879_s11 + $0xa8] sm:$0xff] (%p8698_p8) }
 0x33c   : > { %v4677_v49 = vpop.permute.xlu1 %4676  ;;  %v2908_v29 = vadd.f32 %v4849_v40, %v2887_v28  ;;  %3124 = vst [vmem:[%s8051_s9 + $0x20] sm:$0xff] (%p8698_p8), %v3123_v42  ;;  %3128 = vst [vmem:[%s8051_s9 + $0x30] sm:$0xff] (%p8698_p8), %v3127_v24  ;;  %v3163_v6 = vld [vmem:[%s5879_s11 + $0xc0] sm:$0xff] (%p8698_p8)  ;;  %v3167_v19 = vld [vmem:[%s5879_s11 + $0xd0] sm:$0xff] (%p8698_p8) }
 0x33d   : > { %v2905_v56 = vadd.f32 %v4850_v5, %v2886_v4  ;;  %v2906_v38 = vadd.f32 %v4851_v45, %v2880_v3  ;;  %3451 = vst.msk [vmem:[%s5879_s11 + $0x210] sm:$0xff] %vm326_vm1, %v2907_v46  ;;  %v4852_v14 = vadd.low.f32.bf16 %v2731_v63, %v4677_v49  ;;  %v4853_v0 = vadd.high.f32.bf16 %v2732_v57, %v4677_v49  ;;  %2938 = sbr.rel (!%p8698_p8) target bundleno = 864 (0x360), region = 40  ;;  %v3125_v63 = vld [vmem:[%s5879_s11 + $0x28] sm:$0xff] (%p8698_p8)  ;;  %v3129_v57 = vld [vmem:[%s5879_s11 + $0x38] sm:$0xff] (%p8698_p8)  ;;  %v3171_v12 = vld [vmem:[%s5879_s11 + $0xe0] sm:$0xff] (%p8698_p8) }
 0x33e   : > { %v4672_v2 = vpop.permute.xlu0 %4671  ;;  %3452 = vst.msk [vmem:[%s5879_s11 + $0x218] sm:$0xff] %vm326_vm1, %v2908_v29  ;;  %3126 = vst [vmem:[%s8051_s9 + $0x28] sm:$0xff] (%p8698_p8), %v3125_v63  ;;  %v3169_v28 = vld [vmem:[%s5879_s11 + $0xd8] sm:$0xff] (%p8698_p8)  ;;  %v3173_v25 = vld [vmem:[%s5879_s11 + $0xe8] sm:$0xff] (%p8698_p8) }
 0x33f   : > { %3449 = vst.msk [vmem:[%s5879_s11 + $0x200] sm:$0xff] %vm326_vm1, %v2905_v56  ;;  %3450 = vst.msk [vmem:[%s5879_s11 + $0x208] sm:$0xff] %vm326_vm1, %v2906_v38  ;;  %v4854_v37 = vadd.low.f32.bf16 %v7965_v58, %v4672_v2  ;;  %v4855_v17 = vadd.high.f32.bf16 %v7970_v16, %v4672_v2  ;;  %v2911_v27 = vadd.f32 %v4852_v14, %v2888_v59  ;;  %v3131_v58 = vld [vmem:[%s5879_s11 + $0x40] sm:$0xff] (%p8698_p8)  ;;  %v3133_v16 = vld [vmem:[%s5879_s11 + $0x48] sm:$0xff] (%p8698_p8) }
 0x340   : > { %v2912_v44 = vadd.f32 %v4853_v0, %v2882_v1  ;;  %3130 = vst [vmem:[%s8051_s9 + $0x38] sm:$0xff] (%p8698_p8), %v3129_v57  ;;  %3132 = vst [vmem:[%s8051_s9 + $0x40] sm:$0xff] (%p8698_p8), %v3131_v58  ;;  %v3175_v31 = vld [vmem:[%s5879_s11 + $0xf0] sm:$0xff] (%p8698_p8)  ;;  %v3177_v8 = vld [vmem:[%s5879_s11 + $0xf8] sm:$0xff] (%p8698_p8) }
 0x341   : > { %v2909_v26 = vadd.f32 %v4854_v37, %v2881_v30  ;;  %v2910_v52 = vadd.f32 %v4855_v17, %v2894_v7  ;;  %3455 = vst.msk [vmem:[%s5879_s11 + $0x230] sm:$0xff] %vm326_vm1, %v2911_v27  ;;  %3134 = vst [vmem:[%s8051_s9 + $0x48] sm:$0xff] (%p8698_p8), %v3133_v16  ;;  %v3179_v33 = vld [vmem:[%s5879_s11 + $0x100] sm:$0xff] (%p8698_p8)  ;;  %v3181_v60 = vld [vmem:[%s5879_s11 + $0x108] sm:$0xff] (%p8698_p8) }
 0x342   : > { %3456 = vst.msk [vmem:[%s5879_s11 + $0x238] sm:$0xff] %vm326_vm1, %v2912_v44  ;;  %3136 = vst [vmem:[%s8051_s9 + $0x50] sm:$0xff] (%p8698_p8), %v3135_v50  ;;  %v3183_v20 = vld [vmem:[%s5879_s11 + $0x110] sm:$0xff] (%p8698_p8)  ;;  %v3185_v54 = vld [vmem:[%s5879_s11 + $0x118] sm:$0xff] (%p8698_p8) }
 0x343   : > { %3453 = vst.msk [vmem:[%s5879_s11 + $0x220] sm:$0xff] %vm326_vm1, %v2909_v26  ;;  %3454 = vst.msk [vmem:[%s5879_s11 + $0x228] sm:$0xff] %vm326_vm1, %v2910_v52  ;;  %v3187_v23 = vld [vmem:[%s5879_s11 + $0x120] sm:$0xff] (%p8698_p8)  ;;  %v3189_v18 = vld [vmem:[%s5879_s11 + $0x128] sm:$0xff] (%p8698_p8) }
 0x344   : > { %3138 = vst [vmem:[%s8051_s9 + $0x58] sm:$0xff] %v3137_v55  ;;  %3140 = vst [vmem:[%s8051_s9 + $0x60] sm:$0xff] %v3139_v13  ;;  %v3191_v21 = vld [vmem:[%s5879_s11 + $0x130] sm:$0xff]  ;;  %v3193_v40 = vld [vmem:[%s5879_s11 + $0x138] sm:$0xff] }
 0x345   : > { %3144 = vst [vmem:[%s8051_s9 + $0x70] sm:$0xff] %v3143_v11  ;;  %3154 = vst [vmem:[%s8051_s9 + $0x1b8] sm:$0xff] %v3153_v43  ;;  %v3195_v3 = vld [vmem:[%s5879_s11 + $0x140] sm:$0xff]  ;;  %v3197_v4 = vld [vmem:[%s5879_s11 + $0x148] sm:$0xff] }
 0x346   : > { %3156 = vst [vmem:[%s8051_s9 + $0x1c0] sm:$0xff] %v3155_v39  ;;  %3158 = vst [vmem:[%s8051_s9 + $0x1c8] sm:$0xff] %v3157_v41  ;;  %v3199_v34 = vld [vmem:[%s5879_s11 + $0x150] sm:$0xff]  ;;  %v3201_v36 = vld [vmem:[%s5879_s11 + $0x158] sm:$0xff] }
 0x347   : > { %3162 = vst [vmem:[%s8051_s9 + $0x1d8] sm:$0xff] %v3161_v35  ;;  %3164 = vst [vmem:[%s8051_s9 + $0x1e0] sm:$0xff] %v3163_v6  ;;  %v3203_v5 = vld [vmem:[%s5879_s11 + $0x160] sm:$0xff]  ;;  %v3205_v45 = vld [vmem:[%s5879_s11 + $0x168] sm:$0xff] }
 0x348   : > { %3166 = vst [vmem:[%s8051_s9 + $0x1e8] sm:$0xff] %v3165_v22  ;;  %3168 = vst [vmem:[%s8051_s9 + $0x1f0] sm:$0xff] %v3167_v19  ;;  %v3207_v49 = vld [vmem:[%s5879_s11 + $0x170] sm:$0xff]  ;;  %v3209_v46 = vld [vmem:[%s5879_s11 + $0x178] sm:$0xff] }
 0x349   : > { %3170 = vst [vmem:[%s8051_s9 + $0x1f8] sm:$0xff] %v3169_v28  ;;  %3172 = vst [vmem:[%s8051_s9 + $0x200] sm:$0xff] %v3171_v12  ;;  %v3211_v29 = vld [vmem:[%s5879_s11 + $0x180] sm:$0xff]  ;;  %v3213_v2 = vld [vmem:[%s5879_s11 + $0x188] sm:$0xff] }
 0x34a   : > { %3174 = vst [vmem:[%s8051_s9 + $0x208] sm:$0xff] %v3173_v25  ;;  %3176 = vst [vmem:[%s8051_s9 + $0x210] sm:$0xff] %v3175_v31  ;;  %v3215_v56 = vld [vmem:[%s5879_s11 + $0x190] sm:$0xff]  ;;  %v3217_v38 = vld [vmem:[%s5879_s11 + $0x198] sm:$0xff] }
 0x34b   : > { %3178 = vst [vmem:[%s8051_s9 + $0x218] sm:$0xff] %v3177_v8  ;;  %3180 = vst [vmem:[%s8051_s9 + $0x220] sm:$0xff] %v3179_v33  ;;  %v3219_v14 = vld [vmem:[%s5879_s11 + $0x1a0] sm:$0xff]  ;;  %v3221_v0 = vld [vmem:[%s5879_s11 + $0x1a8] sm:$0xff] }
 0x34c   : > { %3182 = vst [vmem:[%s8051_s9 + $0x228] sm:$0xff] %v3181_v60  ;;  %3184 = vst [vmem:[%s8051_s9 + $0x230] sm:$0xff] %v3183_v20  ;;  %v3223_v1 = vld [vmem:[%s5879_s11 + $0x1b0] sm:$0xff]  ;;  %v3225_v59 = vld [vmem:[%s5879_s11 + $0x1b8] sm:$0xff] }
 0x34d   : > { %3186 = vst [vmem:[%s8051_s9 + $0x238] sm:$0xff] %v3185_v54  ;;  %3188 = vst [vmem:[%s8051_s9 + $0x360] sm:$0xff] %v3187_v23  ;;  %v3227_v37 = vld [vmem:[%s5879_s11 + $0x1c0] sm:$0xff]  ;;  %v3229_v17 = vld [vmem:[%s5879_s11 + $0x1c8] sm:$0xff] }
 0x34e   : > { %3190 = vst [vmem:[%s8051_s9 + $0x368] sm:$0xff] %v3189_v18  ;;  %3192 = vst [vmem:[%s8051_s9 + $0x370] sm:$0xff] %v3191_v21  ;;  %v3231_v27 = vld [vmem:[%s5879_s11 + $0x1d0] sm:$0xff]  ;;  %v3233_v44 = vld [vmem:[%s5879_s11 + $0x1d8] sm:$0xff] }
 0x34f   : > { %3194 = vst [vmem:[%s8051_s9 + $0x378] sm:$0xff] %v3193_v40  ;;  %3196 = vst [vmem:[%s8051_s9 + $0x380] sm:$0xff] %v3195_v3  ;;  %v3235_v30 = vld [vmem:[%s5879_s11 + $0x1e0] sm:$0xff]  ;;  %v3237_v7 = vld [vmem:[%s5879_s11 + $0x1e8] sm:$0xff] }
 0x350   : > { %3198 = vst [vmem:[%s8051_s9 + $0x388] sm:$0xff] %v3197_v4  ;;  %3200 = vst [vmem:[%s8051_s9 + $0x390] sm:$0xff] %v3199_v34  ;;  %v3239_v26 = vld [vmem:[%s5879_s11 + $0x1f0] sm:$0xff]  ;;  %v3241_v52 = vld [vmem:[%s5879_s11 + $0x1f8] sm:$0xff] }
 0x351   : > { %3202 = vst [vmem:[%s8051_s9 + $0x398] sm:$0xff] %v3201_v36  ;;  %3204 = vst [vmem:[%s8051_s9 + $0x3a0] sm:$0xff] %v3203_v5  ;;  %v3243_v62 = vld [vmem:[%s5879_s11 + $0x200] sm:$0xff]  ;;  %v3245_v9 = vld [vmem:[%s5879_s11 + $0x208] sm:$0xff] }
 0x352   : > { %3206 = vst [vmem:[%s8051_s9 + $0x3a8] sm:$0xff] %v3205_v45  ;;  %3208 = vst [vmem:[%s8051_s9 + $0x3b0] sm:$0xff] %v3207_v49  ;;  %v3247_v61 = vld [vmem:[%s5879_s11 + $0x210] sm:$0xff]  ;;  %v3249_v51 = vld [vmem:[%s5879_s11 + $0x218] sm:$0xff] }
 0x353   : > { %3210 = vst [vmem:[%s8051_s9 + $0x3b8] sm:$0xff] %v3209_v46  ;;  %3212 = vst [vmem:[%s8051_s9 + $0x3c0] sm:$0xff] %v3211_v29  ;;  %v3251_v42 = vld [vmem:[%s5879_s11 + $0x220] sm:$0xff]  ;;  %v3253_v63 = vld [vmem:[%s5879_s11 + $0x228] sm:$0xff] }
 0x354   : > { %3214 = vst [vmem:[%s8051_s9 + $0x3c8] sm:$0xff] %v3213_v2  ;;  %3216 = vst [vmem:[%s8051_s9 + $0x3d0] sm:$0xff] %v3215_v56  ;;  %v3255_v24 = vld [vmem:[%s5879_s11 + $0x230] sm:$0xff]  ;;  %v3257_v57 = vld [vmem:[%s5879_s11 + $0x238] sm:$0xff] }
 0x355   : > { %3218 = vst [vmem:[%s8051_s9 + $0x3d8] sm:$0xff] %v3217_v38  ;;  %3220 = vst [vmem:[%s8051_s9 + $0x3e0] sm:$0xff] %v3219_v14 }
 0x356   : > { %3222 = vst [vmem:[%s8051_s9 + $0x3e8] sm:$0xff] %v3221_v0  ;;  %3224 = vst [vmem:[%s8051_s9 + $0x510] sm:$0xff] %v3223_v1 }
 0x357   : > { %3226 = vst [vmem:[%s8051_s9 + $0x518] sm:$0xff] %v3225_v59  ;;  %3228 = vst [vmem:[%s8051_s9 + $0x520] sm:$0xff] %v3227_v37 }
 0x358   : > { %3230 = vst [vmem:[%s8051_s9 + $0x528] sm:$0xff] %v3229_v17  ;;  %3232 = vst [vmem:[%s8051_s9 + $0x530] sm:$0xff] %v3231_v27 }
 0x359   : > { %3234 = vst [vmem:[%s8051_s9 + $0x538] sm:$0xff] %v3233_v44  ;;  %3236 = vst [vmem:[%s8051_s9 + $0x540] sm:$0xff] %v3235_v30 }
 0x35a   : > { %3238 = vst [vmem:[%s8051_s9 + $0x548] sm:$0xff] %v3237_v7  ;;  %3240 = vst [vmem:[%s8051_s9 + $0x550] sm:$0xff] %v3239_v26 }
 0x35b   : > { %3242 = vst [vmem:[%s8051_s9 + $0x558] sm:$0xff] %v3241_v52  ;;  %3244 = vst [vmem:[%s8051_s9 + $0x560] sm:$0xff] %v3243_v62 }
 0x35c   : > { %3246 = vst [vmem:[%s8051_s9 + $0x568] sm:$0xff] %v3245_v9  ;;  %3248 = vst [vmem:[%s8051_s9 + $0x570] sm:$0xff] %v3247_v61 }
 0x35d   : > { %3250 = vst [vmem:[%s8051_s9 + $0x578] sm:$0xff] %v3249_v51  ;;  %3252 = vst [vmem:[%s8051_s9 + $0x580] sm:$0xff] %v3251_v42 }
 0x35e   : > { %3254 = vst [vmem:[%s8051_s9 + $0x588] sm:$0xff] %v3253_v63  ;;  %3256 = vst [vmem:[%s8051_s9 + $0x590] sm:$0xff] %v3255_v24 }
 0x35f   : > { %3258 = vst [vmem:[%s8051_s9 + $0x598] sm:$0xff] %v3257_v57 }
 0x360 PF: > { %s14_s18 = sadd.s32 1, %s4942_s18   ;;  %s8699_s12 = smov %s4922_s13 }
 0x361   : > { %p11_p11 = scmp.ge.s32.totalorder %s14_s18, 8   ;;  %s8700_s13 = smov %s5062_s5 }
 0x362   : > { %s8701_s14 = smov %s4934_s16  ;;  %s8702_s15 = smov %s4938_s17 }
 0x363   : > { %s8703_s16 = smov %s8706_s20  ;;  %s8704_s17 = smov %s8710_s21 }
 0x364   :  { %13 = sbr.rel (!%p11_p11) target bundleno = 4 (0x4), region = 112 }
 0x36b   :  { %3274 = vsyncpa [#allocation3], 1 }
 0x36c   :  { %3276 = vsyncpa [#allocation3 + $0x1], 1 }

</bundles_post_ra>
